<compile_context>
chip_gen: v7x
topology: tpu7x:2x2x1
jax: 0.10.0
libtpu: 0.0.40
codegen_flags: <defaults>
</compile_context>

<pallas_src>
import jax
import jax.numpy as jnp
from jax.experimental import pallas as pl
from jax.experimental.pallas import tpu as pltpu


def _round_up(x, m):
    return (x + m - 1) // m * m


def _cdiv(a, b):
    return -(-a // b)


def _tpu_generation():
    """Returns (max_tm, num_tensorcores, physical_vmem_bytes) for this TPU."""
    try:
        kind = jax.devices()[0].device_kind.lower()
    except Exception:  # no device info available
        kind = ""
    try:
        phys_vmem = int(pltpu.get_tpu_info().vmem_capacity_bytes)
    except Exception:
        phys_vmem = 64 << 20  # conservative per-TC floor (v7x)
    if ("v5 lite" in kind) or ("v5e" in kind) or ("v5lite" in kind):
        return 128, 1, phys_vmem  # v5e: 4x(128x128) MXU -> native M granule 128
    if ("7x" in kind) or ("v7" in kind) or ("tpu7" in kind):
        return 256, 2, phys_vmem  # v7x: 2x(256x256) MXU, 2 TCs/chip, 64 MiB VMEM
    return 256, 1, phys_vmem      # v6e (default): 2x(256x256) MXU, 1 TC


def _choose_tm(B, *, max_tm, num_cores):
    """Batch tile that minimizes zero-padding; prefers a grid divisible by the
    TensorCore count (balanced megacore sharding); never exceeds max_tm."""
    B8 = _round_up(B, 8)
    if B8 <= max_tm:
        return B8
    best_key, best_tm = None, max_tm
    for n in range(_cdiv(B8, max_tm), _cdiv(B8, 8) + 1):
        tm = _round_up(_cdiv(B8, n), 8)
        if tm > max_tm:
            continue
        pad = n * tm - B
        unbalanced = 0 if (num_cores <= 1 or n % num_cores == 0) else 1
        key = (pad, unbalanced, n)
        if best_key is None or key < best_key:
            best_key, best_tm = key, tm
        if pad == B8 - B and unbalanced == 0:
            break  # minimal possible padding with a balanced grid
    return best_tm


def prepare_projection_head_params(w1, b1, w2, b2, matmul_dtype=jnp.bfloat16):
    """One-time param prep (hoisted out of the per-call path).

    Weights are expected in (in, out) layout (PyTorch nn.Linear weight.T).
    Casts W1/W2 to the MXU dtype, reshapes biases to (1, N) f32, and pads
    D_out to a multiple of 128 so kernel stores are lane-dense/unmasked.
    """
    d_in, h = w1.shape
    d_out = w2.shape[1]
    d_out_p = _round_up(max(d_out, 128), 128)
    if d_out_p != d_out:
        w2 = jnp.pad(w2, ((0, 0), (0, d_out_p - d_out)))
        b2 = jnp.pad(b2, (0, d_out_p - d_out))
    return {
        "w1": w1.astype(matmul_dtype),
        "b1": b1.reshape(1, h).astype(jnp.float32),
        "w2": w2.astype(matmul_dtype),
        "b2": b2.reshape(1, d_out_p).astype(jnp.float32),
        "d_out": d_out,
    }


def projection_head_kernel(x_ref, w1_ref, b1_ref, w2_ref, b2_ref, o_ref):
    # Cast x to the MXU dtype in-kernel (x is streamed f32 from HBM).
    x = x_ref[...].astype(w1_ref.dtype)
    # Linear 1 on the MXU, f32 accumulation.
    h = jnp.dot(x, w1_ref[...], preferred_element_type=jnp.float32)
    # Bias + ReLU in f32 on the VPU; b1 is (1, H) and broadcasts over rows.
    h = jnp.maximum(h + b1_ref[...], 0.0)
    # Linear 2: activation back to the weight dtype for the MXU, f32 accum.
    y = jnp.dot(h.astype(w2_ref.dtype), w2_ref[...],
                preferred_element_type=jnp.float32)
    o_ref[...] = (y + b2_ref[...]).astype(o_ref.dtype)


def projection_head(x, params, *, block_m=None):
    """y = relu(x @ W1 + b1) @ W2 + b2 with params from prepare_projection_head_params."""
    out_dtype = x.dtype
    B, D_in = x.shape
    w1, b1, w2, b2 = params["w1"], params["b1"], params["w2"], params["b2"]
    H = w1.shape[1]
    D_out_p = w2.shape[1]
    D_out = params["d_out"]
    assert w1.shape[0] == D_in, (w1.shape, D_in)

    max_tm, num_cores, phys_vmem = _tpu_generation()
    if block_m is not None:
        max_tm = block_m
    tm = _choose_tm(B, max_tm=max_tm, num_cores=num_cores)
    B_p = _round_up(B, tm)
    if B_p != B:
        x = jnp.pad(x, ((0, B_p - B), (0, 0)))
    grid = (B_p // tm,)

    w_isize = jnp.dtype(w1.dtype).itemsize
    x_isize = jnp.dtype(x.dtype).itemsize
    o_isize = jnp.dtype(out_dtype).itemsize
    vmem_cap = max(int(phys_vmem * 0.78), 32 << 20)  # ~100 MiB v5e/v6e, ~50 MiB v7x

    def _call(single_buffer_weights):
        resident_kwargs = (
            {"pipeline_mode": pl.Buffered(1)} if single_buffer_weights else {}
        )
        w_bufs = 1 if single_buffer_weights else 2
        vmem_bytes = (
            (D_in * H + H * D_out_p) * w_isize * w_bufs       # resident W1, W2
            + (H + D_out_p) * 4 * w_bufs                      # resident biases (f32)
            + 2 * tm * D_in * x_isize                         # x tile, double-buffered
            + 2 * tm * D_out_p * o_isize                      # out tile, double-buffered
            + tm * (H + D_out_p) * 4                          # in-kernel f32 h / y
            + (4 << 20)                                       # headroom
        )
        vmem_limit = int(min(max(vmem_bytes, 16 << 20), vmem_cap))
        in_specs = [
            pl.BlockSpec((tm, D_in), lambda i: (i, 0)),                        # streamed
            pl.BlockSpec((D_in, H), lambda i: (0, 0), **resident_kwargs),      # resident
            pl.BlockSpec((1, H), lambda i: (0, 0), **resident_kwargs),         # resident
            pl.BlockSpec((H, D_out_p), lambda i: (0, 0), **resident_kwargs),   # resident
            pl.BlockSpec((1, D_out_p), lambda i: (0, 0), **resident_kwargs),   # resident
        ]
        return pl.pallas_call(
            projection_head_kernel,
            out_shape=jax.ShapeDtypeStruct((B_p, D_out_p), out_dtype),
            grid=grid,
            in_specs=in_specs,
            out_specs=pl.BlockSpec((tm, D_out_p), lambda i: (i, 0)),
            compiler_params=pltpu.CompilerParams(
                dimension_semantics=("parallel",),   # batch tiles -> megacore shards
                vmem_limit_bytes=vmem_limit,
            ),
        )(x, w1, b1, w2, b2)

    try:
        # Preferred: constant-index weights held in a single VMEM buffer.
        out = _call(True)
    except Exception:
        # Fallback for Pallas versions without Buffered(1) support on pallas_call.
        out = _call(False)

    return out[:B, :D_out]


def init_projection_head_params(key, input_dim, hidden_dim, output_dim,
                                dtype=jnp.float32):
    """PyTorch nn.Linear-style init (uniform, bound 1/sqrt(fan_in)); weights
    returned already transposed to (in, out)."""
    k1, k2, k3, k4 = jax.random.split(key, 4)
    bound1 = 1.0 / (input_dim ** 0.5)
    bound2 = 1.0 / (hidden_dim ** 0.5)
    w1 = jax.random.uniform(k1, (input_dim, hidden_dim), dtype, -bound1, bound1)
    b1 = jax.random.uniform(k2, (hidden_dim,), dtype, -bound1, bound1)
    w2 = jax.random.uniform(k3, (hidden_dim, output_dim), dtype, -bound2, bound2)
    b2 = jax.random.uniform(k4, (output_dim,), dtype, -bound2, bound2)
    return w1, b1, w2, b2


if __name__ == "__main__":
    root_key = jax.random.PRNGKey(0)

    def run_case(case_id, B, D_IN, HID, D_OUT):
        kx, kp = jax.random.split(jax.random.fold_in(root_key, case_id))
        x = jax.random.normal(kx, (B, D_IN), jnp.float32)
        w1, b1, w2, b2 = init_projection_head_params(kp, D_IN, HID, D_OUT)
        params = prepare_projection_head_params(w1, b1, w2, b2)  # one-time prep

        out = jax.block_until_ready(projection_head(x, params))
        assert out.shape == (B, D_OUT), out.shape

        # Mixed-precision reference mirroring the kernel math
        # (bf16 operands, f32 accumulation / bias / ReLU).
        xb = x.astype(jnp.bfloat16).astype(jnp.float32)
        w1b = w1.astype(jnp.bfloat16).astype(jnp.float32)
        w2b = w2.astype(jnp.bfloat16).astype(jnp.float32)
        h_ref = jnp.maximum(xb @ w1b + b1, 0.0)
        ref = h_ref.astype(jnp.bfloat16).astype(jnp.float32) @ w2b + b2
        err = float(jnp.max(jnp.abs(out - ref)))
        assert jnp.allclose(out, ref, atol=2e-2, rtol=2e-2), err

    # Module defaults (input_dim=960, hidden=512, output=128). B=384 exercises
    # the padding-free tiling: tm=192/grid=2 on v6e/v7x, tm=128/grid=3 on v5e.
    run_case(0, 384, 960, 512, 128)
    # Ragged shapes: batch pad (13 -> 16 rows) + D_out lane pad (40 -> 128).
    run_case(1, 13, 96, 72, 40)

    print("KERNEL_OK")
</pallas_src>

<mosaic_0001>
module attributes {stable_mosaic.version = 11 : i64} {
  func.func @projection_head_kernel(%arg0: i32, %arg1: memref<192x960xf32, #tpu.memory_space<vmem>>, %arg2: memref<960x512xbf16, #tpu.memory_space<vmem>>, %arg3: memref<1x512xf32, #tpu.memory_space<vmem>>, %arg4: memref<512x128xbf16, #tpu.memory_space<vmem>>, %arg5: memref<1x128xf32, #tpu.memory_space<vmem>>, %arg6: memref<192x128xf32, #tpu.memory_space<vmem>>) attributes {dimension_semantics = [#tpu.dimension_semantics<parallel>], iteration_bounds = array<i64: 2>, scalar_prefetch = 0 : i64, scratch_operands = 0 : i64, tpu.core_type = #tpu.core_type<tc>, window_params = [{transform_indices = @transform_0, window_bounds = array<i64: 192, 960>}, {pipeline_mode = #tpu.pipeline_mode<synchronous>, transform_indices = @transform_1, window_bounds = array<i64: 960, 512>}, {pipeline_mode = #tpu.pipeline_mode<synchronous>, transform_indices = @transform_2, window_bounds = array<i64: 1, 512>}, {pipeline_mode = #tpu.pipeline_mode<synchronous>, transform_indices = @transform_3, window_bounds = array<i64: 512, 128>}, {pipeline_mode = #tpu.pipeline_mode<synchronous>, transform_indices = @transform_4, window_bounds = array<i64: 1, 128>}, {transform_indices = @transform_5, window_bounds = array<i64: 192, 128>}]} {
    %c0 = arith.constant 0 : index
    %c0_0 = arith.constant 0 : index
    %0 = vector.load %arg1[%c0, %c0_0] : memref<192x960xf32, #tpu.memory_space<vmem>>, vector<192x960xf32>
    %1 = arith.truncf %0 : vector<192x960xf32> to vector<192x960xbf16>
    %c0_1 = arith.constant 0 : index
    %c0_2 = arith.constant 0 : index
    %2 = vector.load %arg2[%c0_1, %c0_2] : memref<960x512xbf16, #tpu.memory_space<vmem>>, vector<960x512xbf16>
    %cst = arith.constant dense<0.000000e+00> : vector<192x512xf32>
    %3 = tpu.matmul %1, %2, %cst {dimension_numbers = #tpu.dot_dimension_numbers<[1], [0], [0], [1], [0, 0, 1, 1], [], []>} : vector<192x960xbf16>, vector<960x512xbf16>, vector<192x512xf32> -> vector<192x512xf32>
    %c0_3 = arith.constant 0 : index
    %c0_4 = arith.constant 0 : index
    %4 = vector.load %arg3[%c0_3, %c0_4] : memref<1x512xf32, #tpu.memory_space<vmem>>, vector<1x512xf32>
    %5 = vector.broadcast %4 : vector<1x512xf32> to vector<192x512xf32>
    %6 = arith.addf %3, %5 : vector<192x512xf32>
    %cst_5 = arith.constant 0.000000e+00 : f32
    %7 = vector.broadcast %cst_5 : f32 to vector<192x512xf32>
    %8 = arith.maximumf %6, %7 : vector<192x512xf32>
    %9 = arith.truncf %8 : vector<192x512xf32> to vector<192x512xbf16>
    %c0_6 = arith.constant 0 : index
    %c0_7 = arith.constant 0 : index
    %10 = vector.load %arg4[%c0_6, %c0_7] : memref<512x128xbf16, #tpu.memory_space<vmem>>, vector<512x128xbf16>
    %cst_8 = arith.constant dense<0.000000e+00> : vector<192x128xf32>
    %11 = tpu.matmul %9, %10, %cst_8 {dimension_numbers = #tpu.dot_dimension_numbers<[1], [0], [0], [1], [0, 0, 1, 1], [], []>} : vector<192x512xbf16>, vector<512x128xbf16>, vector<192x128xf32> -> vector<192x128xf32>
    %c0_9 = arith.constant 0 : index
    %c0_10 = arith.constant 0 : index
    %12 = vector.load %arg5[%c0_9, %c0_10] : memref<1x128xf32, #tpu.memory_space<vmem>>, vector<1x128xf32>
    %13 = vector.broadcast %12 : vector<1x128xf32> to vector<192x128xf32>
    %14 = arith.addf %11, %13 : vector<192x128xf32>
    %c0_11 = arith.constant 0 : index
    %c0_12 = arith.constant 0 : index
    %15 = vector.load %arg6[%c0_11, %c0_12] : memref<192x128xf32, #tpu.memory_space<vmem>>, vector<192x128xf32>
    tpu.vector_store %arg6[%c0_11, %c0_12], %14 {strides = array<i32>} : memref<192x128xf32, #tpu.memory_space<vmem>>, vector<192x128xf32>,
    return
  }
  func.func @transform_0(%arg0: i32) -> (i32, i32) {
    %c0_i32 = arith.constant 0 : i32
    %c0_i32_0 = arith.constant 0 : i32
    return %arg0, %c0_i32 : i32, i32
  }
  func.func @transform_1(%arg0: i32) -> (i32, i32) {
    %c0_i32 = arith.constant 0 : i32
    %c0_i32_0 = arith.constant 0 : i32
    %c0_i32_1 = arith.constant 0 : i32
    return %c0_i32, %c0_i32_0 : i32, i32
  }
  func.func @transform_2(%arg0: i32) -> (i32, i32) {
    %c0_i32 = arith.constant 0 : i32
    %c0_i32_0 = arith.constant 0 : i32
    %c0_i32_1 = arith.constant 0 : i32
    return %c0_i32, %c0_i32_0 : i32, i32
  }
  func.func @transform_3(%arg0: i32) -> (i32, i32) {
    %c0_i32 = arith.constant 0 : i32
    %c0_i32_0 = arith.constant 0 : i32
    %c0_i32_1 = arith.constant 0 : i32
    return %c0_i32, %c0_i32_0 : i32, i32
  }
  func.func @transform_4(%arg0: i32) -> (i32, i32) {
    %c0_i32 = arith.constant 0 : i32
    %c0_i32_0 = arith.constant 0 : i32
    %c0_i32_1 = arith.constant 0 : i32
    return %c0_i32, %c0_i32_0 : i32, i32
  }
  func.func @transform_5(%arg0: i32) -> (i32, i32) {
    %c0_i32 = arith.constant 0 : i32
    %c0_i32_0 = arith.constant 0 : i32
    return %arg0, %c0_i32 : i32, i32
  }
}

module attributes {stable_mosaic.version = 11 : i64} {
  func.func @projection_head_kernel(%arg0: i32, %arg1: memref<192x960xf32, #tpu.memory_space<vmem>>, %arg2: memref<960x512xbf16, #tpu.memory_space<vmem>>, %arg3: memref<1x512xf32, #tpu.memory_space<vmem>>, %arg4: memref<512x128xbf16, #tpu.memory_space<vmem>>, %arg5: memref<1x128xf32, #tpu.memory_space<vmem>>, %arg6: memref<192x128xf32, #tpu.memory_space<vmem>>) attributes {dimension_semantics = [#tpu.dimension_semantics<parallel>], iteration_bounds = array<i64: 2>, scalar_prefetch = 0 : i64, scratch_operands = 0 : i64, tpu.core_type = #tpu.core_type<tc>, window_params = [{transform_indices = @transform_0, window_bounds = array<i64: 192, 960>}, {pipeline_mode = #tpu.pipeline_mode<synchronous>, transform_indices = @transform_1, window_bounds = array<i64: 960, 512>}, {pipeline_mode = #tpu.pipeline_mode<synchronous>, transform_indices = @transform_2, window_bounds = array<i64: 1, 512>}, {pipeline_mode = #tpu.pipeline_mode<synchronous>, transform_indices = @transform_3, window_bounds = array<i64: 512, 128>}, {pipeline_mode = #tpu.pipeline_mode<synchronous>, transform_indices = @transform_4, window_bounds = array<i64: 1, 128>}, {transform_indices = @transform_5, window_bounds = array<i64: 192, 128>}]} {
    %c0 = arith.constant 0 : index
    %c0_0 = arith.constant 0 : index
    %0 = vector.load %arg1[%c0, %c0_0] : memref<192x960xf32, #tpu.memory_space<vmem>>, vector<192x960xf32>
    %1 = arith.truncf %0 : vector<192x960xf32> to vector<192x960xbf16>
    %c0_1 = arith.constant 0 : index
    %c0_2 = arith.constant 0 : index
    %2 = vector.load %arg2[%c0_1, %c0_2] : memref<960x512xbf16, #tpu.memory_space<vmem>>, vector<960x512xbf16>
    %cst = arith.constant dense<0.000000e+00> : vector<192x512xf32>
    %3 = tpu.matmul %1, %2, %cst {dimension_numbers = #tpu.dot_dimension_numbers<[1], [0], [0], [1], [0, 0, 1, 1], [], []>} : vector<192x960xbf16>, vector<960x512xbf16>, vector<192x512xf32> -> vector<192x512xf32>
    %c0_3 = arith.constant 0 : index
    %c0_4 = arith.constant 0 : index
    %4 = vector.load %arg3[%c0_3, %c0_4] : memref<1x512xf32, #tpu.memory_space<vmem>>, vector<1x512xf32>
    %5 = vector.broadcast %4 : vector<1x512xf32> to vector<192x512xf32>
    %6 = arith.addf %3, %5 : vector<192x512xf32>
    %cst_5 = arith.constant 0.000000e+00 : f32
    %7 = vector.broadcast %cst_5 : f32 to vector<192x512xf32>
    %8 = arith.maximumf %6, %7 : vector<192x512xf32>
    %9 = arith.truncf %8 : vector<192x512xf32> to vector<192x512xbf16>
    %c0_6 = arith.constant 0 : index
    %c0_7 = arith.constant 0 : index
    %10 = vector.load %arg4[%c0_6, %c0_7] : memref<512x128xbf16, #tpu.memory_space<vmem>>, vector<512x128xbf16>
    %cst_8 = arith.constant dense<0.000000e+00> : vector<192x128xf32>
    %11 = tpu.matmul %9, %10, %cst_8 {dimension_numbers = #tpu.dot_dimension_numbers<[1], [0], [0], [1], [0, 0, 1, 1], [], []>} : vector<192x512xbf16>, vector<512x128xbf16>, vector<192x128xf32> -> vector<192x128xf32>
    %c0_9 = arith.constant 0 : index
    %c0_10 = arith.constant 0 : index
    %12 = vector.load %arg5[%c0_9, %c0_10] : memref<1x128xf32, #tpu.memory_space<vmem>>, vector<1x128xf32>
    %13 = vector.broadcast %12 : vector<1x128xf32> to vector<192x128xf32>
    %14 = arith.addf %11, %13 : vector<192x128xf32>
    %c0_11 = arith.constant 0 : index
    %c0_12 = arith.constant 0 : index
    %15 = vector.load %arg6[%c0_11, %c0_12] : memref<192x128xf32, #tpu.memory_space<vmem>>, vector<192x128xf32>
    tpu.vector_store %arg6[%c0_11, %c0_12], %14 {strides = array<i32>} : memref<192x128xf32, #tpu.memory_space<vmem>>, vector<192x128xf32>,
    return
  }
  func.func @transform_0(%arg0: i32) -> (i32, i32) {
    %c0_i32 = arith.constant 0 : i32
    %c0_i32_0 = arith.constant 0 : i32
    return %arg0, %c0_i32 : i32, i32
  }
  func.func @transform_1(%arg0: i32) -> (i32, i32) {
    %c0_i32 = arith.constant 0 : i32
    %c0_i32_0 = arith.constant 0 : i32
    %c0_i32_1 = arith.constant 0 : i32
    return %c0_i32, %c0_i32_0 : i32, i32
  }
  func.func @transform_2(%arg0: i32) -> (i32, i32) {
    %c0_i32 = arith.constant 0 : i32
    %c0_i32_0 = arith.constant 0 : i32
    %c0_i32_1 = arith.constant 0 : i32
    return %c0_i32, %c0_i32_0 : i32, i32
  }
  func.func @transform_3(%arg0: i32) -> (i32, i32) {
    %c0_i32 = arith.constant 0 : i32
    %c0_i32_0 = arith.constant 0 : i32
    %c0_i32_1 = arith.constant 0 : i32
    return %c0_i32, %c0_i32_0 : i32, i32
  }
  func.func @transform_4(%arg0: i32) -> (i32, i32) {
    %c0_i32 = arith.constant 0 : i32
    %c0_i32_0 = arith.constant 0 : i32
    %c0_i32_1 = arith.constant 0 : i32
    return %c0_i32, %c0_i32_0 : i32, i32
  }
  func.func @transform_5(%arg0: i32) -> (i32, i32) {
    %c0_i32 = arith.constant 0 : i32
    %c0_i32_0 = arith.constant 0 : i32
    return %arg0, %c0_i32 : i32, i32
  }
}

</mosaic_0001>

<bundles_post_ra>
// kernel: tpu_custom_call.1
= control target key start
LH: loop header
LB: loop body
LE: loop exit
PB: predicated region body
PF: predicated region fallthrough
CT: control target
= control target key end

     0   :  { %10 = vsyncpa [#allocation3], 0  ;;  %s6708_s0 = inlined_call_operand.vmem [shape: f32[384,960], index: 0, kind: input, shape index: {}]   ;;  %s6709_s1 = inlined_call_operand.vmem [shape: bf16[960,512], index: 1, kind: input, shape index: {}]   ;;  %s6710_s2 = inlined_call_operand.vmem [shape: f32[1,512], index: 2, kind: input, shape index: {}]   ;;  %s6711_s3 = inlined_call_operand.vmem [shape: bf16[512,128], index: 3, kind: input, shape index: {}]   ;;  %s6712_s4 = inlined_call_operand.vmem [shape: f32[1,128], index: 4, kind: input, shape index: {}]   ;;  %s6713_s5 = inlined_call_operand.hbm [shape: f32[384,128], index: 5, kind: output, shape index: {}]  }
   0x1   :  { %12 = vsyncpa [#allocation3 + $0x1], 0  ;;  %s5405_s18 = smov 0   ;;  %s5407_s19 = smov 0  }
   0x2   :  { %s5409_s20 = smov 0   ;;  %s5411_s21 = smov 0  }
   0x3 LB: > { %s5426_s22 = sadd.s32 4294967295, %s5370_s21   ;;  %s4006_s23 = sadd.s32 4294967294, %s5370_s21   ;;  %s5370_s21 = sphi %s5411_s21, %s6719_s21   ;;  %s5366_s20 = sphi %s5409_s20, %s6718_s20   ;;  %s5362_s19 = sphi %s5407_s19, %s6717_s19   ;;  %s5358_s18 = sphi %s5405_s18, %s6716_s18  }
   0x4   : > { %s5430_s24 = sadd.s32 1, %s5370_s21   ;;  %s135_s25 = sadd.s32 1, %s5366_s20 }
   0x5   : > { %s132_s26 = ssub.s32 %s5370_s21, %s5430_s24  ;;  %p145_p0 = scmp.ne.s32.totalorder %s5366_s20, %s5362_s19 }
   0x6   : > { %p133_p1 = scmp.eq.s32.totalorder %s132_s26, 0  ;;  %p146_p2 = scmp.eq.s32.totalorder %s5426_s22, 1 }
   0x7   : > { %p151_p3 = scmp.ne.s32.totalorder %s5362_s19, %s5358_s18  ;;  %p152_p4 = scmp.eq.s32.totalorder %s4006_s23, 1 }
   0x8   : > { %s5441_s27 = scalar_select %p133_p1, %s5366_s20, %s135_s25  }
   0x9   : > { %p5443_p5 = por %p146_p2, %p145_p0  ;;  %p5447_p6 = por %p152_p4, %p151_p3 }
   0xa   : > { %p4009_p7 = scmp.ge.s32.totalorder %s5370_s21, 1  ;;  %p192_p8 = scmp.lt.s32.totalorder %s5370_s21, 3 }
   0xc   : > { %p193_p9 = pnand %p4009_p7, %p192_p8 }
   0xd   : > { %v4916_v0 = vld [vmem:[%s6709_s1 + $0x4] ss:$16 sps:$4 sm:$0xff] (!%p193_p9)   ;;  %v4918_v1 = vld [vmem:[%s6709_s1 + $0xc] ss:$16 sps:$4 sm:$0xff] (!%p193_p9)   ;;  %v4920_v2 = vld [vmem:[%s6709_s1] ss:$16 sps:$4 sm:$0xff] (!%p193_p9)  }
   0xe   : > { %196 = sbr.rel (%p193_p9) target bundleno = 912 (0x390), region = 40  ;;  %2017 = vmatprep.subr.bf16.mxu0 (!%p193_p9), %v4916_v0  ;;  %v4921_v3 = vld [vmem:[%s6709_s1 + $0x8] ss:$16 sps:$4 sm:$0xff] (!%p193_p9)   ;;  %2629 = vmatprep.subr.bf16.mxu1 (!%p193_p9), %v4918_v1  ;;  %v4922_v4 = vld [vmem:[%s6709_s1 + $0x24] ss:$16 sps:$4 sm:$0xff] (!%p193_p9)   ;;  %vm1980_vm0 = vcmask (!%p193_p9), 523264  }
   0xf   : > { %2018 = vmatpush1.bf16.msra.mxu0 (!%p193_p9), %v4920_v2  ;;  %2630 = vmatpush1.bf16.msra.mxu1 (!%p193_p9), %v4921_v3  ;;  %v4924_v5 = vld [vmem:[%s6709_s1 + $0x2c] ss:$16 sps:$4 sm:$0xff] (!%p193_p9)   ;;  %v4926_v6 = vld [vmem:[%s6709_s1 + $0x20] ss:$16 sps:$4 sm:$0xff] (!%p193_p9)   ;;  %v4927_v7 = vld [vmem:[%s6709_s1 + $0x28] ss:$16 sps:$4 sm:$0xff] (!%p193_p9)  }
  0x10   : > { %2019 = vmatprep.subr.bf16.mxu0 (!%p193_p9), %v4922_v4  ;;  %2631 = vmatprep.subr.bf16.mxu1 (!%p193_p9), %v4924_v5  ;;  %v4928_v8 = vld [vmem:[%s6709_s1 + $0x44] ss:$16 sps:$4 sm:$0xff] (!%p193_p9)   ;;  %v4930_v9 = vld [vmem:[%s6709_s1 + $0x4c] ss:$16 sps:$4 sm:$0xff] (!%p193_p9)   ;;  %v4932_v10 = vld [vmem:[%s6709_s1 + $0x40] ss:$16 sps:$4 sm:$0xff] (!%p193_p9)  }
  0x11   : > { %v4933_v11 = vld [vmem:[%s6709_s1 + $0x48] ss:$16 sps:$4 sm:$0xff] (!%p193_p9)   ;;  %v4934_v12 = vld [vmem:[%s6709_s1 + $0x64] ss:$16 sps:$4 sm:$0xff] (!%p193_p9)   ;;  %v4936_v13 = vld [vmem:[%s6709_s1 + $0x6c] ss:$16 sps:$4 sm:$0xff] (!%p193_p9)  }
  0x12   : > { %v4938_v14 = vld [vmem:[%s6709_s1 + $0x60] ss:$16 sps:$4 sm:$0xff] (!%p193_p9)   ;;  %v4939_v15 = vld [vmem:[%s6709_s1 + $0x68] ss:$16 sps:$4 sm:$0xff] (!%p193_p9)   ;;  %v4940_v16 = vld [vmem:[%s6709_s1 + $0x84] ss:$16 sps:$4 sm:$0xff] (!%p193_p9)  }
  0x13   : > { %2020 = vmatpush1.bf16.msra.mxu0 (!%p193_p9), %v4926_v6  ;;  %2632 = vmatpush1.bf16.msra.mxu1 (!%p193_p9), %v4927_v7  ;;  %v4942_v17 = vld [vmem:[%s6709_s1 + $0x8c] ss:$16 sps:$4 sm:$0xff] (!%p193_p9)   ;;  %v4944_v18 = vld [vmem:[%s6709_s1 + $0x80] ss:$16 sps:$4 sm:$0xff] (!%p193_p9)   ;;  %v4945_v19 = vld [vmem:[%s6709_s1 + $0x88] ss:$16 sps:$4 sm:$0xff] (!%p193_p9)  }
  0x14   : > { %2021 = vmatprep.subr.bf16.mxu0 (!%p193_p9), %v4928_v8  ;;  %2633 = vmatprep.subr.bf16.mxu1 (!%p193_p9), %v4930_v9  ;;  %v4946_v20 = vld [vmem:[%s6709_s1 + $0xa4] ss:$16 sps:$4 sm:$0xff] (!%p193_p9)   ;;  %v4948_v21 = vld [vmem:[%s6709_s1 + $0xac] ss:$16 sps:$4 sm:$0xff] (!%p193_p9)   ;;  %v4950_v22 = vld [vmem:[%s6709_s1 + $0xa0] ss:$16 sps:$4 sm:$0xff] (!%p193_p9)  }
  0x15   : > { %v4951_v23 = vld [vmem:[%s6709_s1 + $0xa8] ss:$16 sps:$4 sm:$0xff]   ;;  %v4952_v24 = vld [vmem:[%s6709_s1 + $0xc4] ss:$16 sps:$4 sm:$0xff]   ;;  %v4954_v25 = vld [vmem:[%s6709_s1 + $0xcc] ss:$16 sps:$4 sm:$0xff]  }
  0x16   : > { %v4956_v26 = vld [vmem:[%s6709_s1 + $0xc0] ss:$16 sps:$4 sm:$0xff]   ;;  %v4957_v27 = vld [vmem:[%s6709_s1 + $0xc8] ss:$16 sps:$4 sm:$0xff]   ;;  %v4958_v28 = vld [vmem:[%s6709_s1 + $0xe4] ss:$16 sps:$4 sm:$0xff]  }
  0x17   : > { %2022 = vmatpush1.bf16.msra.mxu0 %v4932_v10  ;;  %2634 = vmatpush1.bf16.msra.mxu1 %v4933_v11  ;;  %s221_s15 = smul.u32 24, %s5426_s22  ;;  %v4960_v29 = vld [vmem:[%s6709_s1 + $0xec] ss:$16 sps:$4 sm:$0xff]   ;;  %v4962_v30 = vld [vmem:[%s6709_s1 + $0xe0] ss:$16 sps:$4 sm:$0xff]   ;;  %s218_s10 = sand.u32 1, %s5362_s19  }
  0x18   : > { %2023 = vmatprep.subr.bf16.mxu0 %v4934_v12  ;;  %2635 = vmatprep.subr.bf16.mxu1 %v4936_v13  ;;  %v4963_v31 = vld [vmem:[%s6709_s1 + $0xe8] ss:$16 sps:$4 sm:$0xff]   ;;  %v4964_v32 = vld [vmem:[%s6709_s1 + $0x104] ss:$16 sps:$4 sm:$0xff]   ;;  %v4966_v33 = vld [vmem:[%s6709_s1 + $0x10c] ss:$16 sps:$4 sm:$0xff]  }
  0x19   : > { %p222_p10 = scmp.lt.s32.totalorder %s221_s15, 47  ;;  %v4968_v34 = vld [vmem:[%s6709_s1 + $0x100] ss:$16 sps:$4 sm:$0xff]   ;;  %v4969_v35 = vld [vmem:[%s6709_s1 + $0x108] ss:$16 sps:$4 sm:$0xff]   ;;  %s4874_s13 = smul.u32 192, %s218_s10 }
  0x1a   : > { %v4970_v36 = vld [vmem:[%s6709_s1 + $0x124] ss:$16 sps:$4 sm:$0xff]   ;;  %v4972_v37 = vld [vmem:[%s6709_s1 + $0x12c] ss:$16 sps:$4 sm:$0xff]   ;;  %v4974_v38 = vld [vmem:[%s6709_s1 + $0x120] ss:$16 sps:$4 sm:$0xff]  }
  0x1b   : > { %2024 = vmatpush1.bf16.msra.mxu0 %v4938_v14  ;;  %2636 = vmatpush1.bf16.msra.mxu1 %v4939_v15  ;;  %s6721_s15 = smov (!%p222_p10, %s221_s15), 47  ;;  %v4975_v39 = vld [vmem:[%s6709_s1 + $0x128] ss:$16 sps:$4 sm:$0xff]   ;;  %v4976_v40 = vld [vmem:[%s6709_s1 + $0x144] ss:$16 sps:$4 sm:$0xff]   ;;  %s6608_s14 = scalar_lea.vmem [#allocation2], %s4874_s13 }
  0x1c   : > { %2025 = vmatprep.subr.bf16.mxu0 %v4940_v16  ;;  %2637 = vmatprep.subr.bf16.mxu1 %v4942_v17  ;;  %s4312_s9 = sshll.u32 %s6721_s15, 6  ;;  %v4978_v41 = vld [vmem:[%s6709_s1 + $0x14c] ss:$16 sps:$4 sm:$0xff]   ;;  %v4980_v42 = vld [vmem:[%s6709_s1 + $0x140] ss:$16 sps:$4 sm:$0xff]   ;;  %s4313_s16 = smul.u32 3072, %s5426_s22 }
  0x1d   : > { %v4981_v43 = vld [vmem:[%s6709_s1 + $0x148] ss:$16 sps:$4 sm:$0xff]   ;;  %s5589_s25 = scalar_lea.vmem %s6708_s0, %s4312_s9  ;;  %v4982_v44 = vld [vmem:[%s6709_s1 + $0x164] ss:$16 sps:$4 sm:$0xff]   ;;  %v4984_v45 = vld [vmem:[%s6709_s1 + $0x16c] ss:$16 sps:$4 sm:$0xff]  }
  0x1e   : > { %v231_v46 = vld [vmem:[%s5589_s25 + $0x8] sm:$0xff]  ;;  %v4986_v47 = vld [vmem:[%s6709_s1 + $0x160] ss:$16 sps:$4 sm:$0xff]   ;;  %v4988_v50 = vld [vmem:[%s6709_s1 + $0x184] ss:$16 sps:$4 sm:$0xff]   ;;  %s3944_s17 = sshll.u32 %s6608_s14, 4  ;;  %s6659_s26 = scalar_lea.hbm %s6713_s5, %s4313_s16  ;;  %s6661_s17 = int_to_ptr.vmem [resolvable:$true] %s3944_s17 }
  0x1f   : > { %2026 = vmatpush1.bf16.msra.mxu0 %v4944_v18  ;;  %2638 = vmatpush1.bf16.msra.mxu1 %v4945_v19  ;;  %v4987_v48 = vld [vmem:[%s6709_s1 + $0x168] ss:$16 sps:$4 sm:$0xff]   ;;  %v4990_v52 = vld [vmem:[%s6709_s1 + $0x18c] ss:$16 sps:$4 sm:$0xff]   ;;  %v4992_v53 = vld [vmem:[%s6709_s1 + $0x180] ss:$16 sps:$4 sm:$0xff]  }
  0x20   : > { %2027 = vmatprep.subr.bf16.mxu0 %v4946_v20  ;;  %2639 = vmatprep.subr.bf16.mxu1 %v4948_v21  ;;  %v239_v49 = vld [vmem:[%s5589_s25 + $0x48] sm:$0xff]  ;;  %v4994_v55 = vld [vmem:[%s6709_s1 + $0x1a4] ss:$16 sps:$4 sm:$0xff]   ;;  %v4998_v57 = vld [vmem:[%s6709_s1 + $0x1a0] ss:$16 sps:$4 sm:$0xff]   ;;  %s6667_s22 = scalar_lea.sflag [#allocation3], %s218_s10 }
  0x21   : > { %v423_v51 = vpack.c.bf16 %v239_v49, %v231_v46  ;;  %v4993_v54 = vld [vmem:[%s6709_s1 + $0x188] ss:$16 sps:$4 sm:$0xff]   ;;  %v4996_v56 = vld [vmem:[%s6709_s1 + $0x1ac] ss:$16 sps:$4 sm:$0xff]   ;;  %v5000_v59 = vld [vmem:[%s6709_s1 + $0x1c4] ss:$16 sps:$4 sm:$0xff]  }
  0x22   : > { %v4999_v58 = vld [vmem:[%s6709_s1 + $0x1a8] ss:$16 sps:$4 sm:$0xff]   ;;  %v5002_v60 = vld [vmem:[%s6709_s1 + $0x1cc] ss:$16 sps:$4 sm:$0xff]   ;;  %v5004_v61 = vld [vmem:[%s6709_s1 + $0x1c0] ss:$16 sps:$4 sm:$0xff]  }
  0x23   : > { %2028 = vmatpush1.bf16.msra.mxu0 %v4950_v22  ;;  %2640 = vmatpush1.bf16.msra.mxu1 %v4951_v23  ;;  %v5005_v62 = vld [vmem:[%s6709_s1 + $0x1c8] ss:$16 sps:$4 sm:$0xff]   ;;  %v5006_v63 = vld [vmem:[%s6709_s1 + $0x1e4] ss:$16 sps:$4 sm:$0xff]   ;;  %v5008_v0 = vld [vmem:[%s6709_s1 + $0x1ec] ss:$16 sps:$4 sm:$0xff]  }
  0x24   : > { %2029 = vmatprep.subr.bf16.mxu0 %v4952_v24  ;;  %2641 = vmatprep.subr.bf16.mxu1 %v4954_v25  ;;  %v5010_v1 = vld [vmem:[%s6709_s1 + $0x1e0] ss:$16 sps:$4 sm:$0xff]   ;;  %v5011_v2 = vld [vmem:[%s6709_s1 + $0x1e8] ss:$16 sps:$4 sm:$0xff]   ;;  %v5014_v5 = vld [vmem:[%s6709_s1 + $0x204] ss:$16 sps:$4 sm:$0xff]  }
  0x25   : > { %2049 = vmatprep.mubr.bf16.mxu0 %v423_v51  ;;  %2661 = vmatprep.mubr.bf16.mxu1 %v423_v51  ;;  %v230_v3 = vld [vmem:[%s5589_s25] sm:$0xff]  ;;  %v5017_v6 = vld [vmem:[%s6709_s1 + $0x20c] ss:$16 sps:$4 sm:$0xff]   ;;  %v5015_v11 = vld [vmem:[%s6709_s1 + $0x208] ss:$16 sps:$4 sm:$0xff]   ;;  %s5308_s30 = scalar_lea.vmem %s6661_s17, 3072 }
  0x26   : > { %v238_v4 = vld [vmem:[%s5589_s25 + $0x40] sm:$0xff]  ;;  %v247_v7 = vld [vmem:[%s5589_s25 + $0x88] sm:$0xff]  ;;  %p5309_p11 = scmp.ne.s32.totalorder %s6661_s17, %s5308_s30  ;;  %s5372_s6 = smov [#allocation2]  }
  0x27   : > { %2030 = vmatpush1.bf16.msra.mxu0 %v4956_v26  ;;  %2642 = vmatpush1.bf16.msra.mxu1 %v4957_v27  ;;  %v255_v8 = vld [vmem:[%s5589_s25 + $0xc8] sm:$0xff]  ;;  %v422_v9 = vpack.c.bf16 %v238_v4, %v230_v3  ;;  %v5012_v10 = vld [vmem:[%s6709_s1 + $0x200] ss:$16 sps:$4 sm:$0xff]   ;;  %v5020_v12 = vld [vmem:[%s6709_s1 + $0x224] ss:$16 sps:$4 sm:$0xff]   ;;  %s5312_s7 = sshll.u32 %s5372_s6, 4  ;;  %s5313_s7 = int_to_ptr.vmem [resolvable:$false] %s5312_s7 }
  0x28   : > { %2031 = vmatprep.subr.bf16.mxu0 %v4958_v28  ;;  %2643 = vmatprep.subr.bf16.mxu1 %v4960_v29  ;;  %v431_v13 = vpack.c.bf16 %v255_v8, %v247_v7  ;;  %v5018_v14 = vld [vmem:[%s6709_s1 + $0x220] ss:$16 sps:$4 sm:$0xff]   ;;  %v5023_v16 = vld [vmem:[%s6709_s1 + $0x22c] ss:$16 sps:$4 sm:$0xff]   ;;  %v5021_v18 = vld [vmem:[%s6709_s1 + $0x228] ss:$16 sps:$4 sm:$0xff]   ;;  %p5310_p12 = pnand %p5309_p11, %p5443_p5  ;;  %p5315_p0 = scmp.lt.s32.totalorder %s6661_s17, %s5313_s7 }
  0x29   : > { %v246_v15 = vld [vmem:[%s5589_s25 + $0x80] sm:$0xff]  ;;  %v5029_v20 = vld [vmem:[%s6709_s1 + $0x24c] ss:$16 sps:$4 sm:$0xff]   ;;  %v5027_v26 = vld [vmem:[%s6709_s1 + $0x248] ss:$16 sps:$4 sm:$0xff]   ;;  %s5314_s8 = scalar_lea.vmem %s5313_s7, 6144 }
  0x2a   : > { %v254_v17 = vld [vmem:[%s5589_s25 + $0xc0] sm:$0xff]  ;;  %v263_v21 = vld [vmem:[%s5589_s25 + $0x108] sm:$0xff]  ;;  %p5311_p13 = pneg %p5310_p12  ;;  %p5316_p1 = scmp.lt.s32.totalorder %s5314_s8, %s5308_s30 }
  0x2b   : > { %2032 = vmatpush1.bf16.msra.mxu0 %v4962_v30  ;;  %2644 = vmatpush1.bf16.msra.mxu1 %v4963_v31  ;;  %v5026_v19 = vld [vmem:[%s6709_s1 + $0x244] ss:$16 sps:$4 sm:$0xff]   ;;  %v271_v22 = vld [vmem:[%s5589_s25 + $0x148] sm:$0xff]  ;;  %v430_v23 = vpack.c.bf16 %v254_v17, %v246_v15  ;;  %v5024_v24 = vld [vmem:[%s6709_s1 + $0x240] ss:$16 sps:$4 sm:$0xff]  }
  0x2c   : > { %2033 = vmatprep.subr.bf16.mxu0 %v4964_v32  ;;  %2645 = vmatprep.subr.bf16.mxu1 %v4966_v33  ;;  %v439_v25 = vpack.c.bf16 %v271_v22, %v263_v21  ;;  %v262_v27 = vld [vmem:[%s5589_s25 + $0x100] sm:$0xff]  ;;  %v5035_v29 = vld [vmem:[%s6709_s1 + $0x26c] ss:$16 sps:$4 sm:$0xff]   ;;  %v5033_v32 = vld [vmem:[%s6709_s1 + $0x268] ss:$16 sps:$4 sm:$0xff]   ;;  %p5317_p2 = por %p5316_p1, %p5315_p0 }
  0x2d   : > { %v5032_v28 = vld [vmem:[%s6709_s1 + $0x264] ss:$16 sps:$4 sm:$0xff]   ;;  %v5030_v31 = vld [vmem:[%s6709_s1 + $0x260] ss:$16 sps:$4 sm:$0xff]   ;;  %v279_v33 = vld [vmem:[%s5589_s25 + $0x188] sm:$0xff] }
  0x2e   : > { %v270_v30 = vld [vmem:[%s5589_s25 + $0x140] sm:$0xff]  ;;  %v295_v46 = vld [vmem:[%s5589_s25 + $0x208] sm:$0xff]  ;;  %p5318_p3 = pnand %p5317_p2, %p5311_p13 }
  0x2f   : > { %2034 = vmatpush1.bf16.msra.mxu0 %v4968_v34  ;;  %2646 = vmatpush1.bf16.msra.mxu1 %v4969_v35  ;;  %v287_v34 = vld [vmem:[%s5589_s25 + $0x1c8] sm:$0xff]  ;;  %v5038_v35 = vld [vmem:[%s6709_s1 + $0x284] ss:$16 sps:$4 sm:$0xff]   ;;  %v5060_v3 = vld [vmem:[%s6709_s1 + $0x300] ss:$16 sps:$4 sm:$0xff]  }
  0x30   : > { %2035 = vmatprep.subr.bf16.mxu0 %v4970_v36  ;;  %2647 = vmatprep.subr.bf16.mxu1 %v4972_v37  ;;  %v5041_v36 = vld [vmem:[%s6709_s1 + $0x28c] ss:$16 sps:$4 sm:$0xff]   ;;  %v438_v37 = vpack.c.bf16 %v270_v30, %v262_v27  ;;  %v5050_v49 = vld [vmem:[%s6709_s1 + $0x2c4] ss:$16 sps:$4 sm:$0xff]   ;;  %v5063_v4 = vld [vmem:[%s6709_s1 + $0x308] ss:$16 sps:$4 sm:$0xff]  }
  0x31   : > { %v310_v7 = vld [vmem:[%s5589_s25 + $0x280] sm:$0xff]  ;;  %v5083_v21 = vld [vmem:[%s6709_s1 + $0x36c] ss:$16 sps:$4 sm:$0xff]  }
  0x32   : > { %v318_v8 = vld [vmem:[%s5589_s25 + $0x2c0] sm:$0xff] }
  0x33   : > { %2036 = vmatpush1.bf16.msra.mxu0 %v4974_v38  ;;  %2648 = vmatpush1.bf16.msra.mxu1 %v4975_v39  ;;  %v447_v38 = vpack.c.bf16 %v287_v34, %v279_v33  ;;  %v5036_v39 = vld [vmem:[%s6709_s1 + $0x280] ss:$16 sps:$4 sm:$0xff]   ;;  %v462_v15 = vpack.c.bf16 %v318_v8, %v310_v7  ;;  %v5086_v27 = vld [vmem:[%s6709_s1 + $0x384] ss:$16 sps:$4 sm:$0xff]   ;;  %v5095_v34 = vld [vmem:[%s6709_s1 + $0x3ac] ss:$16 sps:$4 sm:$0xff]  }
  0x34   : > { %2037 = vmatprep.subr.bf16.mxu0 %v4976_v40  ;;  %2649 = vmatprep.subr.bf16.mxu1 %v4978_v41  ;;  %v5039_v40 = vld [vmem:[%s6709_s1 + $0x288] ss:$16 sps:$4 sm:$0xff]   ;;  %v278_v41 = vld [vmem:[%s5589_s25 + $0x180] sm:$0xff] }
  0x35   : > { %v5072_v17 = vld [vmem:[%s6709_s1 + $0x340] ss:$16 sps:$4 sm:$0xff]   ;;  %v5092_v33 = vld [vmem:[%s6709_s1 + $0x3a4] ss:$16 sps:$4 sm:$0xff]  }
  0x36   : > { %v334_v22 = vld [vmem:[%s5589_s25 + $0x340] sm:$0xff] }
  0x37   : > { %2038 = vmatpush1.bf16.msra.mxu0 %v4980_v42  ;;  %2650 = vmatpush1.bf16.msra.mxu1 %v4981_v43  ;;  %v5044_v42 = vld [vmem:[%s6709_s1 + $0x2a4] ss:$16 sps:$4 sm:$0xff]   ;;  %v5047_v43 = vld [vmem:[%s6709_s1 + $0x2ac] ss:$16 sps:$4 sm:$0xff]  }
  0x38   : > { %2039 = vmatprep.subr.bf16.mxu0 %v4982_v44  ;;  %2651 = vmatprep.subr.bf16.mxu1 %v4984_v45  ;;  %v286_v44 = vld [vmem:[%s5589_s25 + $0x1c0] sm:$0xff] }
  0x39   : > { %v5042_v45 = vld [vmem:[%s6709_s1 + $0x2a0] ss:$16 sps:$4 sm:$0xff]   ;;  %v446_v51 = vpack.c.bf16 %v286_v44, %v278_v41  ;;  %v5098_v41 = vld [vmem:[%s6709_s1 + $0x3c4] ss:$16 sps:$4 sm:$0xff]  }
  0x3a   : > { %v406_v7 = vld [vmem:[%s5589_s25 + $0x580] sm:$0xff] }
  0x3b   : > { %2040 = vmatpush1.bf16.msra.mxu0 %v4986_v47  ;;  %2652 = vmatpush1.bf16.msra.mxu1 %v4987_v48  ;;  %v303_v47 = vld [vmem:[%s5589_s25 + $0x248] sm:$0xff]  ;;  %v414_v8 = vld [vmem:[%s5589_s25 + $0x5c0] sm:$0xff] }
  0x3c   : > { %2041 = vmatprep.subr.bf16.mxu0 %v4988_v50  ;;  %2653 = vmatprep.subr.bf16.mxu1 %v4990_v52  ;;  %v5045_v48 = vld [vmem:[%s6709_s1 + $0x2a8] ss:$16 sps:$4 sm:$0xff]   ;;  %v5053_v50 = vld [vmem:[%s6709_s1 + $0x2cc] ss:$16 sps:$4 sm:$0xff]   ;;  %v455_v52 = vpack.c.bf16 %v303_v47, %v295_v46  ;;  %v358_v47 = vld [vmem:[%s5589_s25 + $0x400] sm:$0xff] }
  0x3d   : > { %v5099_v46 = vld [vmem:[%s6709_s1 + $0x3c8] ss:$16 sps:$4 sm:$0xff]  }
  0x3f   : > { %2042 = vmatpush1.bf16.msra.mxu0 %v4992_v53  ;;  %2654 = vmatpush1.bf16.msra.mxu1 %v4993_v54  ;;  %v5048_v53 = vld [vmem:[%s6709_s1 + $0x2c0] ss:$16 sps:$4 sm:$0xff]   ;;  %v5051_v54 = vld [vmem:[%s6709_s1 + $0x2c8] ss:$16 sps:$4 sm:$0xff]  }
  0x40   : > { %2043 = vmatprep.subr.bf16.mxu0 %v4994_v55  ;;  %2655 = vmatprep.subr.bf16.mxu1 %v4996_v56  ;;  %v5056_v55 = vld [vmem:[%s6709_s1 + $0x2e4] ss:$16 sps:$4 sm:$0xff]   ;;  %v5059_v56 = vld [vmem:[%s6709_s1 + $0x2ec] ss:$16 sps:$4 sm:$0xff]  }
  0x43   : > { %2044 = vmatpush1.bf16.msra.mxu0 %v4998_v57  ;;  %2656 = vmatpush1.bf16.msra.mxu1 %v4999_v58  ;;  %v294_v57 = vld [vmem:[%s5589_s25 + $0x200] sm:$0xff] }
  0x44   : > { %2045 = vmatprep.subr.bf16.mxu0 %v5000_v59  ;;  %2657 = vmatprep.subr.bf16.mxu1 %v5002_v60  ;;  %v302_v58 = vld [vmem:[%s5589_s25 + $0x240] sm:$0xff]  ;;  %v311_v59 = vld [vmem:[%s5589_s25 + $0x288] sm:$0xff] }
  0x45   : > { %v319_v60 = vld [vmem:[%s5589_s25 + $0x2c8] sm:$0xff] }
  0x47   : > { %2046 = vmatpush1.bf16.msra.mxu0 %v5004_v61  ;;  %2658 = vmatpush1.bf16.msra.mxu1 %v5005_v62  ;;  %v5054_v61 = vld [vmem:[%s6709_s1 + $0x2e0] ss:$16 sps:$4 sm:$0xff]   ;;  %v5057_v62 = vld [vmem:[%s6709_s1 + $0x2e8] ss:$16 sps:$4 sm:$0xff]  }
  0x48   : > { %2047 = vmatprep.subr.bf16.mxu0 %v5006_v63  ;;  %2659 = vmatprep.subr.bf16.mxu1 %v5008_v0  ;;  %v5062_v63 = vld [vmem:[%s6709_s1 + $0x304] ss:$16 sps:$4 sm:$0xff]   ;;  %v5065_v0 = vld [vmem:[%s6709_s1 + $0x30c] ss:$16 sps:$4 sm:$0xff]  }
  0x4b   : > { %2048 = vmatpush1.bf16.msra.mxu0 %v5010_v1  ;;  %2660 = vmatpush1.bf16.msra.mxu1 %v5011_v2  ;;  %v454_v1 = vpack.c.bf16 %v302_v58, %v294_v57  ;;  %v463_v2 = vpack.c.bf16 %v319_v60, %v311_v59  ;;  %v374_v59 = vld [vmem:[%s5589_s25 + $0x480] sm:$0xff] }
  0x4c   : > { %2170 = vmatprep.subr.bf16.mxu0 %v5014_v5  ;;  %2782 = vmatprep.subr.bf16.mxu1 %v5017_v6  ;;  %v5068_v5 = vld [vmem:[%s6709_s1 + $0x324] ss:$16 sps:$4 sm:$0xff]   ;;  %v5071_v6 = vld [vmem:[%s6709_s1 + $0x32c] ss:$16 sps:$4 sm:$0xff]  }
  0x4d   : > { %v382_v60 = vld [vmem:[%s5589_s25 + $0x4c0] sm:$0xff] }
  0x4e   : > { %2050 = vmatmul.mubr.bf16.vlgmr.msra.gmra.mrb[0].mxu0 %v422_v9  ;;  %2662 = vmatmul.mubr.bf16.vlgmr.msra.gmra.mrb[0].mxu1 %v422_v9  ;;  %v327_v9 = vld [vmem:[%s5589_s25 + $0x308] sm:$0xff] }
  0x4f   : > { %2171 = vmatpush1.bf16.msra.mxu0 %v5012_v10  ;;  %2783 = vmatpush1.bf16.msra.mxu1 %v5015_v11  ;;  %v335_v10 = vld [vmem:[%s5589_s25 + $0x348] sm:$0xff]  ;;  %v5066_v11 = vld [vmem:[%s6709_s1 + $0x320] ss:$16 sps:$4 sm:$0xff]  }
  0x50   : > { %2172 = vmatprep.subr.bf16.mxu0 %v5020_v12  ;;  %2059 = vmatprep.mubr.bf16.mxu0 %v431_v13  ;;  %v5069_v12 = vld [vmem:[%s6709_s1 + $0x328] ss:$16 sps:$4 sm:$0xff]  }
  0x51   : > { %2671 = vmatprep.mubr.bf16.mxu1 %v431_v13  ;;  %2784 = vmatprep.subr.bf16.mxu1 %v5023_v16  ;;  %v5074_v13 = vld [vmem:[%s6709_s1 + $0x344] ss:$16 sps:$4 sm:$0xff]   ;;  %v471_v16 = vpack.c.bf16 %v335_v10, %v327_v9  ;;  %v233_v9 = vld [vmem:[%s5589_s25 + $0x18] sm:$0xff] }
  0x52   : > { %v241_v10 = vld [vmem:[%s5589_s25 + $0x58] sm:$0xff] }
  0x53   : > { %2173 = vmatpush1.bf16.msra.mxu0 %v5018_v14  ;;  %2785 = vmatpush1.bf16.msra.mxu1 %v5021_v18  ;;  %v5077_v14 = vld [vmem:[%s6709_s1 + $0x34c] ss:$16 sps:$4 sm:$0xff]   ;;  %v5075_v18 = vld [vmem:[%s6709_s1 + $0x348] ss:$16 sps:$4 sm:$0xff]  }
  0x54   : > { %2174 = vmatprep.subr.bf16.mxu0 %v5026_v19  ;;  %2786 = vmatprep.subr.bf16.mxu1 %v5029_v20  ;;  %v326_v19 = vld [vmem:[%s5589_s25 + $0x300] sm:$0xff] }
  0x55   : > { %v5080_v20 = vld [vmem:[%s6709_s1 + $0x364] ss:$16 sps:$4 sm:$0xff]  }
  0x56   : > { %2060 = vmatmul.mubr.bf16.gmra.mrb[4].mxu0 %v430_v23  ;;  %2672 = vmatmul.mubr.bf16.gmra.mrb[4].mxu1 %v430_v23  ;;  %v343_v23 = vld [vmem:[%s5589_s25 + $0x388] sm:$0xff] }
  0x57   : > { %2175 = vmatpush1.bf16.msra.mxu0 %v5024_v24  ;;  %2069 = vmatprep.mubr.bf16.mxu0 %v439_v25  ;;  %v351_v24 = vld [vmem:[%s5589_s25 + $0x3c8] sm:$0xff] }
  0x58   : > { %2681 = vmatprep.mubr.bf16.mxu1 %v439_v25  ;;  %2787 = vmatpush1.bf16.msra.mxu1 %v5027_v26  ;;  %v5078_v25 = vld [vmem:[%s6709_s1 + $0x360] ss:$16 sps:$4 sm:$0xff]   ;;  %v5081_v26 = vld [vmem:[%s6709_s1 + $0x368] ss:$16 sps:$4 sm:$0xff]   ;;  %v479_v30 = vpack.c.bf16 %v351_v24, %v343_v23  ;;  %v5119_v24 = vld [vmem:[%s6709_s1 + $0x42c] ss:$16 sps:$4 sm:$0xff]  }
  0x59   : > { %2176 = vmatprep.subr.bf16.mxu0 %v5032_v28  ;;  %2788 = vmatprep.subr.bf16.mxu1 %v5035_v29  ;;  %v5089_v28 = vld [vmem:[%s6709_s1 + $0x38c] ss:$16 sps:$4 sm:$0xff]   ;;  %v470_v29 = vpack.c.bf16 %v334_v22, %v326_v19  ;;  %v5111_v19 = vld [vmem:[%s6709_s1 + $0x408] ss:$16 sps:$4 sm:$0xff]   ;;  %v5114_v22 = vld [vmem:[%s6709_s1 + $0x420] ss:$16 sps:$4 sm:$0xff]  }
  0x5a   : > { %v248_v23 = vld [vmem:[%s5589_s25 + $0x90] sm:$0xff] }
  0x5b   : > { %2177 = vmatpush1.bf16.msra.mxu0 %v5030_v31  ;;  %v5084_v31 = vld [vmem:[%s6709_s1 + $0x380] ss:$16 sps:$4 sm:$0xff]  }
  0x5c   : > { %2789 = vmatpush1.bf16.msra.mxu1 %v5033_v32  ;;  %2178 = vmatprep.subr.bf16.mxu0 %v5038_v35  ;;  %v5087_v32 = vld [vmem:[%s6709_s1 + $0x388] ss:$16 sps:$4 sm:$0xff]   ;;  %v342_v35 = vld [vmem:[%s5589_s25 + $0x380] sm:$0xff] }
  0x5d   : > { %2790 = vmatprep.subr.bf16.mxu1 %v5041_v36  ;;  %v350_v36 = vld [vmem:[%s5589_s25 + $0x3c0] sm:$0xff] }
  0x5e   : > { %2070 = vmatmul.mubr.bf16.gmra.mrb[8].mxu0 %v438_v37  ;;  %2682 = vmatmul.mubr.bf16.gmra.mrb[8].mxu1 %v438_v37  ;;  %v359_v37 = vld [vmem:[%s5589_s25 + $0x408] sm:$0xff] }
  0x5f   : > { %2079 = vmatprep.mubr.bf16.mxu0 %v447_v38  ;;  %2691 = vmatprep.mubr.bf16.mxu1 %v447_v38  ;;  %v367_v38 = vld [vmem:[%s5589_s25 + $0x448] sm:$0xff] }
  0x60   : > { %2179 = vmatpush1.bf16.msra.mxu0 %v5036_v39  ;;  %2791 = vmatpush1.bf16.msra.mxu1 %v5039_v40  ;;  %v5090_v39 = vld [vmem:[%s6709_s1 + $0x3a0] ss:$16 sps:$4 sm:$0xff]   ;;  %v5093_v40 = vld [vmem:[%s6709_s1 + $0x3a8] ss:$16 sps:$4 sm:$0xff]   ;;  %v487_v44 = vpack.c.bf16 %v367_v38, %v359_v37  ;;  %v5131_v37 = vld [vmem:[%s6709_s1 + $0x46c] ss:$16 sps:$4 sm:$0xff]  }
  0x61   : > { %2180 = vmatprep.subr.bf16.mxu0 %v5044_v42  ;;  %2792 = vmatprep.subr.bf16.mxu1 %v5047_v43  ;;  %v5101_v42 = vld [vmem:[%s6709_s1 + $0x3cc] ss:$16 sps:$4 sm:$0xff]   ;;  %v478_v43 = vpack.c.bf16 %v350_v36, %v342_v35  ;;  %v264_v35 = vld [vmem:[%s5589_s25 + $0x110] sm:$0xff] }
  0x62   : > { %v5128_v36 = vld [vmem:[%s6709_s1 + $0x464] ss:$16 sps:$4 sm:$0xff]  }
  0x63   : > { %v272_v38 = vld [vmem:[%s5589_s25 + $0x150] sm:$0xff] }
  0x64   : > { %2181 = vmatpush1.bf16.msra.mxu0 %v5042_v45  ;;  %2793 = vmatpush1.bf16.msra.mxu1 %v5045_v48  ;;  %v5096_v45 = vld [vmem:[%s6709_s1 + $0x3c0] ss:$16 sps:$4 sm:$0xff]  }
  0x65   : > { %2182 = vmatprep.subr.bf16.mxu0 %v5050_v49  ;;  %2794 = vmatprep.subr.bf16.mxu1 %v5053_v50  ;;  %v366_v48 = vld [vmem:[%s5589_s25 + $0x440] sm:$0xff]  ;;  %v5107_v50 = vld [vmem:[%s6709_s1 + $0x3ec] ss:$16 sps:$4 sm:$0xff]  }
  0x66   : > { %2080 = vmatmul.mubr.bf16.gmra.mrb[12].mxu0 %v446_v51  ;;  %2692 = vmatmul.mubr.bf16.gmra.mrb[12].mxu1 %v446_v51  ;;  %v5104_v49 = vld [vmem:[%s6709_s1 + $0x3e4] ss:$16 sps:$4 sm:$0xff]   ;;  %v375_v51 = vld [vmem:[%s5589_s25 + $0x488] sm:$0xff]  ;;  %v486_v57 = vpack.c.bf16 %v366_v48, %v358_v47  ;;  %v5132_v47 = vld [vmem:[%s6709_s1 + $0x480] ss:$16 sps:$4 sm:$0xff]  }
  0x67   : > { %2089 = vmatprep.mubr.bf16.mxu0 %v455_v52  ;;  %2701 = vmatprep.mubr.bf16.mxu1 %v455_v52  ;;  %v383_v52 = vld [vmem:[%s5589_s25 + $0x4c8] sm:$0xff] }
  0x68   : > { %2183 = vmatpush1.bf16.msra.mxu0 %v5048_v53  ;;  %2795 = vmatpush1.bf16.msra.mxu1 %v5051_v54  ;;  %v5102_v53 = vld [vmem:[%s6709_s1 + $0x3e0] ss:$16 sps:$4 sm:$0xff]   ;;  %v5105_v54 = vld [vmem:[%s6709_s1 + $0x3e8] ss:$16 sps:$4 sm:$0xff]   ;;  %v495_v58 = vpack.c.bf16 %v383_v52, %v375_v51 }
  0x69   : > { %2184 = vmatprep.subr.bf16.mxu0 %v5056_v55  ;;  %2796 = vmatprep.subr.bf16.mxu1 %v5059_v56  ;;  %v5110_v55 = vld [vmem:[%s6709_s1 + $0x404] ss:$16 sps:$4 sm:$0xff]   ;;  %v5113_v56 = vld [vmem:[%s6709_s1 + $0x40c] ss:$16 sps:$4 sm:$0xff]   ;;  %v5135_v48 = vld [vmem:[%s6709_s1 + $0x488] ss:$16 sps:$4 sm:$0xff]  }
  0x6a   : > { %v280_v51 = vld [vmem:[%s5589_s25 + $0x190] sm:$0xff] }
  0x6b   : > { %v288_v52 = vld [vmem:[%s5589_s25 + $0x1d0] sm:$0xff] }
  0x6c   : > { %2185 = vmatpush1.bf16.msra.mxu0 %v5054_v61  ;;  %2797 = vmatpush1.bf16.msra.mxu1 %v5057_v62  ;;  %v391_v61 = vld [vmem:[%s5589_s25 + $0x508] sm:$0xff] }
  0x6d   : > { %2186 = vmatprep.subr.bf16.mxu0 %v5062_v63  ;;  %2798 = vmatprep.subr.bf16.mxu1 %v5065_v0  ;;  %v399_v62 = vld [vmem:[%s5589_s25 + $0x548] sm:$0xff]  ;;  %v494_v63 = vpack.c.bf16 %v382_v60, %v374_v59  ;;  %v448_v59 = vpack.c.bf16 %v288_v52, %v280_v51  ;;  %v5192_v52 = vld [vmem:[%s6709_s1 + $0x5c0] ss:$16 sps:$4 sm:$0xff]  }
  0x6e   : > { %2090 = vmatmul.mubr.bf16.gmra.mrb[16].mxu0 %v454_v1  ;;  %2702 = vmatmul.mubr.bf16.gmra.mrb[16].mxu1 %v454_v1  ;;  %v503_v0 = vpack.c.bf16 %v399_v62, %v391_v61  ;;  %v390_v1 = vld [vmem:[%s5589_s25 + $0x500] sm:$0xff]  ;;  %v5147_v62 = vld [vmem:[%s6709_s1 + $0x4c8] ss:$16 sps:$4 sm:$0xff]  }
  0x6f   : > { %2099 = vmatprep.mubr.bf16.mxu0 %v463_v2  ;;  %2711 = vmatprep.mubr.bf16.mxu1 %v463_v2  ;;  %v398_v2 = vld [vmem:[%s5589_s25 + $0x540] sm:$0xff] }
  0x70   : > { %2187 = vmatpush1.bf16.msra.mxu0 %v5060_v3  ;;  %2799 = vmatpush1.bf16.msra.mxu1 %v5063_v4  ;;  %v407_v3 = vld [vmem:[%s5589_s25 + $0x588] sm:$0xff]  ;;  %v5144_v61 = vld [vmem:[%s6709_s1 + $0x4c0] ss:$16 sps:$4 sm:$0xff]  }
  0x71   : > { %2188 = vmatprep.subr.bf16.mxu0 %v5068_v5  ;;  %2800 = vmatprep.subr.bf16.mxu1 %v5071_v6  ;;  %v415_v4 = vld [vmem:[%s5589_s25 + $0x5c8] sm:$0xff]  ;;  %v502_v5 = vpack.c.bf16 %v398_v2, %v390_v1  ;;  %v296_v1 = vld [vmem:[%s5589_s25 + $0x210] sm:$0xff] }
  0x72   : > { %v511_v6 = vpack.c.bf16 %v415_v4, %v407_v3  ;;  %v304_v2 = vld [vmem:[%s5589_s25 + $0x250] sm:$0xff]  ;;  %v313_v3 = vld [vmem:[%s5589_s25 + $0x298] sm:$0xff] }
  0x73   : > { %v321_v4 = vld [vmem:[%s5589_s25 + $0x2d8] sm:$0xff] }
  0x74   : > { %2189 = vmatpush1.bf16.msra.mxu0 %v5066_v11  ;;  %2801 = vmatpush1.bf16.msra.mxu1 %v5069_v12  ;;  %v510_v11 = vpack.c.bf16 %v414_v8, %v406_v7  ;;  %v425_v12 = vpack.c.bf16 %v241_v10, %v233_v9  ;;  %v5158_v7 = vld [vmem:[%s6709_s1 + $0x504] ss:$16 sps:$4 sm:$0xff]   ;;  %v5161_v8 = vld [vmem:[%s6709_s1 + $0x50c] ss:$16 sps:$4 sm:$0xff]   ;;  %v456_v9 = vpack.c.bf16 %v304_v2, %v296_v1 }
  0x75   : > { %2190 = vmatprep.subr.bf16.mxu0 %v5074_v13  ;;  %2802 = vmatprep.subr.bf16.mxu1 %v5077_v14  ;;  %v232_v13 = vld [vmem:[%s5589_s25 + $0x10] sm:$0xff]  ;;  %v465_v10 = vpack.c.bf16 %v321_v4, %v313_v3 }
  0x76   : > { %2100 = vmatmul.mubr.bf16.gmra.mrb[20].mxu0 %v462_v15  ;;  %2712 = vmatmul.mubr.bf16.gmra.mrb[20].mxu1 %v462_v15  ;;  %v240_v14 = vld [vmem:[%s5589_s25 + $0x50] sm:$0xff]  ;;  %v249_v15 = vld [vmem:[%s5589_s25 + $0x98] sm:$0xff] }
  0x77   : > { %2109 = vmatprep.mubr.bf16.mxu0 %v471_v16  ;;  %2721 = vmatprep.mubr.bf16.mxu1 %v471_v16  ;;  %v257_v16 = vld [vmem:[%s5589_s25 + $0xd8] sm:$0xff]  ;;  %v376_v3 = vld [vmem:[%s5589_s25 + $0x490] sm:$0xff] }
  0x78   : > { %2191 = vmatpush1.bf16.msra.mxu0 %v5072_v17  ;;  %2803 = vmatpush1.bf16.msra.mxu1 %v5075_v18  ;;  %v424_v17 = vpack.c.bf16 %v240_v14, %v232_v13  ;;  %v5108_v18 = vld [vmem:[%s6709_s1 + $0x400] ss:$16 sps:$4 sm:$0xff]   ;;  %v5164_v13 = vld [vmem:[%s6709_s1 + $0x524] ss:$16 sps:$4 sm:$0xff]   ;;  %v5167_v14 = vld [vmem:[%s6709_s1 + $0x52c] ss:$16 sps:$4 sm:$0xff]  }
  0x79   : > { %2192 = vmatprep.subr.bf16.mxu0 %v5080_v20  ;;  %2804 = vmatprep.subr.bf16.mxu1 %v5083_v21  ;;  %v5116_v20 = vld [vmem:[%s6709_s1 + $0x424] ss:$16 sps:$4 sm:$0xff]   ;;  %v433_v21 = vpack.c.bf16 %v257_v16, %v249_v15 }
  0x7a   : > { %v312_v15 = vld [vmem:[%s5589_s25 + $0x290] sm:$0xff] }
  0x7b   : > { %v320_v16 = vld [vmem:[%s5589_s25 + $0x2d0] sm:$0xff] }
  0x7c   : > { %2193 = vmatpush1.bf16.msra.mxu0 %v5078_v25  ;;  %2805 = vmatpush1.bf16.msra.mxu1 %v5081_v26  ;;  %v256_v25 = vld [vmem:[%s5589_s25 + $0xd0] sm:$0xff]  ;;  %v5117_v26 = vld [vmem:[%s6709_s1 + $0x428] ss:$16 sps:$4 sm:$0xff]  }
  0x7d   : > { %2194 = vmatprep.subr.bf16.mxu0 %v5086_v27  ;;  %2806 = vmatprep.subr.bf16.mxu1 %v5089_v28  ;;  %v5122_v27 = vld [vmem:[%s6709_s1 + $0x444] ss:$16 sps:$4 sm:$0xff]   ;;  %v5125_v28 = vld [vmem:[%s6709_s1 + $0x44c] ss:$16 sps:$4 sm:$0xff]  }
  0x7e   : > { %2110 = vmatmul.mubr.bf16.gmra.mrb[24].mxu0 %v470_v29  ;;  %2722 = vmatmul.mubr.bf16.gmra.mrb[24].mxu1 %v470_v29  ;;  %v265_v29 = vld [vmem:[%s5589_s25 + $0x118] sm:$0xff]  ;;  %v384_v4 = vld [vmem:[%s5589_s25 + $0x4d0] sm:$0xff] }
  0x7f   : > { %2119 = vmatprep.mubr.bf16.mxu0 %v479_v30  ;;  %2731 = vmatprep.mubr.bf16.mxu1 %v479_v30  ;;  %v273_v30 = vld [vmem:[%s5589_s25 + $0x158] sm:$0xff] }
  0x80   : > { %2195 = vmatpush1.bf16.msra.mxu0 %v5084_v31  ;;  %2807 = vmatpush1.bf16.msra.mxu1 %v5087_v32  ;;  %v432_v31 = vpack.c.bf16 %v256_v25, %v248_v23  ;;  %v5120_v32 = vld [vmem:[%s6709_s1 + $0x440] ss:$16 sps:$4 sm:$0xff]   ;;  %v464_v23 = vpack.c.bf16 %v320_v16, %v312_v15  ;;  %v5171_v25 = vld [vmem:[%s6709_s1 + $0x548] ss:$16 sps:$4 sm:$0xff]  }
  0x81   : > { %2196 = vmatprep.subr.bf16.mxu0 %v5092_v33  ;;  %2808 = vmatprep.subr.bf16.mxu1 %v5095_v34  ;;  %v441_v33 = vpack.c.bf16 %v273_v30, %v265_v29  ;;  %v5123_v34 = vld [vmem:[%s6709_s1 + $0x448] ss:$16 sps:$4 sm:$0xff]   ;;  %v328_v29 = vld [vmem:[%s5589_s25 + $0x310] sm:$0xff] }
  0x82   : > { %v336_v30 = vld [vmem:[%s5589_s25 + $0x350] sm:$0xff] }
  0x83   : > { %v408_v15 = vld [vmem:[%s5589_s25 + $0x590] sm:$0xff] }
  0x84   : > { %2197 = vmatpush1.bf16.msra.mxu0 %v5090_v39  ;;  %2809 = vmatpush1.bf16.msra.mxu1 %v5093_v40  ;;  %v5126_v39 = vld [vmem:[%s6709_s1 + $0x460] ss:$16 sps:$4 sm:$0xff]   ;;  %v5129_v40 = vld [vmem:[%s6709_s1 + $0x468] ss:$16 sps:$4 sm:$0xff]  }
  0x85   : > { %2198 = vmatprep.subr.bf16.mxu0 %v5098_v41  ;;  %2810 = vmatprep.subr.bf16.mxu1 %v5101_v42  ;;  %v281_v41 = vld [vmem:[%s5589_s25 + $0x198] sm:$0xff]  ;;  %v416_v16 = vld [vmem:[%s5589_s25 + $0x5d0] sm:$0xff] }
  0x86   : > { %2120 = vmatmul.mubr.bf16.gmra.mrb[28].mxu0 %v478_v43  ;;  %2732 = vmatmul.mubr.bf16.gmra.mrb[28].mxu1 %v478_v43  ;;  %v289_v42 = vld [vmem:[%s5589_s25 + $0x1d8] sm:$0xff]  ;;  %v5134_v43 = vld [vmem:[%s6709_s1 + $0x484] ss:$16 sps:$4 sm:$0xff]  }
  0x87   : > { %2129 = vmatprep.mubr.bf16.mxu0 %v487_v44  ;;  %2741 = vmatprep.mubr.bf16.mxu1 %v487_v44  ;;  %v5137_v44 = vld [vmem:[%s6709_s1 + $0x48c] ss:$16 sps:$4 sm:$0xff]  }
  0x88   : > { %2199 = vmatpush1.bf16.msra.mxu0 %v5096_v45  ;;  %2811 = vmatpush1.bf16.msra.mxu1 %v5099_v46  ;;  %v440_v45 = vpack.c.bf16 %v272_v38, %v264_v35  ;;  %v449_v46 = vpack.c.bf16 %v289_v42, %v281_v41  ;;  %v5182_v35 = vld [vmem:[%s6709_s1 + $0x584] ss:$16 sps:$4 sm:$0xff]   ;;  %v5180_v38 = vld [vmem:[%s6709_s1 + $0x580] ss:$16 sps:$4 sm:$0xff]   ;;  %v5191_v42 = vld [vmem:[%s6709_s1 + $0x5ac] ss:$16 sps:$4 sm:$0xff]  }
  0x89   : > { %2200 = vmatprep.subr.bf16.mxu0 %v5104_v49  ;;  %2812 = vmatprep.subr.bf16.mxu1 %v5107_v50  ;;  %v5140_v49 = vld [vmem:[%s6709_s1 + $0x4a4] ss:$16 sps:$4 sm:$0xff]   ;;  %v5143_v50 = vld [vmem:[%s6709_s1 + $0x4ac] ss:$16 sps:$4 sm:$0xff]  }
  0x8a   : > { %v5188_v41 = vld [vmem:[%s6709_s1 + $0x5a4] ss:$16 sps:$4 sm:$0xff]  }
  0x8c   : > { %2201 = vmatpush1.bf16.msra.mxu0 %v5102_v53  ;;  %2813 = vmatpush1.bf16.msra.mxu1 %v5105_v54  ;;  %v5138_v53 = vld [vmem:[%s6709_s1 + $0x4a0] ss:$16 sps:$4 sm:$0xff]   ;;  %v297_v54 = vld [vmem:[%s5589_s25 + $0x218] sm:$0xff] }
  0x8d   : > { %2323 = vmatprep.subr.bf16.mxu0 %v5110_v55  ;;  %2935 = vmatprep.subr.bf16.mxu1 %v5113_v56  ;;  %v305_v55 = vld [vmem:[%s5589_s25 + $0x258] sm:$0xff] }
  0x8e   : > { %2130 = vmatmul.mubr.bf16.gmra.mrb[32].mxu0 %v486_v57  ;;  %2742 = vmatmul.mubr.bf16.gmra.mrb[32].mxu1 %v486_v57  ;;  %v5141_v56 = vld [vmem:[%s6709_s1 + $0x4a8] ss:$16 sps:$4 sm:$0xff]   ;;  %v5146_v57 = vld [vmem:[%s6709_s1 + $0x4c4] ss:$16 sps:$4 sm:$0xff]   ;;  %v457_v60 = vpack.c.bf16 %v305_v55, %v297_v54 }
  0x8f   : > { %2139 = vmatprep.mubr.bf16.mxu0 %v495_v58  ;;  %2751 = vmatprep.mubr.bf16.mxu1 %v495_v58  ;;  %v5149_v58 = vld [vmem:[%s6709_s1 + $0x4cc] ss:$16 sps:$4 sm:$0xff]   ;;  %v5200_v55 = vld [vmem:[%s6709_s1 + $0x5e4] ss:$16 sps:$4 sm:$0xff]  }
  0x96   : > { %2140 = vmatmul.mubr.bf16.gmra.mrb[36].mxu0 %v494_v63  ;;  %2752 = vmatmul.mubr.bf16.gmra.mrb[36].mxu1 %v494_v63  ;;  %v5152_v63 = vld [vmem:[%s6709_s1 + $0x4e4] ss:$16 sps:$4 sm:$0xff]  }
  0x97   : > { %2149 = vmatprep.mubr.bf16.mxu0 %v503_v0  ;;  %2761 = vmatprep.mubr.bf16.mxu1 %v503_v0  ;;  %v5155_v0 = vld [vmem:[%s6709_s1 + $0x4ec] ss:$16 sps:$4 sm:$0xff]  }
  0x9e   : > { %2150 = vmatmul.mubr.bf16.gmra.mrb[40].mxu0 %v502_v5  ;;  %2762 = vmatmul.mubr.bf16.gmra.mrb[40].mxu1 %v502_v5  ;;  %v5150_v5 = vld [vmem:[%s6709_s1 + $0x4e0] ss:$16 sps:$4 sm:$0xff]  }
  0x9f   : > { %2159 = vmatprep.mubr.bf16.mxu0 %v511_v6  ;;  %2771 = vmatprep.mubr.bf16.mxu1 %v511_v6  ;;  %v5153_v6 = vld [vmem:[%s6709_s1 + $0x4e8] ss:$16 sps:$4 sm:$0xff]  }
  0xa6   : > { %2160 = vmatmul.mubr.bf16.gmra.mrb[44].mxu0 %v510_v11  ;;  %2772 = vmatmul.mubr.bf16.gmra.mrb[44].mxu1 %v510_v11  ;;  %v5156_v11 = vld [vmem:[%s6709_s1 + $0x500] ss:$16 sps:$4 sm:$0xff]  }
  0xa7   : > { %2202 = vmatprep.mubr.bf16.mxu0 %v425_v12  ;;  %2814 = vmatprep.mubr.bf16.mxu1 %v425_v12  ;;  %v5159_v12 = vld [vmem:[%s6709_s1 + $0x508] ss:$16 sps:$4 sm:$0xff]  }
  0xae   : > { %2203 = vmatmul.mubr.bf16.vlgmr.msra.gmra.mrb[0].mxu0 %v424_v17  ;;  %2815 = vmatmul.mubr.bf16.vlgmr.msra.gmra.mrb[0].mxu1 %v424_v17  ;;  %v329_v17 = vld [vmem:[%s5589_s25 + $0x318] sm:$0xff] }
  0xaf   : > { %2324 = vmatpush1.bf16.msra.mxu0 %v5108_v18  ;;  %2936 = vmatpush1.bf16.msra.mxu1 %v5111_v19  ;;  %v337_v18 = vld [vmem:[%s5589_s25 + $0x358] sm:$0xff]  ;;  %v5162_v19 = vld [vmem:[%s6709_s1 + $0x520] ss:$16 sps:$4 sm:$0xff]  }
  0xb0   : > { %2325 = vmatprep.subr.bf16.mxu0 %v5116_v20  ;;  %2212 = vmatprep.mubr.bf16.mxu0 %v433_v21  ;;  %v5165_v20 = vld [vmem:[%s6709_s1 + $0x528] ss:$16 sps:$4 sm:$0xff]  }
  0xb1   : > { %2824 = vmatprep.mubr.bf16.mxu1 %v433_v21  ;;  %2937 = vmatprep.subr.bf16.mxu1 %v5119_v24  ;;  %v5170_v21 = vld [vmem:[%s6709_s1 + $0x544] ss:$16 sps:$4 sm:$0xff]   ;;  %v5168_v24 = vld [vmem:[%s6709_s1 + $0x540] ss:$16 sps:$4 sm:$0xff]  }
  0xb3   : > { %2326 = vmatpush1.bf16.msra.mxu0 %v5114_v22  ;;  %2938 = vmatpush1.bf16.msra.mxu1 %v5117_v26  ;;  %v5173_v22 = vld [vmem:[%s6709_s1 + $0x54c] ss:$16 sps:$4 sm:$0xff]   ;;  %v473_v26 = vpack.c.bf16 %v337_v18, %v329_v17 }
  0xb4   : > { %2327 = vmatprep.subr.bf16.mxu0 %v5122_v27  ;;  %2939 = vmatprep.subr.bf16.mxu1 %v5125_v28  ;;  %v5176_v27 = vld [vmem:[%s6709_s1 + $0x564] ss:$16 sps:$4 sm:$0xff]   ;;  %v5179_v28 = vld [vmem:[%s6709_s1 + $0x56c] ss:$16 sps:$4 sm:$0xff]  }
  0xb5   : > { %v235_v17 = vld [vmem:[%s5589_s25 + $0x28] sm:$0xff] }
  0xb6   : > { %2213 = vmatmul.mubr.bf16.gmra.mrb[4].mxu0 %v432_v31  ;;  %2825 = vmatmul.mubr.bf16.gmra.mrb[4].mxu1 %v432_v31  ;;  %v345_v31 = vld [vmem:[%s5589_s25 + $0x398] sm:$0xff]  ;;  %v243_v18 = vld [vmem:[%s5589_s25 + $0x68] sm:$0xff] }
  0xb7   : > { %2328 = vmatpush1.bf16.msra.mxu0 %v5120_v32  ;;  %2222 = vmatprep.mubr.bf16.mxu0 %v441_v33  ;;  %v353_v32 = vld [vmem:[%s5589_s25 + $0x3d8] sm:$0xff] }
  0xb8   : > { %2834 = vmatprep.mubr.bf16.mxu1 %v441_v33  ;;  %2940 = vmatpush1.bf16.msra.mxu1 %v5123_v34  ;;  %v5174_v33 = vld [vmem:[%s6709_s1 + $0x560] ss:$16 sps:$4 sm:$0xff]   ;;  %v5177_v34 = vld [vmem:[%s6709_s1 + $0x568] ss:$16 sps:$4 sm:$0xff]  }
  0xb9   : > { %2329 = vmatprep.subr.bf16.mxu0 %v5128_v36  ;;  %2941 = vmatprep.subr.bf16.mxu1 %v5131_v37  ;;  %v5185_v36 = vld [vmem:[%s6709_s1 + $0x58c] ss:$16 sps:$4 sm:$0xff]   ;;  %v472_v37 = vpack.c.bf16 %v336_v30, %v328_v29  ;;  %v5212_v29 = vld [vmem:[%s6709_s1 + $0x624] ss:$16 sps:$4 sm:$0xff]  }
  0xba   : > { %v5215_v30 = vld [vmem:[%s6709_s1 + $0x62c] ss:$16 sps:$4 sm:$0xff]  }
  0xbb   : > { %2330 = vmatpush1.bf16.msra.mxu0 %v5126_v39  ;;  %v5183_v39 = vld [vmem:[%s6709_s1 + $0x588] ss:$16 sps:$4 sm:$0xff]  }
  0xbc   : > { %2942 = vmatpush1.bf16.msra.mxu1 %v5129_v40  ;;  %2331 = vmatprep.subr.bf16.mxu0 %v5134_v43  ;;  %v481_v40 = vpack.c.bf16 %v353_v32, %v345_v31  ;;  %v344_v43 = vld [vmem:[%s5589_s25 + $0x390] sm:$0xff]  ;;  %v250_v31 = vld [vmem:[%s5589_s25 + $0xa0] sm:$0xff] }
  0xbd   : > { %2943 = vmatprep.subr.bf16.mxu1 %v5137_v44  ;;  %v352_v44 = vld [vmem:[%s5589_s25 + $0x3d0] sm:$0xff]  ;;  %v258_v32 = vld [vmem:[%s5589_s25 + $0xe0] sm:$0xff] }
  0xbe   : > { %2223 = vmatmul.mubr.bf16.gmra.mrb[8].mxu0 %v440_v45  ;;  %2835 = vmatmul.mubr.bf16.gmra.mrb[8].mxu1 %v440_v45  ;;  %v361_v45 = vld [vmem:[%s5589_s25 + $0x418] sm:$0xff]  ;;  %v480_v51 = vpack.c.bf16 %v352_v44, %v344_v43  ;;  %v5224_v43 = vld [vmem:[%s6709_s1 + $0x664] ss:$16 sps:$4 sm:$0xff]  }
  0xbf   : > { %2232 = vmatprep.mubr.bf16.mxu0 %v449_v46  ;;  %2844 = vmatprep.mubr.bf16.mxu1 %v449_v46  ;;  %v369_v46 = vld [vmem:[%s5589_s25 + $0x458] sm:$0xff] }
  0xc0   : > { %2332 = vmatpush1.bf16.msra.mxu0 %v5132_v47  ;;  %2944 = vmatpush1.bf16.msra.mxu1 %v5135_v48  ;;  %v5186_v47 = vld [vmem:[%s6709_s1 + $0x5a0] ss:$16 sps:$4 sm:$0xff]   ;;  %v5189_v48 = vld [vmem:[%s6709_s1 + $0x5a8] ss:$16 sps:$4 sm:$0xff]   ;;  %v489_v54 = vpack.c.bf16 %v369_v46, %v361_v45  ;;  %v5227_v44 = vld [vmem:[%s6709_s1 + $0x66c] ss:$16 sps:$4 sm:$0xff]  }
  0xc1   : > { %2333 = vmatprep.subr.bf16.mxu0 %v5140_v49  ;;  %2945 = vmatprep.subr.bf16.mxu1 %v5143_v50  ;;  %v5194_v49 = vld [vmem:[%s6709_s1 + $0x5c4] ss:$16 sps:$4 sm:$0xff]   ;;  %v5197_v50 = vld [vmem:[%s6709_s1 + $0x5cc] ss:$16 sps:$4 sm:$0xff]  }
  0xc2   : > { %v266_v45 = vld [vmem:[%s5589_s25 + $0x120] sm:$0xff] }
  0xc3   : > { %v274_v46 = vld [vmem:[%s5589_s25 + $0x160] sm:$0xff] }
  0xc4   : > { %2334 = vmatpush1.bf16.msra.mxu0 %v5138_v53  ;;  %2946 = vmatpush1.bf16.msra.mxu1 %v5141_v56  ;;  %v5195_v53 = vld [vmem:[%s6709_s1 + $0x5c8] ss:$16 sps:$4 sm:$0xff]   ;;  %v5203_v56 = vld [vmem:[%s6709_s1 + $0x5ec] ss:$16 sps:$4 sm:$0xff]  }
  0xc5   : > { %2335 = vmatprep.subr.bf16.mxu0 %v5146_v57  ;;  %2947 = vmatprep.subr.bf16.mxu1 %v5149_v58  ;;  %v360_v57 = vld [vmem:[%s5589_s25 + $0x410] sm:$0xff] }
  0xc6   : > { %2233 = vmatmul.mubr.bf16.gmra.mrb[12].mxu0 %v448_v59  ;;  %2845 = vmatmul.mubr.bf16.gmra.mrb[12].mxu1 %v448_v59  ;;  %v368_v58 = vld [vmem:[%s5589_s25 + $0x450] sm:$0xff]  ;;  %v377_v59 = vld [vmem:[%s5589_s25 + $0x498] sm:$0xff] }
  0xc7   : > { %2242 = vmatprep.mubr.bf16.mxu0 %v457_v60  ;;  %2854 = vmatprep.mubr.bf16.mxu1 %v457_v60  ;;  %v385_v60 = vld [vmem:[%s5589_s25 + $0x4d8] sm:$0xff]  ;;  %v488_v1 = vpack.c.bf16 %v368_v58, %v360_v57  ;;  %v5236_v57 = vld [vmem:[%s6709_s1 + $0x6a4] ss:$16 sps:$4 sm:$0xff]  }
  0xc8   : > { %2336 = vmatpush1.bf16.msra.mxu0 %v5144_v61  ;;  %2948 = vmatpush1.bf16.msra.mxu1 %v5147_v62  ;;  %v5198_v61 = vld [vmem:[%s6709_s1 + $0x5e0] ss:$16 sps:$4 sm:$0xff]   ;;  %v5201_v62 = vld [vmem:[%s6709_s1 + $0x5e8] ss:$16 sps:$4 sm:$0xff]   ;;  %v497_v2 = vpack.c.bf16 %v385_v60, %v377_v59  ;;  %v5239_v58 = vld [vmem:[%s6709_s1 + $0x6ac] ss:$16 sps:$4 sm:$0xff]  }
  0xc9   : > { %2337 = vmatprep.subr.bf16.mxu0 %v5152_v63  ;;  %2949 = vmatprep.subr.bf16.mxu1 %v5155_v0  ;;  %v5206_v63 = vld [vmem:[%s6709_s1 + $0x604] ss:$16 sps:$4 sm:$0xff]   ;;  %v5209_v0 = vld [vmem:[%s6709_s1 + $0x60c] ss:$16 sps:$4 sm:$0xff]  }
  0xca   : > { %v282_v59 = vld [vmem:[%s5589_s25 + $0x1a0] sm:$0xff] }
  0xcb   : > { %v290_v60 = vld [vmem:[%s5589_s25 + $0x1e0] sm:$0xff] }
  0xcc   : > { %2338 = vmatpush1.bf16.msra.mxu0 %v5150_v5  ;;  %2950 = vmatpush1.bf16.msra.mxu1 %v5153_v6  ;;  %v393_v5 = vld [vmem:[%s5589_s25 + $0x518] sm:$0xff] }
  0xcd   : > { %2339 = vmatprep.subr.bf16.mxu0 %v5158_v7  ;;  %2951 = vmatprep.subr.bf16.mxu1 %v5161_v8  ;;  %v401_v6 = vld [vmem:[%s5589_s25 + $0x558] sm:$0xff]  ;;  %v496_v7 = vpack.c.bf16 %v384_v4, %v376_v3  ;;  %v450_v3 = vpack.c.bf16 %v290_v60, %v282_v59  ;;  %v378_v59 = vld [vmem:[%s5589_s25 + $0x4a0] sm:$0xff] }
  0xce   : > { %2243 = vmatmul.mubr.bf16.gmra.mrb[16].mxu0 %v456_v9  ;;  %2855 = vmatmul.mubr.bf16.gmra.mrb[16].mxu1 %v456_v9  ;;  %v505_v8 = vpack.c.bf16 %v401_v6, %v393_v5  ;;  %v392_v9 = vld [vmem:[%s5589_s25 + $0x510] sm:$0xff]  ;;  %v5243_v6 = vld [vmem:[%s6709_s1 + $0x6c8] ss:$16 sps:$4 sm:$0xff]   ;;  %v386_v60 = vld [vmem:[%s5589_s25 + $0x4e0] sm:$0xff] }
  0xcf   : > { %2252 = vmatprep.mubr.bf16.mxu0 %v465_v10  ;;  %2864 = vmatprep.mubr.bf16.mxu1 %v465_v10  ;;  %v400_v10 = vld [vmem:[%s5589_s25 + $0x550] sm:$0xff] }
  0xd0   : > { %2340 = vmatpush1.bf16.msra.mxu0 %v5156_v11  ;;  %2952 = vmatpush1.bf16.msra.mxu1 %v5159_v12  ;;  %v409_v11 = vld [vmem:[%s5589_s25 + $0x598] sm:$0xff]  ;;  %v5240_v5 = vld [vmem:[%s6709_s1 + $0x6c0] ss:$16 sps:$4 sm:$0xff]  }
  0xd1   : > { %2341 = vmatprep.subr.bf16.mxu0 %v5164_v13  ;;  %2953 = vmatprep.subr.bf16.mxu1 %v5167_v14  ;;  %v417_v12 = vld [vmem:[%s5589_s25 + $0x5d8] sm:$0xff]  ;;  %v504_v13 = vpack.c.bf16 %v400_v10, %v392_v9  ;;  %v298_v9 = vld [vmem:[%s5589_s25 + $0x220] sm:$0xff] }
  0xd2   : > { %v513_v14 = vpack.c.bf16 %v417_v12, %v409_v11  ;;  %v306_v10 = vld [vmem:[%s5589_s25 + $0x260] sm:$0xff]  ;;  %v315_v11 = vld [vmem:[%s5589_s25 + $0x2a8] sm:$0xff] }
  0xd3   : > { %v323_v12 = vld [vmem:[%s5589_s25 + $0x2e8] sm:$0xff] }
  0xd4   : > { %2342 = vmatpush1.bf16.msra.mxu0 %v5162_v19  ;;  %2954 = vmatpush1.bf16.msra.mxu1 %v5165_v20  ;;  %v512_v19 = vpack.c.bf16 %v416_v16, %v408_v15  ;;  %v427_v20 = vpack.c.bf16 %v243_v18, %v235_v17  ;;  %v5254_v15 = vld [vmem:[%s6709_s1 + $0x704] ss:$16 sps:$4 sm:$0xff]   ;;  %v5257_v16 = vld [vmem:[%s6709_s1 + $0x70c] ss:$16 sps:$4 sm:$0xff]   ;;  %v458_v17 = vpack.c.bf16 %v306_v10, %v298_v9 }
  0xd5   : > { %2343 = vmatprep.subr.bf16.mxu0 %v5170_v21  ;;  %2955 = vmatprep.subr.bf16.mxu1 %v5173_v22  ;;  %v234_v21 = vld [vmem:[%s5589_s25 + $0x20] sm:$0xff]  ;;  %v467_v18 = vpack.c.bf16 %v323_v12, %v315_v11  ;;  %v237_v9 = vld [vmem:[%s5589_s25 + $0x38] sm:$0xff] }
  0xd6   : > { %2253 = vmatmul.mubr.bf16.gmra.mrb[20].mxu0 %v464_v23  ;;  %2865 = vmatmul.mubr.bf16.gmra.mrb[20].mxu1 %v464_v23  ;;  %v242_v22 = vld [vmem:[%s5589_s25 + $0x60] sm:$0xff]  ;;  %v251_v23 = vld [vmem:[%s5589_s25 + $0xa8] sm:$0xff]  ;;  %v245_v10 = vld [vmem:[%s5589_s25 + $0x78] sm:$0xff] }
  0xd7   : > { %2262 = vmatprep.mubr.bf16.mxu0 %v473_v26  ;;  %2874 = vmatprep.mubr.bf16.mxu1 %v473_v26  ;;  %v5204_v26 = vld [vmem:[%s6709_s1 + $0x600] ss:$16 sps:$4 sm:$0xff]   ;;  %v429_v12 = vpack.c.bf16 %v245_v10, %v237_v9  ;;  %v341_v9 = vld [vmem:[%s5589_s25 + $0x378] sm:$0xff] }
  0xd8   : > { %2344 = vmatpush1.bf16.msra.mxu0 %v5168_v24  ;;  %2956 = vmatpush1.bf16.msra.mxu1 %v5171_v25  ;;  %v259_v24 = vld [vmem:[%s5589_s25 + $0xe8] sm:$0xff]  ;;  %v426_v25 = vpack.c.bf16 %v242_v22, %v234_v21  ;;  %v5260_v21 = vld [vmem:[%s6709_s1 + $0x724] ss:$16 sps:$4 sm:$0xff]  }
  0xd9   : > { %2345 = vmatprep.subr.bf16.mxu0 %v5176_v27  ;;  %2957 = vmatprep.subr.bf16.mxu1 %v5179_v28  ;;  %v5207_v27 = vld [vmem:[%s6709_s1 + $0x608] ss:$16 sps:$4 sm:$0xff]   ;;  %v435_v28 = vpack.c.bf16 %v259_v24, %v251_v23  ;;  %v5263_v22 = vld [vmem:[%s6709_s1 + $0x72c] ss:$16 sps:$4 sm:$0xff]   ;;  %v314_v23 = vld [vmem:[%s5589_s25 + $0x2a0] sm:$0xff] }
  0xda   : > { %v322_v24 = vld [vmem:[%s5589_s25 + $0x2e0] sm:$0xff] }
  0xdc   : > { %2346 = vmatpush1.bf16.msra.mxu0 %v5174_v33  ;;  %2958 = vmatpush1.bf16.msra.mxu1 %v5177_v34  ;;  %v5210_v33 = vld [vmem:[%s6709_s1 + $0x620] ss:$16 sps:$4 sm:$0xff]   ;;  %v5213_v34 = vld [vmem:[%s6709_s1 + $0x628] ss:$16 sps:$4 sm:$0xff]  }
  0xdd   : > { %2347 = vmatprep.subr.bf16.mxu0 %v5182_v35  ;;  %2959 = vmatprep.subr.bf16.mxu1 %v5185_v36  ;;  %v267_v35 = vld [vmem:[%s5589_s25 + $0x128] sm:$0xff] }
  0xde   : > { %2263 = vmatmul.mubr.bf16.gmra.mrb[24].mxu0 %v472_v37  ;;  %2875 = vmatmul.mubr.bf16.gmra.mrb[24].mxu1 %v472_v37  ;;  %v275_v36 = vld [vmem:[%s5589_s25 + $0x168] sm:$0xff]  ;;  %v5218_v37 = vld [vmem:[%s6709_s1 + $0x644] ss:$16 sps:$4 sm:$0xff]  }
  0xdf   : > { %2272 = vmatprep.mubr.bf16.mxu0 %v481_v40  ;;  %2884 = vmatprep.mubr.bf16.mxu1 %v481_v40  ;;  %v443_v40 = vpack.c.bf16 %v275_v36, %v267_v35  ;;  %v5272_v35 = vld [vmem:[%s6709_s1 + $0x764] ss:$16 sps:$4 sm:$0xff]   ;;  %v5275_v36 = vld [vmem:[%s6709_s1 + $0x76c] ss:$16 sps:$4 sm:$0xff]  }
  0xe0   : > { %2348 = vmatpush1.bf16.msra.mxu0 %v5180_v38  ;;  %2960 = vmatpush1.bf16.msra.mxu1 %v5183_v39  ;;  %v5221_v38 = vld [vmem:[%s6709_s1 + $0x64c] ss:$16 sps:$4 sm:$0xff]   ;;  %v434_v39 = vpack.c.bf16 %v258_v32, %v250_v31  ;;  %v466_v31 = vpack.c.bf16 %v322_v24, %v314_v23  ;;  %v252_v23 = vld [vmem:[%s5589_s25 + $0xb0] sm:$0xff] }
  0xe1   : > { %2349 = vmatprep.subr.bf16.mxu0 %v5188_v41  ;;  %2961 = vmatprep.subr.bf16.mxu1 %v5191_v42  ;;  %v5216_v41 = vld [vmem:[%s6709_s1 + $0x640] ss:$16 sps:$4 sm:$0xff]   ;;  %v5219_v42 = vld [vmem:[%s6709_s1 + $0x648] ss:$16 sps:$4 sm:$0xff]  }
  0xe2   : > { %v260_v24 = vld [vmem:[%s5589_s25 + $0xf0] sm:$0xff] }
  0xe4   : > { %2350 = vmatpush1.bf16.msra.mxu0 %v5186_v47  ;;  %2962 = vmatpush1.bf16.msra.mxu1 %v5189_v48  ;;  %v283_v47 = vld [vmem:[%s5589_s25 + $0x1a8] sm:$0xff] }
  0xe5   : > { %2351 = vmatprep.subr.bf16.mxu0 %v5194_v49  ;;  %2963 = vmatprep.subr.bf16.mxu1 %v5197_v50  ;;  %v291_v48 = vld [vmem:[%s5589_s25 + $0x1e8] sm:$0xff]  ;;  %v5222_v49 = vld [vmem:[%s6709_s1 + $0x660] ss:$16 sps:$4 sm:$0xff]  }
  0xe6   : > { %2273 = vmatmul.mubr.bf16.gmra.mrb[28].mxu0 %v480_v51  ;;  %2885 = vmatmul.mubr.bf16.gmra.mrb[28].mxu1 %v480_v51  ;;  %v5225_v50 = vld [vmem:[%s6709_s1 + $0x668] ss:$16 sps:$4 sm:$0xff]   ;;  %v5230_v51 = vld [vmem:[%s6709_s1 + $0x684] ss:$16 sps:$4 sm:$0xff]  }
  0xe7   : > { %2282 = vmatprep.mubr.bf16.mxu0 %v489_v54  ;;  %2894 = vmatprep.mubr.bf16.mxu1 %v489_v54  ;;  %v451_v54 = vpack.c.bf16 %v291_v48, %v283_v47  ;;  %v363_v47 = vld [vmem:[%s5589_s25 + $0x428] sm:$0xff] }
  0xe8   : > { %2352 = vmatpush1.bf16.msra.mxu0 %v5192_v52  ;;  %2964 = vmatpush1.bf16.msra.mxu1 %v5195_v53  ;;  %v5233_v52 = vld [vmem:[%s6709_s1 + $0x68c] ss:$16 sps:$4 sm:$0xff]   ;;  %v442_v53 = vpack.c.bf16 %v274_v46, %v266_v45  ;;  %v346_v45 = vld [vmem:[%s5589_s25 + $0x3a0] sm:$0xff] }
  0xe9   : > { %2353 = vmatprep.subr.bf16.mxu0 %v5200_v55  ;;  %2965 = vmatprep.subr.bf16.mxu1 %v5203_v56  ;;  %v5228_v55 = vld [vmem:[%s6709_s1 + $0x680] ss:$16 sps:$4 sm:$0xff]   ;;  %v5231_v56 = vld [vmem:[%s6709_s1 + $0x688] ss:$16 sps:$4 sm:$0xff]  }
  0xea   : > { %v354_v46 = vld [vmem:[%s5589_s25 + $0x3e0] sm:$0xff]  ;;  %v371_v48 = vld [vmem:[%s5589_s25 + $0x468] sm:$0xff] }
  0xec   : > { %2354 = vmatpush1.bf16.msra.mxu0 %v5198_v61  ;;  %2966 = vmatpush1.bf16.msra.mxu1 %v5201_v62  ;;  %v299_v61 = vld [vmem:[%s5589_s25 + $0x228] sm:$0xff] }
  0xed   : > { %2476 = vmatprep.subr.bf16.mxu0 %v5206_v63  ;;  %3088 = vmatprep.subr.bf16.mxu1 %v5209_v0  ;;  %v307_v62 = vld [vmem:[%s5589_s25 + $0x268] sm:$0xff]  ;;  %v5234_v63 = vld [vmem:[%s6709_s1 + $0x6a0] ss:$16 sps:$4 sm:$0xff]  }
  0xee   : > { %2283 = vmatmul.mubr.bf16.gmra.mrb[32].mxu0 %v488_v1  ;;  %2895 = vmatmul.mubr.bf16.gmra.mrb[32].mxu1 %v488_v1  ;;  %v5237_v0 = vld [vmem:[%s6709_s1 + $0x6a8] ss:$16 sps:$4 sm:$0xff]   ;;  %v5242_v1 = vld [vmem:[%s6709_s1 + $0x6c4] ss:$16 sps:$4 sm:$0xff]   ;;  %v459_v4 = vpack.c.bf16 %v307_v62, %v299_v61 }
  0xef   : > { %2292 = vmatprep.mubr.bf16.mxu0 %v497_v2  ;;  %2904 = vmatprep.mubr.bf16.mxu1 %v497_v2  ;;  %v5245_v2 = vld [vmem:[%s6709_s1 + $0x6cc] ss:$16 sps:$4 sm:$0xff]  }
  0xf0   : > { %v395_v61 = vld [vmem:[%s5589_s25 + $0x528] sm:$0xff] }
  0xf1   : > { %v403_v62 = vld [vmem:[%s5589_s25 + $0x568] sm:$0xff] }
  0xf6   : > { %2293 = vmatmul.mubr.bf16.gmra.mrb[36].mxu0 %v496_v7  ;;  %2905 = vmatmul.mubr.bf16.gmra.mrb[36].mxu1 %v496_v7  ;;  %v5248_v7 = vld [vmem:[%s6709_s1 + $0x6e4] ss:$16 sps:$4 sm:$0xff]  }
  0xf7   : > { %2302 = vmatprep.mubr.bf16.mxu0 %v505_v8  ;;  %2914 = vmatprep.mubr.bf16.mxu1 %v505_v8  ;;  %v5251_v8 = vld [vmem:[%s6709_s1 + $0x6ec] ss:$16 sps:$4 sm:$0xff]  }
  0xfe   : > { %2303 = vmatmul.mubr.bf16.gmra.mrb[40].mxu0 %v504_v13  ;;  %2915 = vmatmul.mubr.bf16.gmra.mrb[40].mxu1 %v504_v13  ;;  %v5246_v13 = vld [vmem:[%s6709_s1 + $0x6e0] ss:$16 sps:$4 sm:$0xff]  }
  0xff   : > { %2312 = vmatprep.mubr.bf16.mxu0 %v513_v14  ;;  %2924 = vmatprep.mubr.bf16.mxu1 %v513_v14  ;;  %v5249_v14 = vld [vmem:[%s6709_s1 + $0x6e8] ss:$16 sps:$4 sm:$0xff]  }
 0x106   : > { %2313 = vmatmul.mubr.bf16.gmra.mrb[44].mxu0 %v512_v19  ;;  %2925 = vmatmul.mubr.bf16.gmra.mrb[44].mxu1 %v512_v19  ;;  %v5252_v19 = vld [vmem:[%s6709_s1 + $0x700] ss:$16 sps:$4 sm:$0xff]  }
 0x107   : > { %2355 = vmatprep.mubr.bf16.mxu0 %v427_v20  ;;  %2967 = vmatprep.mubr.bf16.mxu1 %v427_v20  ;;  %v5255_v20 = vld [vmem:[%s6709_s1 + $0x708] ss:$16 sps:$4 sm:$0xff]  }
 0x10e   : > { %2356 = vmatmul.mubr.bf16.vlgmr.msra.gmra.mrb[0].mxu0 %v426_v25  ;;  %2968 = vmatmul.mubr.bf16.vlgmr.msra.gmra.mrb[0].mxu1 %v426_v25  ;;  %v331_v25 = vld [vmem:[%s5589_s25 + $0x328] sm:$0xff] }
 0x10f   : > { %2477 = vmatpush1.bf16.msra.mxu0 %v5204_v26  ;;  %3089 = vmatpush1.bf16.msra.mxu1 %v5207_v27  ;;  %v339_v26 = vld [vmem:[%s5589_s25 + $0x368] sm:$0xff]  ;;  %v5258_v27 = vld [vmem:[%s6709_s1 + $0x720] ss:$16 sps:$4 sm:$0xff]  }
 0x110   : > { %2365 = vmatprep.mubr.bf16.mxu0 %v435_v28  ;;  %2977 = vmatprep.mubr.bf16.mxu1 %v435_v28  ;;  %v5261_v28 = vld [vmem:[%s6709_s1 + $0x728] ss:$16 sps:$4 sm:$0xff]   ;;  %v475_v32 = vpack.c.bf16 %v339_v26, %v331_v25 }
 0x111   : > { %2478 = vmatprep.subr.bf16.mxu0 %v5212_v29  ;;  %3090 = vmatprep.subr.bf16.mxu1 %v5215_v30  ;;  %v5266_v29 = vld [vmem:[%s6709_s1 + $0x744] ss:$16 sps:$4 sm:$0xff]   ;;  %v5269_v30 = vld [vmem:[%s6709_s1 + $0x74c] ss:$16 sps:$4 sm:$0xff]  }
 0x112   : > { %v269_v25 = vld [vmem:[%s5589_s25 + $0x138] sm:$0xff] }
 0x113   : > { %2479 = vmatpush1.bf16.msra.mxu0 %v5210_v33  ;;  %3091 = vmatpush1.bf16.msra.mxu1 %v5213_v34  ;;  %v5264_v33 = vld [vmem:[%s6709_s1 + $0x740] ss:$16 sps:$4 sm:$0xff]   ;;  %v5267_v34 = vld [vmem:[%s6709_s1 + $0x748] ss:$16 sps:$4 sm:$0xff]  }
 0x114   : > { %2480 = vmatprep.subr.bf16.mxu0 %v5218_v37  ;;  %3092 = vmatprep.subr.bf16.mxu1 %v5221_v38  ;;  %v330_v37 = vld [vmem:[%s5589_s25 + $0x320] sm:$0xff]  ;;  %v277_v26 = vld [vmem:[%s5589_s25 + $0x178] sm:$0xff] }
 0x115   : > { %v338_v38 = vld [vmem:[%s5589_s25 + $0x360] sm:$0xff] }
 0x116   : > { %2366 = vmatmul.mubr.bf16.gmra.mrb[4].mxu0 %v434_v39  ;;  %2978 = vmatmul.mubr.bf16.gmra.mrb[4].mxu1 %v434_v39  ;;  %v347_v39 = vld [vmem:[%s5589_s25 + $0x3a8] sm:$0xff] }
 0x117   : > { %2375 = vmatprep.mubr.bf16.mxu0 %v443_v40  ;;  %2987 = vmatprep.mubr.bf16.mxu1 %v443_v40  ;;  %v355_v40 = vld [vmem:[%s5589_s25 + $0x3e8] sm:$0xff] }
 0x118   : > { %2481 = vmatpush1.bf16.msra.mxu0 %v5216_v41  ;;  %3093 = vmatpush1.bf16.msra.mxu1 %v5219_v42  ;;  %v5270_v41 = vld [vmem:[%s6709_s1 + $0x760] ss:$16 sps:$4 sm:$0xff]   ;;  %v5273_v42 = vld [vmem:[%s6709_s1 + $0x768] ss:$16 sps:$4 sm:$0xff]  }
 0x119   : > { %2482 = vmatprep.subr.bf16.mxu0 %v5224_v43  ;;  %3094 = vmatprep.subr.bf16.mxu1 %v5227_v44  ;;  %v474_v43 = vpack.c.bf16 %v338_v38, %v330_v37  ;;  %v483_v44 = vpack.c.bf16 %v355_v40, %v347_v39  ;;  %v268_v37 = vld [vmem:[%s5589_s25 + $0x130] sm:$0xff]  ;;  %v285_v39 = vld [vmem:[%s5589_s25 + $0x1b8] sm:$0xff] }
 0x11a   : > { %v276_v38 = vld [vmem:[%s5589_s25 + $0x170] sm:$0xff]  ;;  %v293_v40 = vld [vmem:[%s5589_s25 + $0x1f8] sm:$0xff] }
 0x11c   : > { %2483 = vmatpush1.bf16.msra.mxu0 %v5222_v49  ;;  %3095 = vmatpush1.bf16.msra.mxu1 %v5225_v50  ;;  %v482_v49 = vpack.c.bf16 %v354_v46, %v346_v45  ;;  %v491_v50 = vpack.c.bf16 %v371_v48, %v363_v47  ;;  %v444_v45 = vpack.c.bf16 %v276_v38, %v268_v37  ;;  %v5293_v47 = vld [vmem:[%s6711_s3 + $0x20] sm:$0xff]   ;;  %v404_v37 = vld [vmem:[%s5589_s25 + $0x570] sm:$0xff]  ;;  %v413_v38 = vld [vmem:[%s5589_s25 + $0x5b8] sm:$0xff] }
 0x11d   : > { %2484 = vmatprep.subr.bf16.mxu0 %v5230_v51  ;;  %3096 = vmatprep.subr.bf16.mxu1 %v5233_v52  ;;  %v5276_v51 = vld [vmem:[%s6711_s3 + $0x40] sm:$0xff]   ;;  %v453_v46 = vpack.c.bf16 %v293_v40, %v285_v39  ;;  %v421_v39 = vld [vmem:[%s5589_s25 + $0x5f8] sm:$0xff] }
 0x11e   : > { %2376 = vmatmul.mubr.bf16.gmra.mrb[8].mxu0 %v442_v53  ;;  %2988 = vmatmul.mubr.bf16.gmra.mrb[8].mxu1 %v442_v53  ;;  %v5278_v52 = vld [vmem:[%s6711_s3 + $0xc0] sm:$0xff]  }
 0x11f   : > { %2385 = vmatprep.mubr.bf16.mxu0 %v451_v54  ;;  %2997 = vmatprep.mubr.bf16.mxu1 %v451_v54  ;;  %v362_v53 = vld [vmem:[%s5589_s25 + $0x420] sm:$0xff] }
 0x120   : > { %2485 = vmatpush1.bf16.msra.mxu0 %v5228_v55  ;;  %3097 = vmatpush1.bf16.msra.mxu1 %v5231_v56  ;;  %v370_v54 = vld [vmem:[%s5589_s25 + $0x460] sm:$0xff]  ;;  %v379_v55 = vld [vmem:[%s5589_s25 + $0x4a8] sm:$0xff] }
 0x121   : > { %2486 = vmatprep.subr.bf16.mxu0 %v5236_v57  ;;  %3098 = vmatprep.subr.bf16.mxu1 %v5239_v58  ;;  %v387_v56 = vld [vmem:[%s5589_s25 + $0x4e8] sm:$0xff]  ;;  %v490_v57 = vpack.c.bf16 %v370_v54, %v362_v53  ;;  %v5295_v48 = vld [vmem:[%s6711_s3 + $0xa0] sm:$0xff]   ;;  %v301_v53 = vld [vmem:[%s5589_s25 + $0x238] sm:$0xff] }
 0x122   : > { %v499_v58 = vpack.c.bf16 %v387_v56, %v379_v55  ;;  %v309_v54 = vld [vmem:[%s5589_s25 + $0x278] sm:$0xff]  ;;  %v5297_v55 = vld [vmem:[%s6711_s3 + $0x28] sm:$0xff]  }
 0x123   : > { %v5299_v56 = vld [vmem:[%s6711_s3 + $0xa8] sm:$0xff]  }
 0x124   : > { %2487 = vmatpush1.bf16.msra.mxu0 %v5234_v63  ;;  %3099 = vmatpush1.bf16.msra.mxu1 %v5237_v0  ;;  %v498_v63 = vpack.c.bf16 %v386_v60, %v378_v59  ;;  %v507_v0 = vpack.c.bf16 %v403_v62, %v395_v61  ;;  %v461_v60 = vpack.c.bf16 %v309_v54, %v301_v53  ;;  %v5301_v61 = vld [vmem:[%s6711_s3 + $0x30] sm:$0xff]  }
 0x125   : > { %2488 = vmatprep.subr.bf16.mxu0 %v5242_v1  ;;  %3100 = vmatprep.subr.bf16.mxu1 %v5245_v2  ;;  %v394_v1 = vld [vmem:[%s5589_s25 + $0x520] sm:$0xff]  ;;  %v5303_v62 = vld [vmem:[%s6711_s3 + $0xb0] sm:$0xff]  }
 0x126   : > { %2386 = vmatmul.mubr.bf16.gmra.mrb[12].mxu0 %v450_v3  ;;  %2998 = vmatmul.mubr.bf16.gmra.mrb[12].mxu1 %v450_v3  ;;  %v402_v2 = vld [vmem:[%s5589_s25 + $0x560] sm:$0xff]  ;;  %v411_v3 = vld [vmem:[%s5589_s25 + $0x5a8] sm:$0xff] }
 0x127   : > { %2395 = vmatprep.mubr.bf16.mxu0 %v459_v4  ;;  %3007 = vmatprep.mubr.bf16.mxu1 %v459_v4  ;;  %v419_v4 = vld [vmem:[%s5589_s25 + $0x5e8] sm:$0xff] }
 0x128   : > { %2489 = vmatpush1.bf16.msra.mxu0 %v5240_v5  ;;  %3101 = vmatpush1.bf16.msra.mxu1 %v5243_v6  ;;  %v506_v5 = vpack.c.bf16 %v402_v2, %v394_v1  ;;  %v515_v6 = vpack.c.bf16 %v419_v4, %v411_v3  ;;  %v308_v1 = vld [vmem:[%s5589_s25 + $0x270] sm:$0xff]  ;;  %v317_v2 = vld [vmem:[%s5589_s25 + $0x2b8] sm:$0xff] }
 0x129   : > { %2490 = vmatprep.subr.bf16.mxu0 %v5248_v7  ;;  %3102 = vmatprep.subr.bf16.mxu1 %v5251_v8  ;;  %v410_v7 = vld [vmem:[%s5589_s25 + $0x5a0] sm:$0xff]  ;;  %v325_v3 = vld [vmem:[%s5589_s25 + $0x2f8] sm:$0xff] }
 0x12a   : > { %v418_v8 = vld [vmem:[%s5589_s25 + $0x5e0] sm:$0xff] }
 0x12b   : > { %v514_v11 = vpack.c.bf16 %v418_v8, %v410_v7  ;;  %v324_v7 = vld [vmem:[%s5589_s25 + $0x2f0] sm:$0xff]  ;;  %v333_v8 = vld [vmem:[%s5589_s25 + $0x338] sm:$0xff] }
 0x12c   : > { %2491 = vmatpush1.bf16.msra.mxu0 %v5246_v13  ;;  %3103 = vmatpush1.bf16.msra.mxu1 %v5249_v14  ;;  %v236_v13 = vld [vmem:[%s5589_s25 + $0x30] sm:$0xff] }
 0x12d   : > { %2492 = vmatprep.subr.bf16.mxu0 %v5254_v15  ;;  %3104 = vmatprep.subr.bf16.mxu1 %v5257_v16  ;;  %v244_v14 = vld [vmem:[%s5589_s25 + $0x70] sm:$0xff]  ;;  %v253_v15 = vld [vmem:[%s5589_s25 + $0xb8] sm:$0xff] }
 0x12e   : > { %2396 = vmatmul.mubr.bf16.gmra.mrb[16].mxu0 %v458_v17  ;;  %3008 = vmatmul.mubr.bf16.gmra.mrb[16].mxu1 %v458_v17  ;;  %v261_v16 = vld [vmem:[%s5589_s25 + $0xf8] sm:$0xff]  ;;  %v428_v17 = vpack.c.bf16 %v244_v14, %v236_v13  ;;  %v340_v13 = vld [vmem:[%s5589_s25 + $0x370] sm:$0xff] }
 0x12f   : > { %2405 = vmatprep.mubr.bf16.mxu0 %v467_v18  ;;  %3017 = vmatprep.mubr.bf16.mxu1 %v467_v18  ;;  %v437_v18 = vpack.c.bf16 %v261_v16, %v253_v15  ;;  %v349_v14 = vld [vmem:[%s5589_s25 + $0x3b8] sm:$0xff] }
 0x130   : > { %2493 = vmatpush1.bf16.msra.mxu0 %v5252_v19  ;;  %3105 = vmatpush1.bf16.msra.mxu1 %v5255_v20  ;;  %v5277_v19 = vld [vmem:[%s6711_s3] sm:$0xff]   ;;  %v357_v15 = vld [vmem:[%s5589_s25 + $0x3f8] sm:$0xff] }
 0x131   : > { %2494 = vmatprep.subr.bf16.mxu0 %v5260_v21  ;;  %3106 = vmatprep.subr.bf16.mxu1 %v5263_v22  ;;  %v5279_v20 = vld [vmem:[%s6711_s3 + $0x80] sm:$0xff]   ;;  %v5280_v21 = vld [vmem:[%s6711_s3 + $0x48] sm:$0xff]  }
 0x132   : > { %v5282_v22 = vld [vmem:[%s6711_s3 + $0xc8] sm:$0xff]  }
 0x134   : > { %2495 = vmatpush1.bf16.msra.mxu0 %v5258_v27  ;;  %3107 = vmatpush1.bf16.msra.mxu1 %v5261_v28  ;;  %v5281_v27 = vld [vmem:[%s6711_s3 + $0x8] sm:$0xff]  }
 0x135   : > { %2496 = vmatprep.subr.bf16.mxu0 %v5266_v29  ;;  %3108 = vmatprep.subr.bf16.mxu1 %v5269_v30  ;;  %v5283_v28 = vld [vmem:[%s6711_s3 + $0x88] sm:$0xff]   ;;  %v5284_v29 = vld [vmem:[%s6711_s3 + $0x50] sm:$0xff]  }
 0x136   : > { %2406 = vmatmul.mubr.bf16.gmra.mrb[20].mxu0 %v466_v31  ;;  %3018 = vmatmul.mubr.bf16.gmra.mrb[20].mxu1 %v466_v31  ;;  %v5286_v30 = vld [vmem:[%s6711_s3 + $0xd0] sm:$0xff]   ;;  %v436_v31 = vpack.c.bf16 %v260_v24, %v252_v23 }
 0x137   : > { %2415 = vmatprep.mubr.bf16.mxu0 %v475_v32  ;;  %3027 = vmatprep.mubr.bf16.mxu1 %v475_v32  ;;  %v445_v32 = vpack.c.bf16 %v277_v26, %v269_v25  ;;  %v364_v24 = vld [vmem:[%s5589_s25 + $0x430] sm:$0xff]  ;;  %v381_v26 = vld [vmem:[%s5589_s25 + $0x4b8] sm:$0xff] }
 0x138   : > { %2497 = vmatpush1.bf16.msra.mxu0 %v5264_v33  ;;  %3109 = vmatpush1.bf16.msra.mxu1 %v5267_v34  ;;  %v5285_v33 = vld [vmem:[%s6711_s3 + $0x10] sm:$0xff]  }
 0x139   : > { %2498 = vmatprep.subr.bf16.mxu0 %v5272_v35  ;;  %3110 = vmatprep.subr.bf16.mxu1 %v5275_v36  ;;  %v5287_v34 = vld [vmem:[%s6711_s3 + $0x90] sm:$0xff]   ;;  %v5288_v35 = vld [vmem:[%s6711_s3 + $0x58] sm:$0xff]  }
 0x13a   : > { %v5290_v36 = vld [vmem:[%s6711_s3 + $0xd8] sm:$0xff]   ;;  %v372_v25 = vld [vmem:[%s5589_s25 + $0x470] sm:$0xff] }
 0x13c   : > { %2499 = vmatpush1.bf16.msra.mxu0 %v5270_v41  ;;  %3111 = vmatpush1.bf16.msra.mxu1 %v5273_v42  ;;  %v5289_v41 = vld [vmem:[%s6711_s3 + $0x18] sm:$0xff]  }
 0x13d   : > { %4314 = vmatprep.subr.bf16.mxu0 %v5276_v51  ;;  %4402 = vmatprep.subr.bf16.mxu1 %v5278_v52  ;;  %v5291_v42 = vld [vmem:[%s6711_s3 + $0x98] sm:$0xff]   ;;  %v284_v51 = vld [vmem:[%s5589_s25 + $0x1b0] sm:$0xff] }
 0x13e   : > { %2416 = vmatmul.mubr.bf16.gmra.mrb[24].mxu0 %v474_v43  ;;  %3028 = vmatmul.mubr.bf16.gmra.mrb[24].mxu1 %v474_v43  ;;  %v5292_v43 = vld [vmem:[%s6711_s3 + $0x60] sm:$0xff]   ;;  %v292_v52 = vld [vmem:[%s5589_s25 + $0x1f0] sm:$0xff] }
 0x13f   : > { %2425 = vmatprep.mubr.bf16.mxu0 %v483_v44  ;;  %3037 = vmatprep.mubr.bf16.mxu1 %v483_v44  ;;  %v5294_v44 = vld [vmem:[%s6711_s3 + $0xe0] sm:$0xff]   ;;  %v452_v59 = vpack.c.bf16 %v292_v52, %v284_v51 }
 0x140   : > { %v758_v52 = vld [vmem:[%s6710_s2] sm:$0xf] }
 0x146   : > { %2426 = vmatmul.mubr.bf16.gmra.mrb[28].mxu0 %v482_v49  ;;  %3038 = vmatmul.mubr.bf16.gmra.mrb[28].mxu1 %v482_v49  ;;  %v5296_v49 = vld [vmem:[%s6711_s3 + $0x68] sm:$0xff]  }
 0x147   : > { %2435 = vmatprep.mubr.bf16.mxu0 %v491_v50  ;;  %3047 = vmatprep.mubr.bf16.mxu1 %v491_v50  ;;  %v5298_v50 = vld [vmem:[%s6711_s3 + $0xe8] sm:$0xff]  }
 0x14e   : > { %2436 = vmatmul.mubr.bf16.gmra.mrb[32].mxu0 %v490_v57  ;;  %3048 = vmatmul.mubr.bf16.gmra.mrb[32].mxu1 %v490_v57  ;;  %v5300_v57 = vld [vmem:[%s6711_s3 + $0x70] sm:$0xff]  }
 0x14f   : > { %2445 = vmatprep.mubr.bf16.mxu0 %v499_v58  ;;  %3057 = vmatprep.mubr.bf16.mxu1 %v499_v58  ;;  %v5302_v58 = vld [vmem:[%s6711_s3 + $0xf0] sm:$0xff]  }
 0x156   : > { %2446 = vmatmul.mubr.bf16.gmra.mrb[36].mxu0 %v498_v63  ;;  %3058 = vmatmul.mubr.bf16.gmra.mrb[36].mxu1 %v498_v63  ;;  %v5304_v63 = vld [vmem:[%s6711_s3 + $0x78] sm:$0xff]  }
 0x157   : > { %2455 = vmatprep.mubr.bf16.mxu0 %v507_v0  ;;  %3067 = vmatprep.mubr.bf16.mxu1 %v507_v0  ;;  %v300_v0 = vld [vmem:[%s5589_s25 + $0x230] sm:$0xff] }
 0x158   : > { %v460_v4 = vpack.c.bf16 %v308_v1, %v300_v0 }
 0x15e   : > { %2456 = vmatmul.mubr.bf16.gmra.mrb[40].mxu0 %v506_v5  ;;  %3068 = vmatmul.mubr.bf16.gmra.mrb[40].mxu1 %v506_v5  ;;  %v469_v5 = vpack.c.bf16 %v325_v3, %v317_v2 }
 0x15f   : > { %2465 = vmatprep.mubr.bf16.mxu0 %v515_v6  ;;  %3077 = vmatprep.mubr.bf16.mxu1 %v515_v6  ;;  %v316_v6 = vld [vmem:[%s5589_s25 + $0x2b0] sm:$0xff] }
 0x160   : > { %v468_v10 = vpack.c.bf16 %v324_v7, %v316_v6 }
 0x166   : > { %2466 = vmatmul.mubr.bf16.gmra.mrb[44].mxu0 %v514_v11  ;;  %3078 = vmatmul.mubr.bf16.gmra.mrb[44].mxu1 %v514_v11  ;;  %v477_v11 = vpack.c.bf16 %v341_v9, %v333_v8 }
 0x167   : > { %4252 = vmatprep.mubr.msk.bf16.mxu0 %vm1980_vm0, %v429_v12  ;;  %4264 = vmatprep.mubr.msk.bf16.mxu1 %vm1980_vm0, %v429_v12  ;;  %v332_v12 = vld [vmem:[%s5589_s25 + $0x330] sm:$0xff] }
 0x168   : > { %v476_v16 = vpack.c.bf16 %v340_v13, %v332_v12 }
 0x16e   : > { %2509 = vmatmul.mubr.bf16.vlgmr.msra.gmra.mrb[0].mxu0 %v428_v17  ;;  %3121 = vmatmul.mubr.bf16.vlgmr.msra.gmra.mrb[0].mxu1 %v428_v17  ;;  %v485_v17 = vpack.c.bf16 %v357_v15, %v349_v14 }
 0x16f   : > { %4253 = vmatprep.mubr.msk.bf16.mxu0 %vm1980_vm0, %v437_v18  ;;  %4265 = vmatprep.mubr.msk.bf16.mxu1 %vm1980_vm0, %v437_v18  ;;  %v348_v18 = vld [vmem:[%s5589_s25 + $0x3b0] sm:$0xff] }
 0x170   : > { %4315 = vmatpush3.bf16.msra.mxu0 %v5277_v19  ;;  %4403 = vmatpush3.bf16.msra.mxu1 %v5279_v20  ;;  %v356_v19 = vld [vmem:[%s5589_s25 + $0x3f0] sm:$0xff]  ;;  %v365_v20 = vld [vmem:[%s5589_s25 + $0x438] sm:$0xff] }
 0x171   : > { %4316 = vmatprep.subr.bf16.mxu0 %v5280_v21  ;;  %4404 = vmatprep.subr.bf16.mxu1 %v5282_v22  ;;  %v373_v21 = vld [vmem:[%s5589_s25 + $0x478] sm:$0xff]  ;;  %v484_v22 = vpack.c.bf16 %v356_v19, %v348_v18 }
 0x172   : > { %v493_v23 = vpack.c.bf16 %v373_v21, %v365_v20 }
 0x174   : > { %4317 = vmatpush3.bf16.msra.mxu0 %v5281_v27  ;;  %4405 = vmatpush3.bf16.msra.mxu1 %v5283_v28  ;;  %v389_v27 = vld [vmem:[%s5589_s25 + $0x4f8] sm:$0xff]  ;;  %v492_v28 = vpack.c.bf16 %v372_v25, %v364_v24 }
 0x175   : > { %4318 = vmatprep.subr.bf16.mxu0 %v5284_v29  ;;  %4406 = vmatprep.subr.bf16.mxu1 %v5286_v30  ;;  %v501_v29 = vpack.c.bf16 %v389_v27, %v381_v26  ;;  %v380_v30 = vld [vmem:[%s5589_s25 + $0x4b0] sm:$0xff] }
 0x176   : > { %2519 = vmatmul.mubr.bf16.gmra.mrb[4].mxu0 %v436_v31  ;;  %3131 = vmatmul.mubr.bf16.gmra.mrb[4].mxu1 %v436_v31  ;;  %v388_v31 = vld [vmem:[%s5589_s25 + $0x4f0] sm:$0xff] }
 0x177   : > { %4254 = vmatprep.mubr.msk.bf16.mxu0 %vm1980_vm0, %v445_v32  ;;  %4266 = vmatprep.mubr.msk.bf16.mxu1 %vm1980_vm0, %v445_v32  ;;  %v397_v32 = vld [vmem:[%s5589_s25 + $0x538] sm:$0xff] }
 0x178   : > { %4319 = vmatpush3.bf16.msra.mxu0 %v5285_v33  ;;  %4407 = vmatpush3.bf16.msra.mxu1 %v5287_v34  ;;  %v405_v33 = vld [vmem:[%s5589_s25 + $0x578] sm:$0xff]  ;;  %v500_v34 = vpack.c.bf16 %v388_v31, %v380_v30 }
 0x179   : > { %4320 = vmatprep.subr.bf16.mxu0 %v5288_v35  ;;  %4408 = vmatprep.subr.bf16.mxu1 %v5290_v36  ;;  %v509_v35 = vpack.c.bf16 %v405_v33, %v397_v32  ;;  %v396_v36 = vld [vmem:[%s5589_s25 + $0x530] sm:$0xff] }
 0x17a   : > { %v508_v40 = vpack.c.bf16 %v404_v37, %v396_v36 }
 0x17c   : > { %4321 = vmatpush3.bf16.msra.mxu0 %v5289_v41  ;;  %4409 = vmatpush3.bf16.msra.mxu1 %v5291_v42  ;;  %v517_v41 = vpack.c.bf16 %v421_v39, %v413_v38  ;;  %v412_v42 = vld [vmem:[%s5589_s25 + $0x5b0] sm:$0xff] }
 0x17d   : > { %4322 = vmatprep.subr.bf16.mxu0 %v5292_v43  ;;  %4410 = vmatprep.subr.bf16.mxu1 %v5294_v44  ;;  %v420_v43 = vld [vmem:[%s5589_s25 + $0x5f0] sm:$0xff] }
 0x17e   : > { %2529 = vmatmul.mubr.bf16.gmra.mrb[8].mxu0 %v444_v45  ;;  %3141 = vmatmul.mubr.bf16.gmra.mrb[8].mxu1 %v444_v45  ;;  %v516_v44 = vpack.c.bf16 %v420_v43, %v412_v42  ;;  %v5305_v45 = vld [vmem:[%s6711_s3 + $0x38] sm:$0xff]  }
 0x17f   : > { %4255 = vmatprep.mubr.msk.bf16.mxu0 %vm1980_vm0, %v453_v46  ;;  %4267 = vmatprep.mubr.msk.bf16.mxu1 %vm1980_vm0, %v453_v46  ;;  %v5306_v46 = vld [vmem:[%s6711_s3 + $0xf8] sm:$0xff]  }
 0x180   : > { %4323 = vmatpush3.bf16.msra.mxu0 %v5293_v47  ;;  %4411 = vmatpush3.bf16.msra.mxu1 %v5295_v48  ;;  %v5307_v47 = vld [vmem:[%s6711_s3 + $0xb8] sm:$0xff]   ;;  %v760_v48 = vlaneseq }
 0x181   : > { %4324 = vmatprep.subr.bf16.mxu0 %v5296_v49  ;;  %4412 = vmatprep.subr.bf16.mxu1 %v5298_v50 }
 0x182   : > { %v761_v49 = vshrl.u32 %v760_v48, 7 }
 0x184   : > { %4325 = vmatpush3.bf16.msra.mxu0 %v5297_v55  ;;  %4413 = vmatpush3.bf16.msra.mxu1 %v5299_v56  ;;  %v762_v50 = vsub.s32 0, %v761_v49  ;;  %v770_v51 = vsub.s32 2, %v761_v49  ;;  %v766_v53 = vsub.s32 1, %v761_v49  ;;  %v774_v54 = vsub.s32 3, %v761_v49 }
 0x185   : > { %4326 = vmatprep.subr.bf16.mxu0 %v5300_v57  ;;  %4414 = vmatprep.subr.bf16.mxu1 %v5302_v58 }
 0x186   : > { %2539 = vmatmul.mubr.bf16.gmra.mrb[12].mxu0 %v452_v59  ;;  %3151 = vmatmul.mubr.bf16.gmra.mrb[12].mxu1 %v452_v59  ;;  %v6494_v55 = vrot.slane %v758_v52, %v762_v50  ;;  %v6496_v56 = vrot.slane %v758_v52, %v770_v51  ;;  %v6498_v57 = vrot.slane %v758_v52, %v766_v53 }
 0x187   : > { %4256 = vmatprep.mubr.msk.bf16.mxu0 %vm1980_vm0, %v461_v60  ;;  %4268 = vmatprep.mubr.msk.bf16.mxu1 %vm1980_vm0, %v461_v60  ;;  %v6500_v58 = vrot.slane %v758_v52, %v774_v54 }
 0x188   : > { %4327 = vmatpush3.bf16.msra.mxu0 %v5301_v61  ;;  %4415 = vmatpush3.bf16.msra.mxu1 %v5303_v62 }
 0x189   : > { %4328 = vmatprep.subr.bf16.mxu0 %v5304_v63  ;;  %4416 = vmatprep.subr.bf16.mxu1 %v5306_v46 }
 0x18c   : > { %4329 = vmatpush3.bf16.msra.mxu0 %v5305_v45  ;;  %4417 = vmatpush3.bf16.msra.mxu1 %v5307_v47 }
 0x18e   : > { %2549 = vmatmul.mubr.bf16.gmra.mrb[16].mxu0 %v460_v4  ;;  %3161 = vmatmul.mubr.bf16.gmra.mrb[16].mxu1 %v460_v4 }
 0x18f   : > { %4257 = vmatprep.mubr.msk.bf16.mxu0 %vm1980_vm0, %v469_v5  ;;  %4269 = vmatprep.mubr.msk.bf16.mxu1 %vm1980_vm0, %v469_v5 }
 0x196   : > { %2559 = vmatmul.mubr.bf16.gmra.mrb[20].mxu0 %v468_v10  ;;  %3171 = vmatmul.mubr.bf16.gmra.mrb[20].mxu1 %v468_v10 }
 0x197   : > { %4258 = vmatprep.mubr.msk.bf16.mxu0 %vm1980_vm0, %v477_v11  ;;  %4270 = vmatprep.mubr.msk.bf16.mxu1 %vm1980_vm0, %v477_v11 }
 0x19e   : > { %2569 = vmatmul.mubr.bf16.gmra.mrb[24].mxu0 %v476_v16  ;;  %3181 = vmatmul.mubr.bf16.gmra.mrb[24].mxu1 %v476_v16 }
 0x19f   : > { %4259 = vmatprep.mubr.msk.bf16.mxu0 %vm1980_vm0, %v485_v17  ;;  %4271 = vmatprep.mubr.msk.bf16.mxu1 %vm1980_vm0, %v485_v17 }
 0x1a6   : > { %2579 = vmatmul.mubr.bf16.gmra.mrb[28].mxu0 %v484_v22  ;;  %3191 = vmatmul.mubr.bf16.gmra.mrb[28].mxu1 %v484_v22 }
 0x1a7   : > { %4260 = vmatprep.mubr.msk.bf16.mxu0 %vm1980_vm0, %v493_v23  ;;  %4272 = vmatprep.mubr.msk.bf16.mxu1 %vm1980_vm0, %v493_v23 }
 0x1ae   : > { %2589 = vmatmul.mubr.bf16.gmra.mrb[32].mxu0 %v492_v28  ;;  %3201 = vmatmul.mubr.bf16.gmra.mrb[32].mxu1 %v492_v28 }
 0x1af   : > { %4261 = vmatprep.mubr.msk.bf16.mxu0 %vm1980_vm0, %v501_v29  ;;  %4273 = vmatprep.mubr.msk.bf16.mxu1 %vm1980_vm0, %v501_v29 }
 0x1b6   : > { %2599 = vmatmul.mubr.bf16.gmra.mrb[36].mxu0 %v500_v34  ;;  %3211 = vmatmul.mubr.bf16.gmra.mrb[36].mxu1 %v500_v34 }
 0x1b7   : > { %4262 = vmatprep.mubr.msk.bf16.mxu0 %vm1980_vm0, %v509_v35  ;;  %4274 = vmatprep.mubr.msk.bf16.mxu1 %vm1980_vm0, %v509_v35 }
 0x1be   : > { %2609 = vmatmul.mubr.bf16.gmra.mrb[40].mxu0 %v508_v40  ;;  %3221 = vmatmul.mubr.bf16.gmra.mrb[40].mxu1 %v508_v40 }
 0x1bf   : > { %4263 = vmatprep.mubr.msk.bf16.mxu0 %vm1980_vm0, %v517_v41  ;;  %4275 = vmatprep.mubr.msk.bf16.mxu1 %vm1980_vm0, %v517_v41 }
 0x1c6   : > { %2619 = vmatmul.mubr.bf16.gmra.mrb[44].mxu0 %v516_v44  ;;  %3231 = vmatmul.mubr.bf16.gmra.mrb[44].mxu1 %v516_v44 }
 0x241   : > { %v2510_v59 = vpop.f32.mrb[0].mxu0  ;;  %v3122_v60 = vpop.f32.mrb[0].mxu1 }
 0x242   : > { %v4490_v61 = vadd.f32 %v2510_v59, %v6494_v55  ;;  %v4538_v62 = vadd.f32 %v3122_v60, %v6496_v56  ;;  %v2512_v63 = vpop.f32.mrb[1].mxu0  ;;  %v3124_v0 = vpop.f32.mrb[1].mxu1 }
 0x243   : > { %v4491_v1 = vadd.f32 %v2512_v63, %v6498_v57  ;;  %v4539_v2 = vadd.f32 %v3124_v0, %v6500_v58  ;;  %v2514_v3 = vpop.f32.mrb[2].mxu0  ;;  %v3126_v4 = vpop.f32.mrb[2].mxu1 }
 0x244   : > { %v4492_v5 = vadd.f32 %v2514_v3, %v6494_v55  ;;  %v4540_v6 = vadd.f32 %v3126_v4, %v6496_v56  ;;  %v2516_v7 = vpop.f32.mrb[3].mxu0  ;;  %v3128_v8 = vpop.f32.mrb[3].mxu1  ;;  %v3241_v11 = vmax.f32 %v4490_v61, 0.0  ;;  %v3243_v12 = vmax.f32 %v4538_v62, 0.0 }
 0x245   : > { %v4493_v9 = vadd.f32 %v2516_v7, %v6498_v57  ;;  %v4541_v10 = vadd.f32 %v3128_v8, %v6500_v58  ;;  %v3242_v15 = vmax.f32 %v4491_v1, 0.0  ;;  %v3244_v16 = vmax.f32 %v4539_v2, 0.0 }
 0x246   : > { %v3245_v13 = vmax.f32 %v4492_v5, 0.0  ;;  %v3247_v14 = vmax.f32 %v4540_v6, 0.0 }
 0x247   : > { %v3246_v17 = vmax.f32 %v4493_v9, 0.0  ;;  %v3248_v18 = vmax.f32 %v4541_v10, 0.0 }
 0x248   : > { %v3337_v19 = vpack.c.bf16 %v3245_v13, %v3241_v11  ;;  %v3339_v20 = vpack.c.bf16 %v3247_v14, %v3243_v12 }
 0x249   : > { %v3338_v21 = vpack.c.bf16 %v3246_v17, %v3242_v15  ;;  %v3340_v22 = vpack.c.bf16 %v3248_v18, %v3244_v16  ;;  %v2520_v23 = vpop.f32.mrb[4].mxu0  ;;  %v3132_v24 = vpop.f32.mrb[4].mxu1 }
 0x24a   : > { %v4494_v25 = vadd.f32 %v2520_v23, %v6494_v55  ;;  %v4542_v26 = vadd.f32 %v3132_v24, %v6496_v56  ;;  %v2522_v27 = vpop.f32.mrb[5].mxu0  ;;  %v3134_v28 = vpop.f32.mrb[5].mxu1 }
 0x24b   : > { %v4495_v29 = vadd.f32 %v2522_v27, %v6498_v57  ;;  %v4543_v30 = vadd.f32 %v3134_v28, %v6500_v58  ;;  %v2524_v31 = vpop.f32.mrb[6].mxu0  ;;  %v3136_v32 = vpop.f32.mrb[6].mxu1  ;;  %3680 = vmatprep.mubr.bf16.mxu0 %v3338_v21  ;;  %3809 = vmatprep.mubr.bf16.mxu1 %v3340_v22 }
 0x24c   : > { %v4496_v33 = vadd.f32 %v2524_v31, %v6494_v55  ;;  %v4544_v34 = vadd.f32 %v3136_v32, %v6496_v56  ;;  %v2526_v35 = vpop.f32.mrb[7].mxu0  ;;  %v3138_v36 = vpop.f32.mrb[7].mxu1  ;;  %3681 = vmatmul.mubr.bf16.vlgmr.msra.gmra.mrb[48].mxu0 %v3337_v19  ;;  %3810 = vmatmul.mubr.bf16.vlgmr.msra.gmra.mrb[48].mxu1 %v3339_v20  ;;  %v3249_v39 = vmax.f32 %v4494_v25, 0.0  ;;  %v3251_v40 = vmax.f32 %v4542_v26, 0.0 }
 0x24d   : > { %v4497_v37 = vadd.f32 %v2526_v35, %v6498_v57  ;;  %v4545_v38 = vadd.f32 %v3138_v36, %v6500_v58  ;;  %v3250_v43 = vmax.f32 %v4495_v29, 0.0  ;;  %v3252_v44 = vmax.f32 %v4543_v30, 0.0 }
 0x24e   : > { %v3253_v41 = vmax.f32 %v4496_v33, 0.0  ;;  %v3255_v42 = vmax.f32 %v4544_v34, 0.0 }
 0x24f   : > { %v3254_v45 = vmax.f32 %v4497_v37, 0.0  ;;  %v3256_v46 = vmax.f32 %v4545_v38, 0.0 }
 0x250   : > { %v3341_v47 = vpack.c.bf16 %v3253_v41, %v3249_v39  ;;  %v3343_v48 = vpack.c.bf16 %v3255_v42, %v3251_v40 }
 0x251   : > { %v3342_v49 = vpack.c.bf16 %v3254_v45, %v3250_v43  ;;  %v3344_v50 = vpack.c.bf16 %v3256_v46, %v3252_v44  ;;  %v2530_v51 = vpop.f32.mrb[8].mxu0  ;;  %v3142_v52 = vpop.f32.mrb[8].mxu1 }
 0x252   : > { %v4498_v53 = vadd.f32 %v2530_v51, %v6494_v55  ;;  %v4546_v54 = vadd.f32 %v3142_v52, %v6496_v56  ;;  %v2532_v59 = vpop.f32.mrb[9].mxu0  ;;  %v3144_v60 = vpop.f32.mrb[9].mxu1 }
 0x253   : > { %v4499_v61 = vadd.f32 %v2532_v59, %v6498_v57  ;;  %v4547_v62 = vadd.f32 %v3144_v60, %v6500_v58  ;;  %v2534_v63 = vpop.f32.mrb[10].mxu0  ;;  %v3146_v0 = vpop.f32.mrb[10].mxu1  ;;  %3688 = vmatprep.mubr.bf16.mxu0 %v3342_v49  ;;  %3817 = vmatprep.mubr.bf16.mxu1 %v3344_v50 }
 0x254   : > { %v4500_v1 = vadd.f32 %v2534_v63, %v6494_v55  ;;  %v4548_v2 = vadd.f32 %v3146_v0, %v6496_v56  ;;  %v2536_v3 = vpop.f32.mrb[11].mxu0  ;;  %v3148_v4 = vpop.f32.mrb[11].mxu1  ;;  %3689 = vmatmul.mubr.bf16.gmra.mrb[52].mxu0 %v3341_v47  ;;  %3818 = vmatmul.mubr.bf16.gmra.mrb[52].mxu1 %v3343_v48  ;;  %v3257_v7 = vmax.f32 %v4498_v53, 0.0  ;;  %v3259_v8 = vmax.f32 %v4546_v54, 0.0 }
 0x255   : > { %v4501_v5 = vadd.f32 %v2536_v3, %v6498_v57  ;;  %v4549_v6 = vadd.f32 %v3148_v4, %v6500_v58  ;;  %v3258_v11 = vmax.f32 %v4499_v61, 0.0  ;;  %v3260_v12 = vmax.f32 %v4547_v62, 0.0 }
 0x256   : > { %v3261_v9 = vmax.f32 %v4500_v1, 0.0  ;;  %v3263_v10 = vmax.f32 %v4548_v2, 0.0 }
 0x257   : > { %v3262_v13 = vmax.f32 %v4501_v5, 0.0  ;;  %v3264_v14 = vmax.f32 %v4549_v6, 0.0 }
 0x258   : > { %v3345_v15 = vpack.c.bf16 %v3261_v9, %v3257_v7  ;;  %v3347_v16 = vpack.c.bf16 %v3263_v10, %v3259_v8 }
 0x259   : > { %v3346_v17 = vpack.c.bf16 %v3262_v13, %v3258_v11  ;;  %v3348_v18 = vpack.c.bf16 %v3264_v14, %v3260_v12  ;;  %v2540_v19 = vpop.f32.mrb[12].mxu0  ;;  %v3152_v20 = vpop.f32.mrb[12].mxu1 }
 0x25a   : > { %v4502_v21 = vadd.f32 %v2540_v19, %v6494_v55  ;;  %v4550_v22 = vadd.f32 %v3152_v20, %v6496_v56  ;;  %v2542_v23 = vpop.f32.mrb[13].mxu0  ;;  %v3154_v24 = vpop.f32.mrb[13].mxu1 }
 0x25b   : > { %v4503_v25 = vadd.f32 %v2542_v23, %v6498_v57  ;;  %v4551_v26 = vadd.f32 %v3154_v24, %v6500_v58  ;;  %v2544_v27 = vpop.f32.mrb[14].mxu0  ;;  %v3156_v28 = vpop.f32.mrb[14].mxu1  ;;  %3696 = vmatprep.mubr.bf16.mxu0 %v3346_v17  ;;  %3825 = vmatprep.mubr.bf16.mxu1 %v3348_v18 }
 0x25c   : > { %v4504_v29 = vadd.f32 %v2544_v27, %v6494_v55  ;;  %v4552_v30 = vadd.f32 %v3156_v28, %v6496_v56  ;;  %v2546_v31 = vpop.f32.mrb[15].mxu0  ;;  %v3158_v32 = vpop.f32.mrb[15].mxu1  ;;  %3697 = vmatmul.mubr.bf16.gmra.mrb[56].mxu0 %v3345_v15  ;;  %3826 = vmatmul.mubr.bf16.gmra.mrb[56].mxu1 %v3347_v16  ;;  %v3265_v35 = vmax.f32 %v4502_v21, 0.0  ;;  %v3267_v36 = vmax.f32 %v4550_v22, 0.0 }
 0x25d   : > { %v4505_v33 = vadd.f32 %v2546_v31, %v6498_v57  ;;  %v4553_v34 = vadd.f32 %v3158_v32, %v6500_v58  ;;  %v3266_v39 = vmax.f32 %v4503_v25, 0.0  ;;  %v3268_v40 = vmax.f32 %v4551_v26, 0.0 }
 0x25e   : > { %v3269_v37 = vmax.f32 %v4504_v29, 0.0  ;;  %v3271_v38 = vmax.f32 %v4552_v30, 0.0 }
 0x25f   : > { %v3270_v41 = vmax.f32 %v4505_v33, 0.0  ;;  %v3272_v42 = vmax.f32 %v4553_v34, 0.0 }
 0x260   : > { %v3349_v43 = vpack.c.bf16 %v3269_v37, %v3265_v35  ;;  %v3351_v44 = vpack.c.bf16 %v3271_v38, %v3267_v36 }
 0x261   : > { %v3350_v45 = vpack.c.bf16 %v3270_v41, %v3266_v39  ;;  %v3352_v46 = vpack.c.bf16 %v3272_v42, %v3268_v40  ;;  %v2550_v47 = vpop.f32.mrb[16].mxu0  ;;  %v3162_v48 = vpop.f32.mrb[16].mxu1 }
 0x262   : > { %v4506_v49 = vadd.f32 %v2550_v47, %v6494_v55  ;;  %v4554_v50 = vadd.f32 %v3162_v48, %v6496_v56  ;;  %v2552_v51 = vpop.f32.mrb[17].mxu0  ;;  %v3164_v52 = vpop.f32.mrb[17].mxu1 }
 0x263   : > { %v4507_v53 = vadd.f32 %v2552_v51, %v6498_v57  ;;  %v4555_v54 = vadd.f32 %v3164_v52, %v6500_v58  ;;  %v2554_v59 = vpop.f32.mrb[18].mxu0  ;;  %v3166_v60 = vpop.f32.mrb[18].mxu1  ;;  %3704 = vmatprep.mubr.bf16.mxu0 %v3350_v45  ;;  %3833 = vmatprep.mubr.bf16.mxu1 %v3352_v46 }
 0x264   : > { %v4508_v61 = vadd.f32 %v2554_v59, %v6494_v55  ;;  %v4556_v62 = vadd.f32 %v3166_v60, %v6496_v56  ;;  %v2556_v63 = vpop.f32.mrb[19].mxu0  ;;  %v3168_v0 = vpop.f32.mrb[19].mxu1  ;;  %3705 = vmatmul.mubr.bf16.gmra.mrb[60].mxu0 %v3349_v43  ;;  %3834 = vmatmul.mubr.bf16.gmra.mrb[60].mxu1 %v3351_v44  ;;  %v3273_v3 = vmax.f32 %v4506_v49, 0.0  ;;  %v3275_v4 = vmax.f32 %v4554_v50, 0.0 }
 0x265   : > { %v4509_v1 = vadd.f32 %v2556_v63, %v6498_v57  ;;  %v4557_v2 = vadd.f32 %v3168_v0, %v6500_v58  ;;  %v3274_v7 = vmax.f32 %v4507_v53, 0.0  ;;  %v3276_v8 = vmax.f32 %v4555_v54, 0.0 }
 0x266   : > { %v3277_v5 = vmax.f32 %v4508_v61, 0.0  ;;  %v3279_v6 = vmax.f32 %v4556_v62, 0.0 }
 0x267   : > { %v3278_v9 = vmax.f32 %v4509_v1, 0.0  ;;  %v3280_v10 = vmax.f32 %v4557_v2, 0.0 }
 0x268   : > { %v3353_v11 = vpack.c.bf16 %v3277_v5, %v3273_v3  ;;  %v3355_v12 = vpack.c.bf16 %v3279_v6, %v3275_v4 }
 0x269   : > { %v3354_v13 = vpack.c.bf16 %v3278_v9, %v3274_v7  ;;  %v3356_v14 = vpack.c.bf16 %v3280_v10, %v3276_v8  ;;  %v2560_v15 = vpop.f32.mrb[20].mxu0  ;;  %v3172_v16 = vpop.f32.mrb[20].mxu1 }
 0x26a   : > { %v4510_v17 = vadd.f32 %v2560_v15, %v6494_v55  ;;  %v4558_v18 = vadd.f32 %v3172_v16, %v6496_v56  ;;  %v2562_v19 = vpop.f32.mrb[21].mxu0  ;;  %v3174_v20 = vpop.f32.mrb[21].mxu1 }
 0x26b   : > { %v4511_v21 = vadd.f32 %v2562_v19, %v6498_v57  ;;  %v4559_v22 = vadd.f32 %v3174_v20, %v6500_v58  ;;  %v2564_v23 = vpop.f32.mrb[22].mxu0  ;;  %v3176_v24 = vpop.f32.mrb[22].mxu1  ;;  %3712 = vmatprep.mubr.bf16.mxu0 %v3354_v13  ;;  %3841 = vmatprep.mubr.bf16.mxu1 %v3356_v14 }
 0x26c   : > { %v4512_v25 = vadd.f32 %v2564_v23, %v6494_v55  ;;  %v4560_v26 = vadd.f32 %v3176_v24, %v6496_v56  ;;  %v2566_v27 = vpop.f32.mrb[23].mxu0  ;;  %v3178_v28 = vpop.f32.mrb[23].mxu1  ;;  %3713 = vmatmul.mubr.bf16.gmra.mrb[64].mxu0 %v3353_v11  ;;  %3842 = vmatmul.mubr.bf16.gmra.mrb[64].mxu1 %v3355_v12  ;;  %v3281_v31 = vmax.f32 %v4510_v17, 0.0  ;;  %v3283_v32 = vmax.f32 %v4558_v18, 0.0 }
 0x26d   : > { %v4513_v29 = vadd.f32 %v2566_v27, %v6498_v57  ;;  %v4561_v30 = vadd.f32 %v3178_v28, %v6500_v58  ;;  %v3282_v35 = vmax.f32 %v4511_v21, 0.0  ;;  %v3284_v36 = vmax.f32 %v4559_v22, 0.0 }
 0x26e   : > { %v3285_v33 = vmax.f32 %v4512_v25, 0.0  ;;  %v3287_v34 = vmax.f32 %v4560_v26, 0.0 }
 0x26f   : > { %v3286_v37 = vmax.f32 %v4513_v29, 0.0  ;;  %v3288_v38 = vmax.f32 %v4561_v30, 0.0 }
 0x270   : > { %v3357_v39 = vpack.c.bf16 %v3285_v33, %v3281_v31  ;;  %v3359_v40 = vpack.c.bf16 %v3287_v34, %v3283_v32 }
 0x271   : > { %v3358_v41 = vpack.c.bf16 %v3286_v37, %v3282_v35  ;;  %v3360_v42 = vpack.c.bf16 %v3288_v38, %v3284_v36  ;;  %v2570_v43 = vpop.f32.mrb[24].mxu0  ;;  %v3182_v44 = vpop.f32.mrb[24].mxu1 }
 0x272   : > { %v4514_v45 = vadd.f32 %v2570_v43, %v6494_v55  ;;  %v4562_v46 = vadd.f32 %v3182_v44, %v6496_v56  ;;  %v2572_v47 = vpop.f32.mrb[25].mxu0  ;;  %v3184_v48 = vpop.f32.mrb[25].mxu1 }
 0x273   : > { %v4515_v49 = vadd.f32 %v2572_v47, %v6498_v57  ;;  %v4563_v50 = vadd.f32 %v3184_v48, %v6500_v58  ;;  %v2574_v51 = vpop.f32.mrb[26].mxu0  ;;  %v3186_v52 = vpop.f32.mrb[26].mxu1  ;;  %3720 = vmatprep.mubr.bf16.mxu0 %v3358_v41  ;;  %3849 = vmatprep.mubr.bf16.mxu1 %v3360_v42 }
 0x274   : > { %v4516_v53 = vadd.f32 %v2574_v51, %v6494_v55  ;;  %v4564_v54 = vadd.f32 %v3186_v52, %v6496_v56  ;;  %v2576_v59 = vpop.f32.mrb[27].mxu0  ;;  %v3188_v60 = vpop.f32.mrb[27].mxu1  ;;  %3721 = vmatmul.mubr.bf16.gmra.mrb[68].mxu0 %v3357_v39  ;;  %3850 = vmatmul.mubr.bf16.gmra.mrb[68].mxu1 %v3359_v40  ;;  %v3289_v63 = vmax.f32 %v4514_v45, 0.0  ;;  %v3291_v0 = vmax.f32 %v4562_v46, 0.0 }
 0x275   : > { %v4517_v61 = vadd.f32 %v2576_v59, %v6498_v57  ;;  %v4565_v62 = vadd.f32 %v3188_v60, %v6500_v58  ;;  %v3290_v3 = vmax.f32 %v4515_v49, 0.0  ;;  %v3292_v4 = vmax.f32 %v4563_v50, 0.0 }
 0x276   : > { %v3293_v1 = vmax.f32 %v4516_v53, 0.0  ;;  %v3295_v2 = vmax.f32 %v4564_v54, 0.0 }
 0x277   : > { %v3294_v5 = vmax.f32 %v4517_v61, 0.0  ;;  %v3296_v6 = vmax.f32 %v4565_v62, 0.0 }
 0x278   : > { %v3361_v7 = vpack.c.bf16 %v3293_v1, %v3289_v63  ;;  %v3363_v8 = vpack.c.bf16 %v3295_v2, %v3291_v0 }
 0x279   : > { %v3362_v9 = vpack.c.bf16 %v3294_v5, %v3290_v3  ;;  %v3364_v10 = vpack.c.bf16 %v3296_v6, %v3292_v4  ;;  %v2580_v11 = vpop.f32.mrb[28].mxu0  ;;  %v3192_v12 = vpop.f32.mrb[28].mxu1 }
 0x27a   : > { %v4518_v13 = vadd.f32 %v2580_v11, %v6494_v55  ;;  %v4566_v14 = vadd.f32 %v3192_v12, %v6496_v56  ;;  %v2582_v15 = vpop.f32.mrb[29].mxu0  ;;  %v3194_v16 = vpop.f32.mrb[29].mxu1 }
 0x27b   : > { %v4519_v17 = vadd.f32 %v2582_v15, %v6498_v57  ;;  %v4567_v18 = vadd.f32 %v3194_v16, %v6500_v58  ;;  %v2584_v19 = vpop.f32.mrb[30].mxu0  ;;  %v3196_v20 = vpop.f32.mrb[30].mxu1  ;;  %3728 = vmatprep.mubr.bf16.mxu0 %v3362_v9  ;;  %3857 = vmatprep.mubr.bf16.mxu1 %v3364_v10 }
 0x27c   : > { %v4520_v21 = vadd.f32 %v2584_v19, %v6494_v55  ;;  %v4568_v22 = vadd.f32 %v3196_v20, %v6496_v56  ;;  %v2586_v23 = vpop.f32.mrb[31].mxu0  ;;  %v3198_v24 = vpop.f32.mrb[31].mxu1  ;;  %3729 = vmatmul.mubr.bf16.gmra.mrb[72].mxu0 %v3361_v7  ;;  %3858 = vmatmul.mubr.bf16.gmra.mrb[72].mxu1 %v3363_v8  ;;  %v3297_v27 = vmax.f32 %v4518_v13, 0.0  ;;  %v3299_v28 = vmax.f32 %v4566_v14, 0.0 }
 0x27d   : > { %v4521_v25 = vadd.f32 %v2586_v23, %v6498_v57  ;;  %v4569_v26 = vadd.f32 %v3198_v24, %v6500_v58  ;;  %v3298_v31 = vmax.f32 %v4519_v17, 0.0  ;;  %v3300_v32 = vmax.f32 %v4567_v18, 0.0 }
 0x27e   : > { %v3301_v29 = vmax.f32 %v4520_v21, 0.0  ;;  %v3303_v30 = vmax.f32 %v4568_v22, 0.0 }
 0x27f   : > { %v3302_v33 = vmax.f32 %v4521_v25, 0.0  ;;  %v3304_v34 = vmax.f32 %v4569_v26, 0.0 }
 0x280   : > { %v3365_v35 = vpack.c.bf16 %v3301_v29, %v3297_v27  ;;  %v3367_v36 = vpack.c.bf16 %v3303_v30, %v3299_v28 }
 0x281   : > { %v3366_v37 = vpack.c.bf16 %v3302_v33, %v3298_v31  ;;  %v3368_v38 = vpack.c.bf16 %v3304_v34, %v3300_v32  ;;  %v2590_v39 = vpop.f32.mrb[32].mxu0  ;;  %v3202_v40 = vpop.f32.mrb[32].mxu1 }
 0x282   : > { %v4522_v41 = vadd.f32 %v2590_v39, %v6494_v55  ;;  %v4570_v42 = vadd.f32 %v3202_v40, %v6496_v56  ;;  %v2592_v43 = vpop.f32.mrb[33].mxu0  ;;  %v3204_v44 = vpop.f32.mrb[33].mxu1 }
 0x283   : > { %v4523_v45 = vadd.f32 %v2592_v43, %v6498_v57  ;;  %v4571_v46 = vadd.f32 %v3204_v44, %v6500_v58  ;;  %v2594_v47 = vpop.f32.mrb[34].mxu0  ;;  %v3206_v48 = vpop.f32.mrb[34].mxu1  ;;  %3736 = vmatprep.mubr.bf16.mxu0 %v3366_v37  ;;  %3865 = vmatprep.mubr.bf16.mxu1 %v3368_v38 }
 0x284   : > { %v4524_v49 = vadd.f32 %v2594_v47, %v6494_v55  ;;  %v4572_v50 = vadd.f32 %v3206_v48, %v6496_v56  ;;  %v2596_v51 = vpop.f32.mrb[35].mxu0  ;;  %v3208_v52 = vpop.f32.mrb[35].mxu1  ;;  %3737 = vmatmul.mubr.bf16.gmra.mrb[76].mxu0 %v3365_v35  ;;  %3866 = vmatmul.mubr.bf16.gmra.mrb[76].mxu1 %v3367_v36  ;;  %v3305_v59 = vmax.f32 %v4522_v41, 0.0  ;;  %v3307_v60 = vmax.f32 %v4570_v42, 0.0 }
 0x285   : > { %v4525_v53 = vadd.f32 %v2596_v51, %v6498_v57  ;;  %v4573_v54 = vadd.f32 %v3208_v52, %v6500_v58  ;;  %v3306_v63 = vmax.f32 %v4523_v45, 0.0  ;;  %v3308_v0 = vmax.f32 %v4571_v46, 0.0 }
 0x286   : > { %v3309_v61 = vmax.f32 %v4524_v49, 0.0  ;;  %v3311_v62 = vmax.f32 %v4572_v50, 0.0 }
 0x287   : > { %v3310_v1 = vmax.f32 %v4525_v53, 0.0  ;;  %v3312_v2 = vmax.f32 %v4573_v54, 0.0 }
 0x288   : > { %v3369_v3 = vpack.c.bf16 %v3309_v61, %v3305_v59  ;;  %v3371_v4 = vpack.c.bf16 %v3311_v62, %v3307_v60 }
 0x289   : > { %v3370_v5 = vpack.c.bf16 %v3310_v1, %v3306_v63  ;;  %v3372_v6 = vpack.c.bf16 %v3312_v2, %v3308_v0  ;;  %v2600_v7 = vpop.f32.mrb[36].mxu0  ;;  %v3212_v8 = vpop.f32.mrb[36].mxu1 }
 0x28a   : > { %v4526_v9 = vadd.f32 %v2600_v7, %v6494_v55  ;;  %v4574_v10 = vadd.f32 %v3212_v8, %v6496_v56  ;;  %v2602_v11 = vpop.f32.mrb[37].mxu0  ;;  %v3214_v12 = vpop.f32.mrb[37].mxu1 }
 0x28b   : > { %v4527_v13 = vadd.f32 %v2602_v11, %v6498_v57  ;;  %v4575_v14 = vadd.f32 %v3214_v12, %v6500_v58  ;;  %v2604_v15 = vpop.f32.mrb[38].mxu0  ;;  %v3216_v16 = vpop.f32.mrb[38].mxu1  ;;  %3744 = vmatprep.mubr.bf16.mxu0 %v3370_v5  ;;  %3873 = vmatprep.mubr.bf16.mxu1 %v3372_v6 }
 0x28c   : > { %v4528_v17 = vadd.f32 %v2604_v15, %v6494_v55  ;;  %v4576_v18 = vadd.f32 %v3216_v16, %v6496_v56  ;;  %v2606_v19 = vpop.f32.mrb[39].mxu0  ;;  %v3218_v20 = vpop.f32.mrb[39].mxu1  ;;  %3745 = vmatmul.mubr.bf16.gmra.mrb[80].mxu0 %v3369_v3  ;;  %3874 = vmatmul.mubr.bf16.gmra.mrb[80].mxu1 %v3371_v4  ;;  %v3313_v23 = vmax.f32 %v4526_v9, 0.0  ;;  %v3315_v24 = vmax.f32 %v4574_v10, 0.0 }
 0x28d   : > { %v4529_v21 = vadd.f32 %v2606_v19, %v6498_v57  ;;  %v4577_v22 = vadd.f32 %v3218_v20, %v6500_v58  ;;  %v3314_v27 = vmax.f32 %v4527_v13, 0.0  ;;  %v3316_v28 = vmax.f32 %v4575_v14, 0.0 }
 0x28e   : > { %v3317_v25 = vmax.f32 %v4528_v17, 0.0  ;;  %v3319_v26 = vmax.f32 %v4576_v18, 0.0 }
 0x28f   : > { %v3318_v29 = vmax.f32 %v4529_v21, 0.0  ;;  %v3320_v30 = vmax.f32 %v4577_v22, 0.0 }
 0x290   : > { %v3373_v31 = vpack.c.bf16 %v3317_v25, %v3313_v23  ;;  %v3375_v32 = vpack.c.bf16 %v3319_v26, %v3315_v24 }
 0x291   : > { %v3374_v33 = vpack.c.bf16 %v3318_v29, %v3314_v27  ;;  %v3376_v34 = vpack.c.bf16 %v3320_v30, %v3316_v28  ;;  %v2610_v35 = vpop.f32.mrb[40].mxu0  ;;  %v3222_v36 = vpop.f32.mrb[40].mxu1  ;;  %v6602_v29 = vld [vmem:[%s6712_s4] ss:$0 sm:$0xff] }
 0x292   : > { %v4530_v37 = vadd.f32 %v2610_v35, %v6494_v55  ;;  %v4578_v38 = vadd.f32 %v3222_v36, %v6496_v56  ;;  %v2612_v39 = vpop.f32.mrb[41].mxu0  ;;  %v3224_v40 = vpop.f32.mrb[41].mxu1 }
 0x293   : > { %v4531_v41 = vadd.f32 %v2612_v39, %v6498_v57  ;;  %v4579_v42 = vadd.f32 %v3224_v40, %v6500_v58  ;;  %v2614_v43 = vpop.f32.mrb[42].mxu0  ;;  %v3226_v44 = vpop.f32.mrb[42].mxu1  ;;  %3752 = vmatprep.mubr.bf16.mxu0 %v3374_v33  ;;  %3881 = vmatprep.mubr.bf16.mxu1 %v3376_v34 }
 0x294   : > { %v4532_v45 = vadd.f32 %v2614_v43, %v6494_v55  ;;  %v4580_v46 = vadd.f32 %v3226_v44, %v6496_v56  ;;  %v2616_v47 = vpop.f32.mrb[43].mxu0  ;;  %v3228_v48 = vpop.f32.mrb[43].mxu1  ;;  %3753 = vmatmul.mubr.bf16.gmra.mrb[84].mxu0 %v3373_v31  ;;  %3882 = vmatmul.mubr.bf16.gmra.mrb[84].mxu1 %v3375_v32  ;;  %v3321_v51 = vmax.f32 %v4530_v37, 0.0  ;;  %v3323_v52 = vmax.f32 %v4578_v38, 0.0 }
 0x295   : > { %v4533_v49 = vadd.f32 %v2616_v47, %v6498_v57  ;;  %v4581_v50 = vadd.f32 %v3228_v48, %v6500_v58  ;;  %v3322_v59 = vmax.f32 %v4531_v41, 0.0  ;;  %v3324_v60 = vmax.f32 %v4579_v42, 0.0 }
 0x296   : > { %v3325_v53 = vmax.f32 %v4532_v45, 0.0  ;;  %v3327_v54 = vmax.f32 %v4580_v46, 0.0 }
 0x297   : > { %v3326_v61 = vmax.f32 %v4533_v49, 0.0  ;;  %v3328_v62 = vmax.f32 %v4581_v50, 0.0 }
 0x298   : > { %v3377_v63 = vpack.c.bf16 %v3325_v53, %v3321_v51  ;;  %v3379_v0 = vpack.c.bf16 %v3327_v54, %v3323_v52 }
 0x299   : > { %v3378_v1 = vpack.c.bf16 %v3326_v61, %v3322_v59  ;;  %v3380_v2 = vpack.c.bf16 %v3328_v62, %v3324_v60  ;;  %v2620_v3 = vpop.f32.mrb[44].mxu0  ;;  %v3232_v4 = vpop.f32.mrb[44].mxu1 }
 0x29a   : > { %v4534_v5 = vadd.f32 %v2620_v3, %v6494_v55  ;;  %v4582_v6 = vadd.f32 %v3232_v4, %v6496_v56  ;;  %v2622_v7 = vpop.f32.mrb[45].mxu0  ;;  %v3234_v8 = vpop.f32.mrb[45].mxu1 }
 0x29b   : > { %v4535_v9 = vadd.f32 %v2622_v7, %v6498_v57  ;;  %v4583_v10 = vadd.f32 %v3234_v8, %v6500_v58  ;;  %v2624_v11 = vpop.f32.mrb[46].mxu0  ;;  %v3236_v12 = vpop.f32.mrb[46].mxu1  ;;  %3760 = vmatprep.mubr.bf16.mxu0 %v3378_v1  ;;  %3889 = vmatprep.mubr.bf16.mxu1 %v3380_v2 }
 0x29c   : > { %v4536_v13 = vadd.f32 %v2624_v11, %v6494_v55  ;;  %v4584_v14 = vadd.f32 %v3236_v12, %v6496_v56  ;;  %v2626_v15 = vpop.f32.mrb[47].mxu0  ;;  %v3238_v16 = vpop.f32.mrb[47].mxu1  ;;  %3761 = vmatmul.mubr.bf16.gmra.mrb[88].mxu0 %v3377_v63  ;;  %3890 = vmatmul.mubr.bf16.gmra.mrb[88].mxu1 %v3379_v0  ;;  %v3329_v19 = vmax.f32 %v4534_v5, 0.0  ;;  %v3331_v20 = vmax.f32 %v4582_v6, 0.0 }
 0x29d   : > { %v4537_v17 = vadd.f32 %v2626_v15, %v6498_v57  ;;  %v4585_v18 = vadd.f32 %v3238_v16, %v6500_v58  ;;  %v3330_v23 = vmax.f32 %v4535_v9, 0.0  ;;  %v3332_v24 = vmax.f32 %v4583_v10, 0.0 }
 0x29e   : > { %v3333_v21 = vmax.f32 %v4536_v13, 0.0  ;;  %v3335_v22 = vmax.f32 %v4584_v14, 0.0 }
 0x29f   : > { %v3334_v25 = vmax.f32 %v4537_v17, 0.0  ;;  %v3336_v55 = vmax.f32 %v4585_v18, 0.0 }
 0x2a0   : > { %v3381_v26 = vpack.c.bf16 %v3333_v21, %v3329_v19  ;;  %v3383_v56 = vpack.c.bf16 %v3335_v22, %v3331_v20 }
 0x2a1   : > { %v3382_v27 = vpack.c.bf16 %v3334_v25, %v3330_v23  ;;  %v3384_v28 = vpack.c.bf16 %v3336_v55, %v3332_v24 }
 0x2a3   : > { %3768 = vmatprep.mubr.bf16.mxu0 %v3382_v27  ;;  %3897 = vmatprep.mubr.bf16.mxu1 %v3384_v28 }
 0x2a4   : > { %3769 = vmatmul.mubr.bf16.gmra.mrb[92].mxu0 %v3381_v26  ;;  %3898 = vmatmul.mubr.bf16.gmra.mrb[92].mxu1 %v3383_v56 }
 0x31f   : > { %v4330_v57 = vpop.f32.mrb[48].mxu0  ;;  %v4418_v58 = vpop.f32.mrb[48].mxu1 }
 0x320   : > { %v4331_v30 = vpop.f32.mrb[49].mxu0  ;;  %v4419_v31 = vpop.f32.mrb[49].mxu1 }
 0x321   : > { %v4332_v32 = vadd.f32 %v4331_v30, %v4330_v57  ;;  %v4420_v33 = vadd.f32 %v4419_v31, %v4418_v58  ;;  %v4333_v34 = vpop.f32.mrb[50].mxu0  ;;  %v4421_v35 = vpop.f32.mrb[50].mxu1 }
 0x322   : > { %v4334_v36 = vpop.f32.mrb[51].mxu0  ;;  %v4422_v37 = vpop.f32.mrb[51].mxu1 }
 0x323   : > { %v3683_v38 = vadd.f32 %v4332_v32, %v6602_v29  ;;  %v4335_v39 = vadd.f32 %v4334_v36, %v4333_v34  ;;  %v4423_v40 = vadd.f32 %v4422_v37, %v4421_v35 }
 0x325   : > { %v3812_v41 = vadd.f32 %v4420_v33, %v3683_v38  ;;  %v3686_v42 = vadd.f32 %v4335_v39, %v6602_v29 }
 0x327   : > { %3906 = vst [vmem:[%s6608_s14] sm:$0xff] %v3812_v41  ;;  %v3815_v43 = vadd.f32 %v4423_v40, %v3686_v42  ;;  %v4336_v44 = vpop.f32.mrb[52].mxu0  ;;  %v4424_v45 = vpop.f32.mrb[52].mxu1 }
 0x328   : > { %v4337_v46 = vpop.f32.mrb[53].mxu0  ;;  %v4425_v47 = vpop.f32.mrb[53].mxu1 }
 0x329   : > { %3907 = vst [vmem:[%s6608_s14 + $0x8] sm:$0xff] %v3815_v43  ;;  %v4338_v48 = vadd.f32 %v4337_v46, %v4336_v44  ;;  %v4426_v49 = vadd.f32 %v4425_v47, %v4424_v45  ;;  %v4339_v50 = vpop.f32.mrb[54].mxu0  ;;  %v4427_v51 = vpop.f32.mrb[54].mxu1 }
 0x32a   : > { %v4340_v52 = vpop.f32.mrb[55].mxu0  ;;  %v4428_v53 = vpop.f32.mrb[55].mxu1 }
 0x32b   : > { %v3691_v54 = vadd.f32 %v4338_v48, %v6602_v29  ;;  %v4341_v59 = vadd.f32 %v4340_v52, %v4339_v50  ;;  %v4429_v60 = vadd.f32 %v4428_v53, %v4427_v51 }
 0x32d   : > { %v3820_v61 = vadd.f32 %v4426_v49, %v3691_v54  ;;  %v3694_v62 = vadd.f32 %v4341_v59, %v6602_v29 }
 0x32f   : > { %3908 = vst [vmem:[%s6608_s14 + $0x10] sm:$0xff] %v3820_v61  ;;  %v3823_v63 = vadd.f32 %v4429_v60, %v3694_v62  ;;  %v4342_v0 = vpop.f32.mrb[56].mxu0  ;;  %v4430_v1 = vpop.f32.mrb[56].mxu1 }
 0x330   : > { %v4343_v2 = vpop.f32.mrb[57].mxu0  ;;  %v4431_v3 = vpop.f32.mrb[57].mxu1 }
 0x331   : > { %3909 = vst [vmem:[%s6608_s14 + $0x18] sm:$0xff] %v3823_v63  ;;  %v4344_v4 = vadd.f32 %v4343_v2, %v4342_v0  ;;  %v4432_v5 = vadd.f32 %v4431_v3, %v4430_v1  ;;  %v4345_v6 = vpop.f32.mrb[58].mxu0  ;;  %v4433_v7 = vpop.f32.mrb[58].mxu1 }
 0x332   : > { %v4346_v8 = vpop.f32.mrb[59].mxu0  ;;  %v4434_v9 = vpop.f32.mrb[59].mxu1 }
 0x333   : > { %v3699_v10 = vadd.f32 %v4344_v4, %v6602_v29  ;;  %v4347_v11 = vadd.f32 %v4346_v8, %v4345_v6  ;;  %v4435_v12 = vadd.f32 %v4434_v9, %v4433_v7 }
 0x335   : > { %v3828_v13 = vadd.f32 %v4432_v5, %v3699_v10  ;;  %v3702_v14 = vadd.f32 %v4347_v11, %v6602_v29 }
 0x337   : > { %3910 = vst [vmem:[%s6608_s14 + $0x20] sm:$0xff] %v3828_v13  ;;  %v3831_v15 = vadd.f32 %v4435_v12, %v3702_v14  ;;  %v4348_v16 = vpop.f32.mrb[60].mxu0  ;;  %v4436_v17 = vpop.f32.mrb[60].mxu1 }
 0x338   : > { %v4349_v18 = vpop.f32.mrb[61].mxu0  ;;  %v4437_v19 = vpop.f32.mrb[61].mxu1 }
 0x339   : > { %3911 = vst [vmem:[%s6608_s14 + $0x28] sm:$0xff] %v3831_v15  ;;  %v4350_v20 = vadd.f32 %v4349_v18, %v4348_v16  ;;  %v4438_v21 = vadd.f32 %v4437_v19, %v4436_v17  ;;  %v4351_v22 = vpop.f32.mrb[62].mxu0  ;;  %v4439_v23 = vpop.f32.mrb[62].mxu1 }
 0x33a   : > { %v4352_v24 = vpop.f32.mrb[63].mxu0  ;;  %v4440_v25 = vpop.f32.mrb[63].mxu1 }
 0x33b   : > { %v3707_v55 = vadd.f32 %v4350_v20, %v6602_v29  ;;  %v4353_v26 = vadd.f32 %v4352_v24, %v4351_v22  ;;  %v4441_v56 = vadd.f32 %v4440_v25, %v4439_v23 }
 0x33d   : > { %v3836_v27 = vadd.f32 %v4438_v21, %v3707_v55  ;;  %v3710_v28 = vadd.f32 %v4353_v26, %v6602_v29 }
 0x33f   : > { %3912 = vst [vmem:[%s6608_s14 + $0x30] sm:$0xff] %v3836_v27  ;;  %v3839_v57 = vadd.f32 %v4441_v56, %v3710_v28  ;;  %v4354_v58 = vpop.f32.mrb[64].mxu0  ;;  %v4442_v30 = vpop.f32.mrb[64].mxu1 }
 0x340   : > { %v4355_v31 = vpop.f32.mrb[65].mxu0  ;;  %v4443_v32 = vpop.f32.mrb[65].mxu1 }
 0x341   : > { %3913 = vst [vmem:[%s6608_s14 + $0x38] sm:$0xff] %v3839_v57  ;;  %v4356_v33 = vadd.f32 %v4355_v31, %v4354_v58  ;;  %v4444_v34 = vadd.f32 %v4443_v32, %v4442_v30  ;;  %v4357_v35 = vpop.f32.mrb[66].mxu0  ;;  %v4445_v36 = vpop.f32.mrb[66].mxu1 }
 0x342   : > { %v4358_v37 = vpop.f32.mrb[67].mxu0  ;;  %v4446_v38 = vpop.f32.mrb[67].mxu1 }
 0x343   : > { %v3715_v39 = vadd.f32 %v4356_v33, %v6602_v29  ;;  %v4359_v40 = vadd.f32 %v4358_v37, %v4357_v35  ;;  %v4447_v41 = vadd.f32 %v4446_v38, %v4445_v36 }
 0x345   : > { %v3844_v42 = vadd.f32 %v4444_v34, %v3715_v39  ;;  %v3718_v43 = vadd.f32 %v4359_v40, %v6602_v29 }
 0x347   : > { %3914 = vst [vmem:[%s6608_s14 + $0x40] sm:$0xff] %v3844_v42  ;;  %v3847_v44 = vadd.f32 %v4447_v41, %v3718_v43  ;;  %v4360_v45 = vpop.f32.mrb[68].mxu0  ;;  %v4448_v46 = vpop.f32.mrb[68].mxu1 }
 0x348   : > { %v4361_v47 = vpop.f32.mrb[69].mxu0  ;;  %v4449_v48 = vpop.f32.mrb[69].mxu1 }
 0x349   : > { %3915 = vst [vmem:[%s6608_s14 + $0x48] sm:$0xff] %v3847_v44  ;;  %v4362_v49 = vadd.f32 %v4361_v47, %v4360_v45  ;;  %v4450_v50 = vadd.f32 %v4449_v48, %v4448_v46  ;;  %v4363_v51 = vpop.f32.mrb[70].mxu0  ;;  %v4451_v52 = vpop.f32.mrb[70].mxu1 }
 0x34a   : > { %v4364_v53 = vpop.f32.mrb[71].mxu0  ;;  %v4452_v54 = vpop.f32.mrb[71].mxu1 }
 0x34b   : > { %v3723_v59 = vadd.f32 %v4362_v49, %v6602_v29  ;;  %v4365_v60 = vadd.f32 %v4364_v53, %v4363_v51  ;;  %v4453_v61 = vadd.f32 %v4452_v54, %v4451_v52 }
 0x34d   : > { %v3852_v62 = vadd.f32 %v4450_v50, %v3723_v59  ;;  %v3726_v63 = vadd.f32 %v4365_v60, %v6602_v29 }
 0x34f   : > { %3916 = vst [vmem:[%s6608_s14 + $0x50] sm:$0xff] %v3852_v62  ;;  %v3855_v0 = vadd.f32 %v4453_v61, %v3726_v63  ;;  %v4366_v1 = vpop.f32.mrb[72].mxu0  ;;  %v4454_v2 = vpop.f32.mrb[72].mxu1 }
 0x350   : > { %v4367_v3 = vpop.f32.mrb[73].mxu0  ;;  %v4455_v4 = vpop.f32.mrb[73].mxu1 }
 0x351   : > { %3917 = vst [vmem:[%s6608_s14 + $0x58] sm:$0xff] %v3855_v0  ;;  %v4368_v5 = vadd.f32 %v4367_v3, %v4366_v1  ;;  %v4456_v6 = vadd.f32 %v4455_v4, %v4454_v2  ;;  %v4369_v7 = vpop.f32.mrb[74].mxu0  ;;  %v4457_v8 = vpop.f32.mrb[74].mxu1 }
 0x352   : > { %v4370_v9 = vpop.f32.mrb[75].mxu0  ;;  %v4458_v10 = vpop.f32.mrb[75].mxu1 }
 0x353   : > { %v3731_v11 = vadd.f32 %v4368_v5, %v6602_v29  ;;  %v4371_v12 = vadd.f32 %v4370_v9, %v4369_v7  ;;  %v4459_v13 = vadd.f32 %v4458_v10, %v4457_v8 }
 0x355   : > { %v3860_v14 = vadd.f32 %v4456_v6, %v3731_v11  ;;  %v3734_v15 = vadd.f32 %v4371_v12, %v6602_v29 }
 0x357   : > { %3918 = vst [vmem:[%s6608_s14 + $0x60] sm:$0xff] %v3860_v14  ;;  %v3863_v16 = vadd.f32 %v4459_v13, %v3734_v15  ;;  %v4372_v17 = vpop.f32.mrb[76].mxu0  ;;  %v4460_v18 = vpop.f32.mrb[76].mxu1 }
 0x358   : > { %v4373_v19 = vpop.f32.mrb[77].mxu0  ;;  %v4461_v20 = vpop.f32.mrb[77].mxu1 }
 0x359   : > { %3919 = vst [vmem:[%s6608_s14 + $0x68] sm:$0xff] %v3863_v16  ;;  %v4374_v21 = vadd.f32 %v4373_v19, %v4372_v17  ;;  %v4462_v22 = vadd.f32 %v4461_v20, %v4460_v18  ;;  %v4375_v23 = vpop.f32.mrb[78].mxu0  ;;  %v4463_v24 = vpop.f32.mrb[78].mxu1 }
 0x35a   : > { %v4376_v25 = vpop.f32.mrb[79].mxu0  ;;  %v4464_v55 = vpop.f32.mrb[79].mxu1 }
 0x35b   : > { %v3739_v26 = vadd.f32 %v4374_v21, %v6602_v29  ;;  %v4377_v56 = vadd.f32 %v4376_v25, %v4375_v23  ;;  %v4465_v27 = vadd.f32 %v4464_v55, %v4463_v24 }
 0x35d   : > { %v3868_v28 = vadd.f32 %v4462_v22, %v3739_v26  ;;  %v3742_v57 = vadd.f32 %v4377_v56, %v6602_v29 }
 0x35f   : > { %3920 = vst [vmem:[%s6608_s14 + $0x70] sm:$0xff] %v3868_v28  ;;  %v3871_v58 = vadd.f32 %v4465_v27, %v3742_v57  ;;  %v4378_v30 = vpop.f32.mrb[80].mxu0  ;;  %v4466_v31 = vpop.f32.mrb[80].mxu1 }
 0x360   : > { %v4379_v32 = vpop.f32.mrb[81].mxu0  ;;  %v4467_v33 = vpop.f32.mrb[81].mxu1 }
 0x361   : > { %3921 = vst [vmem:[%s6608_s14 + $0x78] sm:$0xff] %v3871_v58  ;;  %v4380_v34 = vadd.f32 %v4379_v32, %v4378_v30  ;;  %v4468_v35 = vadd.f32 %v4467_v33, %v4466_v31  ;;  %v4381_v36 = vpop.f32.mrb[82].mxu0  ;;  %v4469_v37 = vpop.f32.mrb[82].mxu1 }
 0x362   : > { %v4382_v38 = vpop.f32.mrb[83].mxu0  ;;  %v4470_v39 = vpop.f32.mrb[83].mxu1 }
 0x363   : > { %v3747_v40 = vadd.f32 %v4380_v34, %v6602_v29  ;;  %v4383_v41 = vadd.f32 %v4382_v38, %v4381_v36  ;;  %v4471_v42 = vadd.f32 %v4470_v39, %v4469_v37 }
 0x365   : > { %v3876_v43 = vadd.f32 %v4468_v35, %v3747_v40  ;;  %v3750_v44 = vadd.f32 %v4383_v41, %v6602_v29 }
 0x367   : > { %3922 = vst [vmem:[%s6608_s14 + $0x80] sm:$0xff] %v3876_v43  ;;  %v3879_v45 = vadd.f32 %v4471_v42, %v3750_v44  ;;  %v4384_v46 = vpop.f32.mrb[84].mxu0  ;;  %v4472_v47 = vpop.f32.mrb[84].mxu1 }
 0x368   : > { %v4385_v48 = vpop.f32.mrb[85].mxu0  ;;  %v4473_v49 = vpop.f32.mrb[85].mxu1 }
 0x369   : > { %3923 = vst [vmem:[%s6608_s14 + $0x88] sm:$0xff] %v3879_v45  ;;  %v4386_v50 = vadd.f32 %v4385_v48, %v4384_v46  ;;  %v4474_v51 = vadd.f32 %v4473_v49, %v4472_v47  ;;  %v4387_v52 = vpop.f32.mrb[86].mxu0  ;;  %v4475_v53 = vpop.f32.mrb[86].mxu1 }
 0x36a   : > { %v4388_v54 = vpop.f32.mrb[87].mxu0  ;;  %v4476_v59 = vpop.f32.mrb[87].mxu1 }
 0x36b   : > { %v3755_v60 = vadd.f32 %v4386_v50, %v6602_v29  ;;  %v4389_v61 = vadd.f32 %v4388_v54, %v4387_v52  ;;  %v4477_v62 = vadd.f32 %v4476_v59, %v4475_v53 }
 0x36d   : > { %v3884_v63 = vadd.f32 %v4474_v51, %v3755_v60  ;;  %v3758_v0 = vadd.f32 %v4389_v61, %v6602_v29 }
 0x36f   : > { %3924 = vst [vmem:[%s6608_s14 + $0x90] sm:$0xff] %v3884_v63  ;;  %v3887_v1 = vadd.f32 %v4477_v62, %v3758_v0  ;;  %v4390_v2 = vpop.f32.mrb[88].mxu0  ;;  %v4478_v3 = vpop.f32.mrb[88].mxu1 }
 0x370   : > { %v4391_v4 = vpop.f32.mrb[89].mxu0  ;;  %v4479_v5 = vpop.f32.mrb[89].mxu1 }
 0x371   : > { %3925 = vst [vmem:[%s6608_s14 + $0x98] sm:$0xff] %v3887_v1  ;;  %v4392_v6 = vadd.f32 %v4391_v4, %v4390_v2  ;;  %v4480_v7 = vadd.f32 %v4479_v5, %v4478_v3  ;;  %v4393_v8 = vpop.f32.mrb[90].mxu0  ;;  %v4481_v9 = vpop.f32.mrb[90].mxu1 }
 0x372   : > { %v4394_v10 = vpop.f32.mrb[91].mxu0  ;;  %v4482_v11 = vpop.f32.mrb[91].mxu1 }
 0x373   : > { %v3763_v12 = vadd.f32 %v4392_v6, %v6602_v29  ;;  %v4395_v13 = vadd.f32 %v4394_v10, %v4393_v8  ;;  %v4483_v14 = vadd.f32 %v4482_v11, %v4481_v9 }
 0x375   : > { %v3892_v15 = vadd.f32 %v4480_v7, %v3763_v12  ;;  %v3766_v16 = vadd.f32 %v4395_v13, %v6602_v29 }
 0x377   : > { %3926 = vst [vmem:[%s6608_s14 + $0xa0] sm:$0xff] %v3892_v15  ;;  %v3895_v17 = vadd.f32 %v4483_v14, %v3766_v16  ;;  %v4396_v18 = vpop.f32.mrb[92].mxu0  ;;  %v4484_v19 = vpop.f32.mrb[92].mxu1 }
 0x378   : > { %v4397_v20 = vpop.f32.mrb[93].mxu0  ;;  %v4485_v21 = vpop.f32.mrb[93].mxu1 }
 0x379   : > { %3927 = vst [vmem:[%s6608_s14 + $0xa8] sm:$0xff] %v3895_v17  ;;  %v4398_v22 = vadd.f32 %v4397_v20, %v4396_v18  ;;  %v4486_v23 = vadd.f32 %v4485_v21, %v4484_v19  ;;  %v4399_v24 = vpop.f32.mrb[94].mxu0  ;;  %v4487_v25 = vpop.f32.mrb[94].mxu1 }
 0x37a   : > { %v4400_v55 = vpop.f32.mrb[95].mxu0  ;;  %v4488_v26 = vpop.f32.mrb[95].mxu1 }
 0x37b   : > { %v3771_v56 = vadd.f32 %v4398_v22, %v6602_v29  ;;  %v4401_v27 = vadd.f32 %v4400_v55, %v4399_v24  ;;  %v4489_v28 = vadd.f32 %v4488_v26, %v4487_v25 }
 0x37d   : > { %v3900_v57 = vadd.f32 %v4486_v23, %v3771_v56  ;;  %v3774_v58 = vadd.f32 %v4401_v27, %v6602_v29 }
 0x37f   : > { %3928 = vst [vmem:[%s6608_s14 + $0xb0] sm:$0xff] %v3900_v57  ;;  %v3903_v30 = vadd.f32 %v4489_v28, %v3774_v58 }
 0x381   : > { %3929 = vst [vmem:[%s6608_s14 + $0xb8] sm:$0xff] %v3903_v30 }
 0x382   : > { %5321 = shalt.err (!%p5318_p3)
}
 0x383   : > { %s5322_s25 = scalar_lea.hbm %s6659_s26, 3072  ;;  %s5326_s11 = scalar_lea.hbm %s6713_s5, 6144 }
 0x384   : > { %p5323_p4 = scmp.ne.s32.totalorder %s6659_s26, %s5322_s25  ;;  %p5327_p9 = scmp.lt.u32.totalorder %s6659_s26, %s6713_s5 }
 0x385   : > { %p5328_p10 = scmp.lt.u32.totalorder %s5326_s11, %s5322_s25  ;;  %p5330_p12 = scmp.lt.u32.totalorder %s5322_s25, %s6659_s26 }
 0x386   : > { %p5324_p7 = pnand %p5323_p4, %p5443_p5 }
 0x387   : > { %p5329_p11 = por %p5328_p10, %p5327_p9 }
 0x388   : > { %p5325_p8 = pneg %p5324_p7 }
 0x389   : > { %p5331_p13 = por %p5330_p12, %p5329_p11 }
 0x38b   : > { %p5332_p0 = pnand %p5331_p13, %p5325_p8 }
 0x38d   : > { %5335 = shalt.err (!%p5332_p0)
}
 0x38e   : > { %s5373_s14 = smov 128   ;;  %s5374_s16 = smov 8  }
 0x38f   : > { %4875 = dma.vmem_to_hbm [thread:$0]  (%p5443_p5), %s6661_s17, 3072, %s6659_s26, %s6667_s22, %s5373_s14, %s5373_s14, %s5374_s16  }
 0x390 PF: > { %p4881_p1 = scmp.ge.s32.totalorder %s5370_s21, 2  ;;  %s3959_s23 = sand.u32 1, %s5358_s18  }
 0x391   : > { %s3960_s15 = scalar_lea.sflag [#allocation3], %s3959_s23 }
 0x392   : > { %p4878_p2 = pnand %p4881_p1, %p5447_p6 }
 0x394   : > { %5353 = dma.done.wait (!%p4878_p2), %s3960_s15, 3072  }
 0x395   : > { %5355 = vsyncadd (!%p4878_p2), %s3960_s15, 4294964224  ;;  %p15_p3 = scmp.ge.s32.totalorder %s5430_s24, 4   ;;  %s6716_s18 = smov %s5362_s19 }
 0x396   : > { %s6717_s19 = smov %s5366_s20  ;;  %s6718_s20 = smov %s5441_s27 }
 0x397   : > { %s6719_s21 = smov %s5430_s24  ;;  %17 = sbr.rel (!%p15_p3) target bundleno = 3 (0x3), region = 75 }
 0x39e   :  { %3965 = vsyncpa [#allocation3], 1 }
 0x39f   :  { %3967 = vsyncpa [#allocation3 + $0x1], 1 }

// kernel: tpu_custom_call.1
= control target key start
LH: loop header
LB: loop body
LE: loop exit
PB: predicated region body
PF: predicated region fallthrough
CT: control target
= control target key end

     0   :  { %10 = vsyncpa [#allocation3], 0  ;;  %s6708_s0 = inlined_call_operand.vmem [shape: f32[384,960], index: 0, kind: input, shape index: {}]   ;;  %s6709_s1 = inlined_call_operand.vmem [shape: bf16[960,512], index: 1, kind: input, shape index: {}]   ;;  %s6710_s2 = inlined_call_operand.vmem [shape: f32[1,512], index: 2, kind: input, shape index: {}]   ;;  %s6711_s3 = inlined_call_operand.vmem [shape: bf16[512,128], index: 3, kind: input, shape index: {}]   ;;  %s6712_s4 = inlined_call_operand.vmem [shape: f32[1,128], index: 4, kind: input, shape index: {}]   ;;  %s6713_s5 = inlined_call_operand.hbm [shape: f32[384,128], index: 5, kind: output, shape index: {}]  }
   0x1   :  { %12 = vsyncpa [#allocation3 + $0x1], 0  ;;  %s5405_s18 = smov 0   ;;  %s5407_s19 = smov 0  }
   0x2   :  { %s5409_s20 = smov 0   ;;  %s5411_s21 = smov 0  }
   0x3 LB: > { %s5426_s22 = sadd.s32 4294967295, %s5370_s21   ;;  %s4006_s23 = sadd.s32 4294967294, %s5370_s21   ;;  %s5370_s21 = sphi %s5411_s21, %s6719_s21   ;;  %s5366_s20 = sphi %s5409_s20, %s6718_s20   ;;  %s5362_s19 = sphi %s5407_s19, %s6717_s19   ;;  %s5358_s18 = sphi %s5405_s18, %s6716_s18  }
   0x4   : > { %s5430_s24 = sadd.s32 1, %s5370_s21   ;;  %s135_s25 = sadd.s32 1, %s5366_s20 }
   0x5   : > { %s132_s26 = ssub.s32 %s5370_s21, %s5430_s24  ;;  %p145_p0 = scmp.ne.s32.totalorder %s5366_s20, %s5362_s19 }
   0x6   : > { %p133_p1 = scmp.eq.s32.totalorder %s132_s26, 0  ;;  %p146_p2 = scmp.eq.s32.totalorder %s5426_s22, 1 }
   0x7   : > { %p151_p3 = scmp.ne.s32.totalorder %s5362_s19, %s5358_s18  ;;  %p152_p4 = scmp.eq.s32.totalorder %s4006_s23, 1 }
   0x8   : > { %s5441_s27 = scalar_select %p133_p1, %s5366_s20, %s135_s25  }
   0x9   : > { %p5443_p5 = por %p146_p2, %p145_p0  ;;  %p5447_p6 = por %p152_p4, %p151_p3 }
   0xa   : > { %p4009_p7 = scmp.ge.s32.totalorder %s5370_s21, 1  ;;  %p192_p8 = scmp.lt.s32.totalorder %s5370_s21, 3 }
   0xc   : > { %p193_p9 = pnand %p4009_p7, %p192_p8 }
   0xd   : > { %v4916_v0 = vld [vmem:[%s6709_s1 + $0x4] ss:$16 sps:$4 sm:$0xff] (!%p193_p9)   ;;  %v4918_v1 = vld [vmem:[%s6709_s1 + $0xc] ss:$16 sps:$4 sm:$0xff] (!%p193_p9)   ;;  %v4920_v2 = vld [vmem:[%s6709_s1] ss:$16 sps:$4 sm:$0xff] (!%p193_p9)  }
   0xe   : > { %196 = sbr.rel (%p193_p9) target bundleno = 912 (0x390), region = 40  ;;  %2017 = vmatprep.subr.bf16.mxu0 (!%p193_p9), %v4916_v0  ;;  %v4921_v3 = vld [vmem:[%s6709_s1 + $0x8] ss:$16 sps:$4 sm:$0xff] (!%p193_p9)   ;;  %2629 = vmatprep.subr.bf16.mxu1 (!%p193_p9), %v4918_v1  ;;  %v4922_v4 = vld [vmem:[%s6709_s1 + $0x24] ss:$16 sps:$4 sm:$0xff] (!%p193_p9)   ;;  %vm1980_vm0 = vcmask (!%p193_p9), 523264  }
   0xf   : > { %2018 = vmatpush1.bf16.msra.mxu0 (!%p193_p9), %v4920_v2  ;;  %2630 = vmatpush1.bf16.msra.mxu1 (!%p193_p9), %v4921_v3  ;;  %v4924_v5 = vld [vmem:[%s6709_s1 + $0x2c] ss:$16 sps:$4 sm:$0xff] (!%p193_p9)   ;;  %v4926_v6 = vld [vmem:[%s6709_s1 + $0x20] ss:$16 sps:$4 sm:$0xff] (!%p193_p9)   ;;  %v4927_v7 = vld [vmem:[%s6709_s1 + $0x28] ss:$16 sps:$4 sm:$0xff] (!%p193_p9)  }
  0x10   : > { %2019 = vmatprep.subr.bf16.mxu0 (!%p193_p9), %v4922_v4  ;;  %2631 = vmatprep.subr.bf16.mxu1 (!%p193_p9), %v4924_v5  ;;  %v4928_v8 = vld [vmem:[%s6709_s1 + $0x44] ss:$16 sps:$4 sm:$0xff] (!%p193_p9)   ;;  %v4930_v9 = vld [vmem:[%s6709_s1 + $0x4c] ss:$16 sps:$4 sm:$0xff] (!%p193_p9)   ;;  %v4932_v10 = vld [vmem:[%s6709_s1 + $0x40] ss:$16 sps:$4 sm:$0xff] (!%p193_p9)  }
  0x11   : > { %v4933_v11 = vld [vmem:[%s6709_s1 + $0x48] ss:$16 sps:$4 sm:$0xff] (!%p193_p9)   ;;  %v4934_v12 = vld [vmem:[%s6709_s1 + $0x64] ss:$16 sps:$4 sm:$0xff] (!%p193_p9)   ;;  %v4936_v13 = vld [vmem:[%s6709_s1 + $0x6c] ss:$16 sps:$4 sm:$0xff] (!%p193_p9)  }
  0x12   : > { %v4938_v14 = vld [vmem:[%s6709_s1 + $0x60] ss:$16 sps:$4 sm:$0xff] (!%p193_p9)   ;;  %v4939_v15 = vld [vmem:[%s6709_s1 + $0x68] ss:$16 sps:$4 sm:$0xff] (!%p193_p9)   ;;  %v4940_v16 = vld [vmem:[%s6709_s1 + $0x84] ss:$16 sps:$4 sm:$0xff] (!%p193_p9)  }
  0x13   : > { %2020 = vmatpush1.bf16.msra.mxu0 (!%p193_p9), %v4926_v6  ;;  %2632 = vmatpush1.bf16.msra.mxu1 (!%p193_p9), %v4927_v7  ;;  %v4942_v17 = vld [vmem:[%s6709_s1 + $0x8c] ss:$16 sps:$4 sm:$0xff] (!%p193_p9)   ;;  %v4944_v18 = vld [vmem:[%s6709_s1 + $0x80] ss:$16 sps:$4 sm:$0xff] (!%p193_p9)   ;;  %v4945_v19 = vld [vmem:[%s6709_s1 + $0x88] ss:$16 sps:$4 sm:$0xff] (!%p193_p9)  }
  0x14   : > { %2021 = vmatprep.subr.bf16.mxu0 (!%p193_p9), %v4928_v8  ;;  %2633 = vmatprep.subr.bf16.mxu1 (!%p193_p9), %v4930_v9  ;;  %v4946_v20 = vld [vmem:[%s6709_s1 + $0xa4] ss:$16 sps:$4 sm:$0xff] (!%p193_p9)   ;;  %v4948_v21 = vld [vmem:[%s6709_s1 + $0xac] ss:$16 sps:$4 sm:$0xff] (!%p193_p9)   ;;  %v4950_v22 = vld [vmem:[%s6709_s1 + $0xa0] ss:$16 sps:$4 sm:$0xff] (!%p193_p9)  }
  0x15   : > { %v4951_v23 = vld [vmem:[%s6709_s1 + $0xa8] ss:$16 sps:$4 sm:$0xff]   ;;  %v4952_v24 = vld [vmem:[%s6709_s1 + $0xc4] ss:$16 sps:$4 sm:$0xff]   ;;  %v4954_v25 = vld [vmem:[%s6709_s1 + $0xcc] ss:$16 sps:$4 sm:$0xff]  }
  0x16   : > { %v4956_v26 = vld [vmem:[%s6709_s1 + $0xc0] ss:$16 sps:$4 sm:$0xff]   ;;  %v4957_v27 = vld [vmem:[%s6709_s1 + $0xc8] ss:$16 sps:$4 sm:$0xff]   ;;  %v4958_v28 = vld [vmem:[%s6709_s1 + $0xe4] ss:$16 sps:$4 sm:$0xff]  }
  0x17   : > { %2022 = vmatpush1.bf16.msra.mxu0 %v4932_v10  ;;  %2634 = vmatpush1.bf16.msra.mxu1 %v4933_v11  ;;  %s221_s15 = smul.u32 24, %s5426_s22  ;;  %v4960_v29 = vld [vmem:[%s6709_s1 + $0xec] ss:$16 sps:$4 sm:$0xff]   ;;  %v4962_v30 = vld [vmem:[%s6709_s1 + $0xe0] ss:$16 sps:$4 sm:$0xff]   ;;  %s218_s10 = sand.u32 1, %s5362_s19  }
  0x18   : > { %2023 = vmatprep.subr.bf16.mxu0 %v4934_v12  ;;  %2635 = vmatprep.subr.bf16.mxu1 %v4936_v13  ;;  %v4963_v31 = vld [vmem:[%s6709_s1 + $0xe8] ss:$16 sps:$4 sm:$0xff]   ;;  %v4964_v32 = vld [vmem:[%s6709_s1 + $0x104] ss:$16 sps:$4 sm:$0xff]   ;;  %v4966_v33 = vld [vmem:[%s6709_s1 + $0x10c] ss:$16 sps:$4 sm:$0xff]  }
  0x19   : > { %p222_p10 = scmp.lt.s32.totalorder %s221_s15, 47  ;;  %v4968_v34 = vld [vmem:[%s6709_s1 + $0x100] ss:$16 sps:$4 sm:$0xff]   ;;  %v4969_v35 = vld [vmem:[%s6709_s1 + $0x108] ss:$16 sps:$4 sm:$0xff]   ;;  %s4874_s13 = smul.u32 192, %s218_s10 }
  0x1a   : > { %v4970_v36 = vld [vmem:[%s6709_s1 + $0x124] ss:$16 sps:$4 sm:$0xff]   ;;  %v4972_v37 = vld [vmem:[%s6709_s1 + $0x12c] ss:$16 sps:$4 sm:$0xff]   ;;  %v4974_v38 = vld [vmem:[%s6709_s1 + $0x120] ss:$16 sps:$4 sm:$0xff]  }
  0x1b   : > { %2024 = vmatpush1.bf16.msra.mxu0 %v4938_v14  ;;  %2636 = vmatpush1.bf16.msra.mxu1 %v4939_v15  ;;  %s6721_s15 = smov (!%p222_p10, %s221_s15), 47  ;;  %v4975_v39 = vld [vmem:[%s6709_s1 + $0x128] ss:$16 sps:$4 sm:$0xff]   ;;  %v4976_v40 = vld [vmem:[%s6709_s1 + $0x144] ss:$16 sps:$4 sm:$0xff]   ;;  %s6608_s14 = scalar_lea.vmem [#allocation2], %s4874_s13 }
  0x1c   : > { %2025 = vmatprep.subr.bf16.mxu0 %v4940_v16  ;;  %2637 = vmatprep.subr.bf16.mxu1 %v4942_v17  ;;  %s4312_s9 = sshll.u32 %s6721_s15, 6  ;;  %v4978_v41 = vld [vmem:[%s6709_s1 + $0x14c] ss:$16 sps:$4 sm:$0xff]   ;;  %v4980_v42 = vld [vmem:[%s6709_s1 + $0x140] ss:$16 sps:$4 sm:$0xff]   ;;  %s4313_s16 = smul.u32 3072, %s5426_s22 }
  0x1d   : > { %v4981_v43 = vld [vmem:[%s6709_s1 + $0x148] ss:$16 sps:$4 sm:$0xff]   ;;  %s5589_s25 = scalar_lea.vmem %s6708_s0, %s4312_s9  ;;  %v4982_v44 = vld [vmem:[%s6709_s1 + $0x164] ss:$16 sps:$4 sm:$0xff]   ;;  %v4984_v45 = vld [vmem:[%s6709_s1 + $0x16c] ss:$16 sps:$4 sm:$0xff]  }
  0x1e   : > { %v231_v46 = vld [vmem:[%s5589_s25 + $0x8] sm:$0xff]  ;;  %v4986_v47 = vld [vmem:[%s6709_s1 + $0x160] ss:$16 sps:$4 sm:$0xff]   ;;  %v4988_v50 = vld [vmem:[%s6709_s1 + $0x184] ss:$16 sps:$4 sm:$0xff]   ;;  %s3944_s17 = sshll.u32 %s6608_s14, 4  ;;  %s6659_s26 = scalar_lea.hbm %s6713_s5, %s4313_s16  ;;  %s6661_s17 = int_to_ptr.vmem [resolvable:$true] %s3944_s17 }
  0x1f   : > { %2026 = vmatpush1.bf16.msra.mxu0 %v4944_v18  ;;  %2638 = vmatpush1.bf16.msra.mxu1 %v4945_v19  ;;  %v4987_v48 = vld [vmem:[%s6709_s1 + $0x168] ss:$16 sps:$4 sm:$0xff]   ;;  %v4990_v52 = vld [vmem:[%s6709_s1 + $0x18c] ss:$16 sps:$4 sm:$0xff]   ;;  %v4992_v53 = vld [vmem:[%s6709_s1 + $0x180] ss:$16 sps:$4 sm:$0xff]  }
  0x20   : > { %2027 = vmatprep.subr.bf16.mxu0 %v4946_v20  ;;  %2639 = vmatprep.subr.bf16.mxu1 %v4948_v21  ;;  %v239_v49 = vld [vmem:[%s5589_s25 + $0x48] sm:$0xff]  ;;  %v4994_v55 = vld [vmem:[%s6709_s1 + $0x1a4] ss:$16 sps:$4 sm:$0xff]   ;;  %v4998_v57 = vld [vmem:[%s6709_s1 + $0x1a0] ss:$16 sps:$4 sm:$0xff]   ;;  %s6667_s22 = scalar_lea.sflag [#allocation3], %s218_s10 }
  0x21   : > { %v423_v51 = vpack.c.bf16 %v239_v49, %v231_v46  ;;  %v4993_v54 = vld [vmem:[%s6709_s1 + $0x188] ss:$16 sps:$4 sm:$0xff]   ;;  %v4996_v56 = vld [vmem:[%s6709_s1 + $0x1ac] ss:$16 sps:$4 sm:$0xff]   ;;  %v5000_v59 = vld [vmem:[%s6709_s1 + $0x1c4] ss:$16 sps:$4 sm:$0xff]  }
  0x22   : > { %v4999_v58 = vld [vmem:[%s6709_s1 + $0x1a8] ss:$16 sps:$4 sm:$0xff]   ;;  %v5002_v60 = vld [vmem:[%s6709_s1 + $0x1cc] ss:$16 sps:$4 sm:$0xff]   ;;  %v5004_v61 = vld [vmem:[%s6709_s1 + $0x1c0] ss:$16 sps:$4 sm:$0xff]  }
  0x23   : > { %2028 = vmatpush1.bf16.msra.mxu0 %v4950_v22  ;;  %2640 = vmatpush1.bf16.msra.mxu1 %v4951_v23  ;;  %v5005_v62 = vld [vmem:[%s6709_s1 + $0x1c8] ss:$16 sps:$4 sm:$0xff]   ;;  %v5006_v63 = vld [vmem:[%s6709_s1 + $0x1e4] ss:$16 sps:$4 sm:$0xff]   ;;  %v5008_v0 = vld [vmem:[%s6709_s1 + $0x1ec] ss:$16 sps:$4 sm:$0xff]  }
  0x24   : > { %2029 = vmatprep.subr.bf16.mxu0 %v4952_v24  ;;  %2641 = vmatprep.subr.bf16.mxu1 %v4954_v25  ;;  %v5010_v1 = vld [vmem:[%s6709_s1 + $0x1e0] ss:$16 sps:$4 sm:$0xff]   ;;  %v5011_v2 = vld [vmem:[%s6709_s1 + $0x1e8] ss:$16 sps:$4 sm:$0xff]   ;;  %v5014_v5 = vld [vmem:[%s6709_s1 + $0x204] ss:$16 sps:$4 sm:$0xff]  }
  0x25   : > { %2049 = vmatprep.mubr.bf16.mxu0 %v423_v51  ;;  %2661 = vmatprep.mubr.bf16.mxu1 %v423_v51  ;;  %v230_v3 = vld [vmem:[%s5589_s25] sm:$0xff]  ;;  %v5017_v6 = vld [vmem:[%s6709_s1 + $0x20c] ss:$16 sps:$4 sm:$0xff]   ;;  %v5015_v11 = vld [vmem:[%s6709_s1 + $0x208] ss:$16 sps:$4 sm:$0xff]   ;;  %s5308_s30 = scalar_lea.vmem %s6661_s17, 3072 }
  0x26   : > { %v238_v4 = vld [vmem:[%s5589_s25 + $0x40] sm:$0xff]  ;;  %v247_v7 = vld [vmem:[%s5589_s25 + $0x88] sm:$0xff]  ;;  %p5309_p11 = scmp.ne.s32.totalorder %s6661_s17, %s5308_s30  ;;  %s5372_s6 = smov [#allocation2]  }
  0x27   : > { %2030 = vmatpush1.bf16.msra.mxu0 %v4956_v26  ;;  %2642 = vmatpush1.bf16.msra.mxu1 %v4957_v27  ;;  %v255_v8 = vld [vmem:[%s5589_s25 + $0xc8] sm:$0xff]  ;;  %v422_v9 = vpack.c.bf16 %v238_v4, %v230_v3  ;;  %v5012_v10 = vld [vmem:[%s6709_s1 + $0x200] ss:$16 sps:$4 sm:$0xff]   ;;  %v5020_v12 = vld [vmem:[%s6709_s1 + $0x224] ss:$16 sps:$4 sm:$0xff]   ;;  %s5312_s7 = sshll.u32 %s5372_s6, 4  ;;  %s5313_s7 = int_to_ptr.vmem [resolvable:$false] %s5312_s7 }
  0x28   : > { %2031 = vmatprep.subr.bf16.mxu0 %v4958_v28  ;;  %2643 = vmatprep.subr.bf16.mxu1 %v4960_v29  ;;  %v431_v13 = vpack.c.bf16 %v255_v8, %v247_v7  ;;  %v5018_v14 = vld [vmem:[%s6709_s1 + $0x220] ss:$16 sps:$4 sm:$0xff]   ;;  %v5023_v16 = vld [vmem:[%s6709_s1 + $0x22c] ss:$16 sps:$4 sm:$0xff]   ;;  %v5021_v18 = vld [vmem:[%s6709_s1 + $0x228] ss:$16 sps:$4 sm:$0xff]   ;;  %p5310_p12 = pnand %p5309_p11, %p5443_p5  ;;  %p5315_p0 = scmp.lt.s32.totalorder %s6661_s17, %s5313_s7 }
  0x29   : > { %v246_v15 = vld [vmem:[%s5589_s25 + $0x80] sm:$0xff]  ;;  %v5029_v20 = vld [vmem:[%s6709_s1 + $0x24c] ss:$16 sps:$4 sm:$0xff]   ;;  %v5027_v26 = vld [vmem:[%s6709_s1 + $0x248] ss:$16 sps:$4 sm:$0xff]   ;;  %s5314_s8 = scalar_lea.vmem %s5313_s7, 6144 }
  0x2a   : > { %v254_v17 = vld [vmem:[%s5589_s25 + $0xc0] sm:$0xff]  ;;  %v263_v21 = vld [vmem:[%s5589_s25 + $0x108] sm:$0xff]  ;;  %p5311_p13 = pneg %p5310_p12  ;;  %p5316_p1 = scmp.lt.s32.totalorder %s5314_s8, %s5308_s30 }
  0x2b   : > { %2032 = vmatpush1.bf16.msra.mxu0 %v4962_v30  ;;  %2644 = vmatpush1.bf16.msra.mxu1 %v4963_v31  ;;  %v5026_v19 = vld [vmem:[%s6709_s1 + $0x244] ss:$16 sps:$4 sm:$0xff]   ;;  %v271_v22 = vld [vmem:[%s5589_s25 + $0x148] sm:$0xff]  ;;  %v430_v23 = vpack.c.bf16 %v254_v17, %v246_v15  ;;  %v5024_v24 = vld [vmem:[%s6709_s1 + $0x240] ss:$16 sps:$4 sm:$0xff]  }
  0x2c   : > { %2033 = vmatprep.subr.bf16.mxu0 %v4964_v32  ;;  %2645 = vmatprep.subr.bf16.mxu1 %v4966_v33  ;;  %v439_v25 = vpack.c.bf16 %v271_v22, %v263_v21  ;;  %v262_v27 = vld [vmem:[%s5589_s25 + $0x100] sm:$0xff]  ;;  %v5035_v29 = vld [vmem:[%s6709_s1 + $0x26c] ss:$16 sps:$4 sm:$0xff]   ;;  %v5033_v32 = vld [vmem:[%s6709_s1 + $0x268] ss:$16 sps:$4 sm:$0xff]   ;;  %p5317_p2 = por %p5316_p1, %p5315_p0 }
  0x2d   : > { %v5032_v28 = vld [vmem:[%s6709_s1 + $0x264] ss:$16 sps:$4 sm:$0xff]   ;;  %v5030_v31 = vld [vmem:[%s6709_s1 + $0x260] ss:$16 sps:$4 sm:$0xff]   ;;  %v279_v33 = vld [vmem:[%s5589_s25 + $0x188] sm:$0xff] }
  0x2e   : > { %v270_v30 = vld [vmem:[%s5589_s25 + $0x140] sm:$0xff]  ;;  %v295_v46 = vld [vmem:[%s5589_s25 + $0x208] sm:$0xff]  ;;  %p5318_p3 = pnand %p5317_p2, %p5311_p13 }
  0x2f   : > { %2034 = vmatpush1.bf16.msra.mxu0 %v4968_v34  ;;  %2646 = vmatpush1.bf16.msra.mxu1 %v4969_v35  ;;  %v287_v34 = vld [vmem:[%s5589_s25 + $0x1c8] sm:$0xff]  ;;  %v5038_v35 = vld [vmem:[%s6709_s1 + $0x284] ss:$16 sps:$4 sm:$0xff]   ;;  %v5060_v3 = vld [vmem:[%s6709_s1 + $0x300] ss:$16 sps:$4 sm:$0xff]  }
  0x30   : > { %2035 = vmatprep.subr.bf16.mxu0 %v4970_v36  ;;  %2647 = vmatprep.subr.bf16.mxu1 %v4972_v37  ;;  %v5041_v36 = vld [vmem:[%s6709_s1 + $0x28c] ss:$16 sps:$4 sm:$0xff]   ;;  %v438_v37 = vpack.c.bf16 %v270_v30, %v262_v27  ;;  %v5050_v49 = vld [vmem:[%s6709_s1 + $0x2c4] ss:$16 sps:$4 sm:$0xff]   ;;  %v5063_v4 = vld [vmem:[%s6709_s1 + $0x308] ss:$16 sps:$4 sm:$0xff]  }
  0x31   : > { %v310_v7 = vld [vmem:[%s5589_s25 + $0x280] sm:$0xff]  ;;  %v5083_v21 = vld [vmem:[%s6709_s1 + $0x36c] ss:$16 sps:$4 sm:$0xff]  }
  0x32   : > { %v318_v8 = vld [vmem:[%s5589_s25 + $0x2c0] sm:$0xff] }
  0x33   : > { %2036 = vmatpush1.bf16.msra.mxu0 %v4974_v38  ;;  %2648 = vmatpush1.bf16.msra.mxu1 %v4975_v39  ;;  %v447_v38 = vpack.c.bf16 %v287_v34, %v279_v33  ;;  %v5036_v39 = vld [vmem:[%s6709_s1 + $0x280] ss:$16 sps:$4 sm:$0xff]   ;;  %v462_v15 = vpack.c.bf16 %v318_v8, %v310_v7  ;;  %v5086_v27 = vld [vmem:[%s6709_s1 + $0x384] ss:$16 sps:$4 sm:$0xff]   ;;  %v5095_v34 = vld [vmem:[%s6709_s1 + $0x3ac] ss:$16 sps:$4 sm:$0xff]  }
  0x34   : > { %2037 = vmatprep.subr.bf16.mxu0 %v4976_v40  ;;  %2649 = vmatprep.subr.bf16.mxu1 %v4978_v41  ;;  %v5039_v40 = vld [vmem:[%s6709_s1 + $0x288] ss:$16 sps:$4 sm:$0xff]   ;;  %v278_v41 = vld [vmem:[%s5589_s25 + $0x180] sm:$0xff] }
  0x35   : > { %v5072_v17 = vld [vmem:[%s6709_s1 + $0x340] ss:$16 sps:$4 sm:$0xff]   ;;  %v5092_v33 = vld [vmem:[%s6709_s1 + $0x3a4] ss:$16 sps:$4 sm:$0xff]  }
  0x36   : > { %v334_v22 = vld [vmem:[%s5589_s25 + $0x340] sm:$0xff] }
  0x37   : > { %2038 = vmatpush1.bf16.msra.mxu0 %v4980_v42  ;;  %2650 = vmatpush1.bf16.msra.mxu1 %v4981_v43  ;;  %v5044_v42 = vld [vmem:[%s6709_s1 + $0x2a4] ss:$16 sps:$4 sm:$0xff]   ;;  %v5047_v43 = vld [vmem:[%s6709_s1 + $0x2ac] ss:$16 sps:$4 sm:$0xff]  }
  0x38   : > { %2039 = vmatprep.subr.bf16.mxu0 %v4982_v44  ;;  %2651 = vmatprep.subr.bf16.mxu1 %v4984_v45  ;;  %v286_v44 = vld [vmem:[%s5589_s25 + $0x1c0] sm:$0xff] }
  0x39   : > { %v5042_v45 = vld [vmem:[%s6709_s1 + $0x2a0] ss:$16 sps:$4 sm:$0xff]   ;;  %v446_v51 = vpack.c.bf16 %v286_v44, %v278_v41  ;;  %v5098_v41 = vld [vmem:[%s6709_s1 + $0x3c4] ss:$16 sps:$4 sm:$0xff]  }
  0x3a   : > { %v406_v7 = vld [vmem:[%s5589_s25 + $0x580] sm:$0xff] }
  0x3b   : > { %2040 = vmatpush1.bf16.msra.mxu0 %v4986_v47  ;;  %2652 = vmatpush1.bf16.msra.mxu1 %v4987_v48  ;;  %v303_v47 = vld [vmem:[%s5589_s25 + $0x248] sm:$0xff]  ;;  %v414_v8 = vld [vmem:[%s5589_s25 + $0x5c0] sm:$0xff] }
  0x3c   : > { %2041 = vmatprep.subr.bf16.mxu0 %v4988_v50  ;;  %2653 = vmatprep.subr.bf16.mxu1 %v4990_v52  ;;  %v5045_v48 = vld [vmem:[%s6709_s1 + $0x2a8] ss:$16 sps:$4 sm:$0xff]   ;;  %v5053_v50 = vld [vmem:[%s6709_s1 + $0x2cc] ss:$16 sps:$4 sm:$0xff]   ;;  %v455_v52 = vpack.c.bf16 %v303_v47, %v295_v46  ;;  %v358_v47 = vld [vmem:[%s5589_s25 + $0x400] sm:$0xff] }
  0x3d   : > { %v5099_v46 = vld [vmem:[%s6709_s1 + $0x3c8] ss:$16 sps:$4 sm:$0xff]  }
  0x3f   : > { %2042 = vmatpush1.bf16.msra.mxu0 %v4992_v53  ;;  %2654 = vmatpush1.bf16.msra.mxu1 %v4993_v54  ;;  %v5048_v53 = vld [vmem:[%s6709_s1 + $0x2c0] ss:$16 sps:$4 sm:$0xff]   ;;  %v5051_v54 = vld [vmem:[%s6709_s1 + $0x2c8] ss:$16 sps:$4 sm:$0xff]  }
  0x40   : > { %2043 = vmatprep.subr.bf16.mxu0 %v4994_v55  ;;  %2655 = vmatprep.subr.bf16.mxu1 %v4996_v56  ;;  %v5056_v55 = vld [vmem:[%s6709_s1 + $0x2e4] ss:$16 sps:$4 sm:$0xff]   ;;  %v5059_v56 = vld [vmem:[%s6709_s1 + $0x2ec] ss:$16 sps:$4 sm:$0xff]  }
  0x43   : > { %2044 = vmatpush1.bf16.msra.mxu0 %v4998_v57  ;;  %2656 = vmatpush1.bf16.msra.mxu1 %v4999_v58  ;;  %v294_v57 = vld [vmem:[%s5589_s25 + $0x200] sm:$0xff] }
  0x44   : > { %2045 = vmatprep.subr.bf16.mxu0 %v5000_v59  ;;  %2657 = vmatprep.subr.bf16.mxu1 %v5002_v60  ;;  %v302_v58 = vld [vmem:[%s5589_s25 + $0x240] sm:$0xff]  ;;  %v311_v59 = vld [vmem:[%s5589_s25 + $0x288] sm:$0xff] }
  0x45   : > { %v319_v60 = vld [vmem:[%s5589_s25 + $0x2c8] sm:$0xff] }
  0x47   : > { %2046 = vmatpush1.bf16.msra.mxu0 %v5004_v61  ;;  %2658 = vmatpush1.bf16.msra.mxu1 %v5005_v62  ;;  %v5054_v61 = vld [vmem:[%s6709_s1 + $0x2e0] ss:$16 sps:$4 sm:$0xff]   ;;  %v5057_v62 = vld [vmem:[%s6709_s1 + $0x2e8] ss:$16 sps:$4 sm:$0xff]  }
  0x48   : > { %2047 = vmatprep.subr.bf16.mxu0 %v5006_v63  ;;  %2659 = vmatprep.subr.bf16.mxu1 %v5008_v0  ;;  %v5062_v63 = vld [vmem:[%s6709_s1 + $0x304] ss:$16 sps:$4 sm:$0xff]   ;;  %v5065_v0 = vld [vmem:[%s6709_s1 + $0x30c] ss:$16 sps:$4 sm:$0xff]  }
  0x4b   : > { %2048 = vmatpush1.bf16.msra.mxu0 %v5010_v1  ;;  %2660 = vmatpush1.bf16.msra.mxu1 %v5011_v2  ;;  %v454_v1 = vpack.c.bf16 %v302_v58, %v294_v57  ;;  %v463_v2 = vpack.c.bf16 %v319_v60, %v311_v59  ;;  %v374_v59 = vld [vmem:[%s5589_s25 + $0x480] sm:$0xff] }
  0x4c   : > { %2170 = vmatprep.subr.bf16.mxu0 %v5014_v5  ;;  %2782 = vmatprep.subr.bf16.mxu1 %v5017_v6  ;;  %v5068_v5 = vld [vmem:[%s6709_s1 + $0x324] ss:$16 sps:$4 sm:$0xff]   ;;  %v5071_v6 = vld [vmem:[%s6709_s1 + $0x32c] ss:$16 sps:$4 sm:$0xff]  }
  0x4d   : > { %v382_v60 = vld [vmem:[%s5589_s25 + $0x4c0] sm:$0xff] }
  0x4e   : > { %2050 = vmatmul.mubr.bf16.vlgmr.msra.gmra.mrb[0].mxu0 %v422_v9  ;;  %2662 = vmatmul.mubr.bf16.vlgmr.msra.gmra.mrb[0].mxu1 %v422_v9  ;;  %v327_v9 = vld [vmem:[%s5589_s25 + $0x308] sm:$0xff] }
  0x4f   : > { %2171 = vmatpush1.bf16.msra.mxu0 %v5012_v10  ;;  %2783 = vmatpush1.bf16.msra.mxu1 %v5015_v11  ;;  %v335_v10 = vld [vmem:[%s5589_s25 + $0x348] sm:$0xff]  ;;  %v5066_v11 = vld [vmem:[%s6709_s1 + $0x320] ss:$16 sps:$4 sm:$0xff]  }
  0x50   : > { %2172 = vmatprep.subr.bf16.mxu0 %v5020_v12  ;;  %2059 = vmatprep.mubr.bf16.mxu0 %v431_v13  ;;  %v5069_v12 = vld [vmem:[%s6709_s1 + $0x328] ss:$16 sps:$4 sm:$0xff]  }
  0x51   : > { %2671 = vmatprep.mubr.bf16.mxu1 %v431_v13  ;;  %2784 = vmatprep.subr.bf16.mxu1 %v5023_v16  ;;  %v5074_v13 = vld [vmem:[%s6709_s1 + $0x344] ss:$16 sps:$4 sm:$0xff]   ;;  %v471_v16 = vpack.c.bf16 %v335_v10, %v327_v9  ;;  %v233_v9 = vld [vmem:[%s5589_s25 + $0x18] sm:$0xff] }
  0x52   : > { %v241_v10 = vld [vmem:[%s5589_s25 + $0x58] sm:$0xff] }
  0x53   : > { %2173 = vmatpush1.bf16.msra.mxu0 %v5018_v14  ;;  %2785 = vmatpush1.bf16.msra.mxu1 %v5021_v18  ;;  %v5077_v14 = vld [vmem:[%s6709_s1 + $0x34c] ss:$16 sps:$4 sm:$0xff]   ;;  %v5075_v18 = vld [vmem:[%s6709_s1 + $0x348] ss:$16 sps:$4 sm:$0xff]  }
  0x54   : > { %2174 = vmatprep.subr.bf16.mxu0 %v5026_v19  ;;  %2786 = vmatprep.subr.bf16.mxu1 %v5029_v20  ;;  %v326_v19 = vld [vmem:[%s5589_s25 + $0x300] sm:$0xff] }
  0x55   : > { %v5080_v20 = vld [vmem:[%s6709_s1 + $0x364] ss:$16 sps:$4 sm:$0xff]  }
  0x56   : > { %2060 = vmatmul.mubr.bf16.gmra.mrb[4].mxu0 %v430_v23  ;;  %2672 = vmatmul.mubr.bf16.gmra.mrb[4].mxu1 %v430_v23  ;;  %v343_v23 = vld [vmem:[%s5589_s25 + $0x388] sm:$0xff] }
  0x57   : > { %2175 = vmatpush1.bf16.msra.mxu0 %v5024_v24  ;;  %2069 = vmatprep.mubr.bf16.mxu0 %v439_v25  ;;  %v351_v24 = vld [vmem:[%s5589_s25 + $0x3c8] sm:$0xff] }
  0x58   : > { %2681 = vmatprep.mubr.bf16.mxu1 %v439_v25  ;;  %2787 = vmatpush1.bf16.msra.mxu1 %v5027_v26  ;;  %v5078_v25 = vld [vmem:[%s6709_s1 + $0x360] ss:$16 sps:$4 sm:$0xff]   ;;  %v5081_v26 = vld [vmem:[%s6709_s1 + $0x368] ss:$16 sps:$4 sm:$0xff]   ;;  %v479_v30 = vpack.c.bf16 %v351_v24, %v343_v23  ;;  %v5119_v24 = vld [vmem:[%s6709_s1 + $0x42c] ss:$16 sps:$4 sm:$0xff]  }
  0x59   : > { %2176 = vmatprep.subr.bf16.mxu0 %v5032_v28  ;;  %2788 = vmatprep.subr.bf16.mxu1 %v5035_v29  ;;  %v5089_v28 = vld [vmem:[%s6709_s1 + $0x38c] ss:$16 sps:$4 sm:$0xff]   ;;  %v470_v29 = vpack.c.bf16 %v334_v22, %v326_v19  ;;  %v5111_v19 = vld [vmem:[%s6709_s1 + $0x408] ss:$16 sps:$4 sm:$0xff]   ;;  %v5114_v22 = vld [vmem:[%s6709_s1 + $0x420] ss:$16 sps:$4 sm:$0xff]  }
  0x5a   : > { %v248_v23 = vld [vmem:[%s5589_s25 + $0x90] sm:$0xff] }
  0x5b   : > { %2177 = vmatpush1.bf16.msra.mxu0 %v5030_v31  ;;  %v5084_v31 = vld [vmem:[%s6709_s1 + $0x380] ss:$16 sps:$4 sm:$0xff]  }
  0x5c   : > { %2789 = vmatpush1.bf16.msra.mxu1 %v5033_v32  ;;  %2178 = vmatprep.subr.bf16.mxu0 %v5038_v35  ;;  %v5087_v32 = vld [vmem:[%s6709_s1 + $0x388] ss:$16 sps:$4 sm:$0xff]   ;;  %v342_v35 = vld [vmem:[%s5589_s25 + $0x380] sm:$0xff] }
  0x5d   : > { %2790 = vmatprep.subr.bf16.mxu1 %v5041_v36  ;;  %v350_v36 = vld [vmem:[%s5589_s25 + $0x3c0] sm:$0xff] }
  0x5e   : > { %2070 = vmatmul.mubr.bf16.gmra.mrb[8].mxu0 %v438_v37  ;;  %2682 = vmatmul.mubr.bf16.gmra.mrb[8].mxu1 %v438_v37  ;;  %v359_v37 = vld [vmem:[%s5589_s25 + $0x408] sm:$0xff] }
  0x5f   : > { %2079 = vmatprep.mubr.bf16.mxu0 %v447_v38  ;;  %2691 = vmatprep.mubr.bf16.mxu1 %v447_v38  ;;  %v367_v38 = vld [vmem:[%s5589_s25 + $0x448] sm:$0xff] }
  0x60   : > { %2179 = vmatpush1.bf16.msra.mxu0 %v5036_v39  ;;  %2791 = vmatpush1.bf16.msra.mxu1 %v5039_v40  ;;  %v5090_v39 = vld [vmem:[%s6709_s1 + $0x3a0] ss:$16 sps:$4 sm:$0xff]   ;;  %v5093_v40 = vld [vmem:[%s6709_s1 + $0x3a8] ss:$16 sps:$4 sm:$0xff]   ;;  %v487_v44 = vpack.c.bf16 %v367_v38, %v359_v37  ;;  %v5131_v37 = vld [vmem:[%s6709_s1 + $0x46c] ss:$16 sps:$4 sm:$0xff]  }
  0x61   : > { %2180 = vmatprep.subr.bf16.mxu0 %v5044_v42  ;;  %2792 = vmatprep.subr.bf16.mxu1 %v5047_v43  ;;  %v5101_v42 = vld [vmem:[%s6709_s1 + $0x3cc] ss:$16 sps:$4 sm:$0xff]   ;;  %v478_v43 = vpack.c.bf16 %v350_v36, %v342_v35  ;;  %v264_v35 = vld [vmem:[%s5589_s25 + $0x110] sm:$0xff] }
  0x62   : > { %v5128_v36 = vld [vmem:[%s6709_s1 + $0x464] ss:$16 sps:$4 sm:$0xff]  }
  0x63   : > { %v272_v38 = vld [vmem:[%s5589_s25 + $0x150] sm:$0xff] }
  0x64   : > { %2181 = vmatpush1.bf16.msra.mxu0 %v5042_v45  ;;  %2793 = vmatpush1.bf16.msra.mxu1 %v5045_v48  ;;  %v5096_v45 = vld [vmem:[%s6709_s1 + $0x3c0] ss:$16 sps:$4 sm:$0xff]  }
  0x65   : > { %2182 = vmatprep.subr.bf16.mxu0 %v5050_v49  ;;  %2794 = vmatprep.subr.bf16.mxu1 %v5053_v50  ;;  %v366_v48 = vld [vmem:[%s5589_s25 + $0x440] sm:$0xff]  ;;  %v5107_v50 = vld [vmem:[%s6709_s1 + $0x3ec] ss:$16 sps:$4 sm:$0xff]  }
  0x66   : > { %2080 = vmatmul.mubr.bf16.gmra.mrb[12].mxu0 %v446_v51  ;;  %2692 = vmatmul.mubr.bf16.gmra.mrb[12].mxu1 %v446_v51  ;;  %v5104_v49 = vld [vmem:[%s6709_s1 + $0x3e4] ss:$16 sps:$4 sm:$0xff]   ;;  %v375_v51 = vld [vmem:[%s5589_s25 + $0x488] sm:$0xff]  ;;  %v486_v57 = vpack.c.bf16 %v366_v48, %v358_v47  ;;  %v5132_v47 = vld [vmem:[%s6709_s1 + $0x480] ss:$16 sps:$4 sm:$0xff]  }
  0x67   : > { %2089 = vmatprep.mubr.bf16.mxu0 %v455_v52  ;;  %2701 = vmatprep.mubr.bf16.mxu1 %v455_v52  ;;  %v383_v52 = vld [vmem:[%s5589_s25 + $0x4c8] sm:$0xff] }
  0x68   : > { %2183 = vmatpush1.bf16.msra.mxu0 %v5048_v53  ;;  %2795 = vmatpush1.bf16.msra.mxu1 %v5051_v54  ;;  %v5102_v53 = vld [vmem:[%s6709_s1 + $0x3e0] ss:$16 sps:$4 sm:$0xff]   ;;  %v5105_v54 = vld [vmem:[%s6709_s1 + $0x3e8] ss:$16 sps:$4 sm:$0xff]   ;;  %v495_v58 = vpack.c.bf16 %v383_v52, %v375_v51 }
  0x69   : > { %2184 = vmatprep.subr.bf16.mxu0 %v5056_v55  ;;  %2796 = vmatprep.subr.bf16.mxu1 %v5059_v56  ;;  %v5110_v55 = vld [vmem:[%s6709_s1 + $0x404] ss:$16 sps:$4 sm:$0xff]   ;;  %v5113_v56 = vld [vmem:[%s6709_s1 + $0x40c] ss:$16 sps:$4 sm:$0xff]   ;;  %v5135_v48 = vld [vmem:[%s6709_s1 + $0x488] ss:$16 sps:$4 sm:$0xff]  }
  0x6a   : > { %v280_v51 = vld [vmem:[%s5589_s25 + $0x190] sm:$0xff] }
  0x6b   : > { %v288_v52 = vld [vmem:[%s5589_s25 + $0x1d0] sm:$0xff] }
  0x6c   : > { %2185 = vmatpush1.bf16.msra.mxu0 %v5054_v61  ;;  %2797 = vmatpush1.bf16.msra.mxu1 %v5057_v62  ;;  %v391_v61 = vld [vmem:[%s5589_s25 + $0x508] sm:$0xff] }
  0x6d   : > { %2186 = vmatprep.subr.bf16.mxu0 %v5062_v63  ;;  %2798 = vmatprep.subr.bf16.mxu1 %v5065_v0  ;;  %v399_v62 = vld [vmem:[%s5589_s25 + $0x548] sm:$0xff]  ;;  %v494_v63 = vpack.c.bf16 %v382_v60, %v374_v59  ;;  %v448_v59 = vpack.c.bf16 %v288_v52, %v280_v51  ;;  %v5192_v52 = vld [vmem:[%s6709_s1 + $0x5c0] ss:$16 sps:$4 sm:$0xff]  }
  0x6e   : > { %2090 = vmatmul.mubr.bf16.gmra.mrb[16].mxu0 %v454_v1  ;;  %2702 = vmatmul.mubr.bf16.gmra.mrb[16].mxu1 %v454_v1  ;;  %v503_v0 = vpack.c.bf16 %v399_v62, %v391_v61  ;;  %v390_v1 = vld [vmem:[%s5589_s25 + $0x500] sm:$0xff]  ;;  %v5147_v62 = vld [vmem:[%s6709_s1 + $0x4c8] ss:$16 sps:$4 sm:$0xff]  }
  0x6f   : > { %2099 = vmatprep.mubr.bf16.mxu0 %v463_v2  ;;  %2711 = vmatprep.mubr.bf16.mxu1 %v463_v2  ;;  %v398_v2 = vld [vmem:[%s5589_s25 + $0x540] sm:$0xff] }
  0x70   : > { %2187 = vmatpush1.bf16.msra.mxu0 %v5060_v3  ;;  %2799 = vmatpush1.bf16.msra.mxu1 %v5063_v4  ;;  %v407_v3 = vld [vmem:[%s5589_s25 + $0x588] sm:$0xff]  ;;  %v5144_v61 = vld [vmem:[%s6709_s1 + $0x4c0] ss:$16 sps:$4 sm:$0xff]  }
  0x71   : > { %2188 = vmatprep.subr.bf16.mxu0 %v5068_v5  ;;  %2800 = vmatprep.subr.bf16.mxu1 %v5071_v6  ;;  %v415_v4 = vld [vmem:[%s5589_s25 + $0x5c8] sm:$0xff]  ;;  %v502_v5 = vpack.c.bf16 %v398_v2, %v390_v1  ;;  %v296_v1 = vld [vmem:[%s5589_s25 + $0x210] sm:$0xff] }
  0x72   : > { %v511_v6 = vpack.c.bf16 %v415_v4, %v407_v3  ;;  %v304_v2 = vld [vmem:[%s5589_s25 + $0x250] sm:$0xff]  ;;  %v313_v3 = vld [vmem:[%s5589_s25 + $0x298] sm:$0xff] }
  0x73   : > { %v321_v4 = vld [vmem:[%s5589_s25 + $0x2d8] sm:$0xff] }
  0x74   : > { %2189 = vmatpush1.bf16.msra.mxu0 %v5066_v11  ;;  %2801 = vmatpush1.bf16.msra.mxu1 %v5069_v12  ;;  %v510_v11 = vpack.c.bf16 %v414_v8, %v406_v7  ;;  %v425_v12 = vpack.c.bf16 %v241_v10, %v233_v9  ;;  %v5158_v7 = vld [vmem:[%s6709_s1 + $0x504] ss:$16 sps:$4 sm:$0xff]   ;;  %v5161_v8 = vld [vmem:[%s6709_s1 + $0x50c] ss:$16 sps:$4 sm:$0xff]   ;;  %v456_v9 = vpack.c.bf16 %v304_v2, %v296_v1 }
  0x75   : > { %2190 = vmatprep.subr.bf16.mxu0 %v5074_v13  ;;  %2802 = vmatprep.subr.bf16.mxu1 %v5077_v14  ;;  %v232_v13 = vld [vmem:[%s5589_s25 + $0x10] sm:$0xff]  ;;  %v465_v10 = vpack.c.bf16 %v321_v4, %v313_v3 }
  0x76   : > { %2100 = vmatmul.mubr.bf16.gmra.mrb[20].mxu0 %v462_v15  ;;  %2712 = vmatmul.mubr.bf16.gmra.mrb[20].mxu1 %v462_v15  ;;  %v240_v14 = vld [vmem:[%s5589_s25 + $0x50] sm:$0xff]  ;;  %v249_v15 = vld [vmem:[%s5589_s25 + $0x98] sm:$0xff] }
  0x77   : > { %2109 = vmatprep.mubr.bf16.mxu0 %v471_v16  ;;  %2721 = vmatprep.mubr.bf16.mxu1 %v471_v16  ;;  %v257_v16 = vld [vmem:[%s5589_s25 + $0xd8] sm:$0xff]  ;;  %v376_v3 = vld [vmem:[%s5589_s25 + $0x490] sm:$0xff] }
  0x78   : > { %2191 = vmatpush1.bf16.msra.mxu0 %v5072_v17  ;;  %2803 = vmatpush1.bf16.msra.mxu1 %v5075_v18  ;;  %v424_v17 = vpack.c.bf16 %v240_v14, %v232_v13  ;;  %v5108_v18 = vld [vmem:[%s6709_s1 + $0x400] ss:$16 sps:$4 sm:$0xff]   ;;  %v5164_v13 = vld [vmem:[%s6709_s1 + $0x524] ss:$16 sps:$4 sm:$0xff]   ;;  %v5167_v14 = vld [vmem:[%s6709_s1 + $0x52c] ss:$16 sps:$4 sm:$0xff]  }
  0x79   : > { %2192 = vmatprep.subr.bf16.mxu0 %v5080_v20  ;;  %2804 = vmatprep.subr.bf16.mxu1 %v5083_v21  ;;  %v5116_v20 = vld [vmem:[%s6709_s1 + $0x424] ss:$16 sps:$4 sm:$0xff]   ;;  %v433_v21 = vpack.c.bf16 %v257_v16, %v249_v15 }
  0x7a   : > { %v312_v15 = vld [vmem:[%s5589_s25 + $0x290] sm:$0xff] }
  0x7b   : > { %v320_v16 = vld [vmem:[%s5589_s25 + $0x2d0] sm:$0xff] }
  0x7c   : > { %2193 = vmatpush1.bf16.msra.mxu0 %v5078_v25  ;;  %2805 = vmatpush1.bf16.msra.mxu1 %v5081_v26  ;;  %v256_v25 = vld [vmem:[%s5589_s25 + $0xd0] sm:$0xff]  ;;  %v5117_v26 = vld [vmem:[%s6709_s1 + $0x428] ss:$16 sps:$4 sm:$0xff]  }
  0x7d   : > { %2194 = vmatprep.subr.bf16.mxu0 %v5086_v27  ;;  %2806 = vmatprep.subr.bf16.mxu1 %v5089_v28  ;;  %v5122_v27 = vld [vmem:[%s6709_s1 + $0x444] ss:$16 sps:$4 sm:$0xff]   ;;  %v5125_v28 = vld [vmem:[%s6709_s1 + $0x44c] ss:$16 sps:$4 sm:$0xff]  }
  0x7e   : > { %2110 = vmatmul.mubr.bf16.gmra.mrb[24].mxu0 %v470_v29  ;;  %2722 = vmatmul.mubr.bf16.gmra.mrb[24].mxu1 %v470_v29  ;;  %v265_v29 = vld [vmem:[%s5589_s25 + $0x118] sm:$0xff]  ;;  %v384_v4 = vld [vmem:[%s5589_s25 + $0x4d0] sm:$0xff] }
  0x7f   : > { %2119 = vmatprep.mubr.bf16.mxu0 %v479_v30  ;;  %2731 = vmatprep.mubr.bf16.mxu1 %v479_v30  ;;  %v273_v30 = vld [vmem:[%s5589_s25 + $0x158] sm:$0xff] }
  0x80   : > { %2195 = vmatpush1.bf16.msra.mxu0 %v5084_v31  ;;  %2807 = vmatpush1.bf16.msra.mxu1 %v5087_v32  ;;  %v432_v31 = vpack.c.bf16 %v256_v25, %v248_v23  ;;  %v5120_v32 = vld [vmem:[%s6709_s1 + $0x440] ss:$16 sps:$4 sm:$0xff]   ;;  %v464_v23 = vpack.c.bf16 %v320_v16, %v312_v15  ;;  %v5171_v25 = vld [vmem:[%s6709_s1 + $0x548] ss:$16 sps:$4 sm:$0xff]  }
  0x81   : > { %2196 = vmatprep.subr.bf16.mxu0 %v5092_v33  ;;  %2808 = vmatprep.subr.bf16.mxu1 %v5095_v34  ;;  %v441_v33 = vpack.c.bf16 %v273_v30, %v265_v29  ;;  %v5123_v34 = vld [vmem:[%s6709_s1 + $0x448] ss:$16 sps:$4 sm:$0xff]   ;;  %v328_v29 = vld [vmem:[%s5589_s25 + $0x310] sm:$0xff] }
  0x82   : > { %v336_v30 = vld [vmem:[%s5589_s25 + $0x350] sm:$0xff] }
  0x83   : > { %v408_v15 = vld [vmem:[%s5589_s25 + $0x590] sm:$0xff] }
  0x84   : > { %2197 = vmatpush1.bf16.msra.mxu0 %v5090_v39  ;;  %2809 = vmatpush1.bf16.msra.mxu1 %v5093_v40  ;;  %v5126_v39 = vld [vmem:[%s6709_s1 + $0x460] ss:$16 sps:$4 sm:$0xff]   ;;  %v5129_v40 = vld [vmem:[%s6709_s1 + $0x468] ss:$16 sps:$4 sm:$0xff]  }
  0x85   : > { %2198 = vmatprep.subr.bf16.mxu0 %v5098_v41  ;;  %2810 = vmatprep.subr.bf16.mxu1 %v5101_v42  ;;  %v281_v41 = vld [vmem:[%s5589_s25 + $0x198] sm:$0xff]  ;;  %v416_v16 = vld [vmem:[%s5589_s25 + $0x5d0] sm:$0xff] }
  0x86   : > { %2120 = vmatmul.mubr.bf16.gmra.mrb[28].mxu0 %v478_v43  ;;  %2732 = vmatmul.mubr.bf16.gmra.mrb[28].mxu1 %v478_v43  ;;  %v289_v42 = vld [vmem:[%s5589_s25 + $0x1d8] sm:$0xff]  ;;  %v5134_v43 = vld [vmem:[%s6709_s1 + $0x484] ss:$16 sps:$4 sm:$0xff]  }
  0x87   : > { %2129 = vmatprep.mubr.bf16.mxu0 %v487_v44  ;;  %2741 = vmatprep.mubr.bf16.mxu1 %v487_v44  ;;  %v5137_v44 = vld [vmem:[%s6709_s1 + $0x48c] ss:$16 sps:$4 sm:$0xff]  }
  0x88   : > { %2199 = vmatpush1.bf16.msra.mxu0 %v5096_v45  ;;  %2811 = vmatpush1.bf16.msra.mxu1 %v5099_v46  ;;  %v440_v45 = vpack.c.bf16 %v272_v38, %v264_v35  ;;  %v449_v46 = vpack.c.bf16 %v289_v42, %v281_v41  ;;  %v5182_v35 = vld [vmem:[%s6709_s1 + $0x584] ss:$16 sps:$4 sm:$0xff]   ;;  %v5180_v38 = vld [vmem:[%s6709_s1 + $0x580] ss:$16 sps:$4 sm:$0xff]   ;;  %v5191_v42 = vld [vmem:[%s6709_s1 + $0x5ac] ss:$16 sps:$4 sm:$0xff]  }
  0x89   : > { %2200 = vmatprep.subr.bf16.mxu0 %v5104_v49  ;;  %2812 = vmatprep.subr.bf16.mxu1 %v5107_v50  ;;  %v5140_v49 = vld [vmem:[%s6709_s1 + $0x4a4] ss:$16 sps:$4 sm:$0xff]   ;;  %v5143_v50 = vld [vmem:[%s6709_s1 + $0x4ac] ss:$16 sps:$4 sm:$0xff]  }
  0x8a   : > { %v5188_v41 = vld [vmem:[%s6709_s1 + $0x5a4] ss:$16 sps:$4 sm:$0xff]  }
  0x8c   : > { %2201 = vmatpush1.bf16.msra.mxu0 %v5102_v53  ;;  %2813 = vmatpush1.bf16.msra.mxu1 %v5105_v54  ;;  %v5138_v53 = vld [vmem:[%s6709_s1 + $0x4a0] ss:$16 sps:$4 sm:$0xff]   ;;  %v297_v54 = vld [vmem:[%s5589_s25 + $0x218] sm:$0xff] }
  0x8d   : > { %2323 = vmatprep.subr.bf16.mxu0 %v5110_v55  ;;  %2935 = vmatprep.subr.bf16.mxu1 %v5113_v56  ;;  %v305_v55 = vld [vmem:[%s5589_s25 + $0x258] sm:$0xff] }
  0x8e   : > { %2130 = vmatmul.mubr.bf16.gmra.mrb[32].mxu0 %v486_v57  ;;  %2742 = vmatmul.mubr.bf16.gmra.mrb[32].mxu1 %v486_v57  ;;  %v5141_v56 = vld [vmem:[%s6709_s1 + $0x4a8] ss:$16 sps:$4 sm:$0xff]   ;;  %v5146_v57 = vld [vmem:[%s6709_s1 + $0x4c4] ss:$16 sps:$4 sm:$0xff]   ;;  %v457_v60 = vpack.c.bf16 %v305_v55, %v297_v54 }
  0x8f   : > { %2139 = vmatprep.mubr.bf16.mxu0 %v495_v58  ;;  %2751 = vmatprep.mubr.bf16.mxu1 %v495_v58  ;;  %v5149_v58 = vld [vmem:[%s6709_s1 + $0x4cc] ss:$16 sps:$4 sm:$0xff]   ;;  %v5200_v55 = vld [vmem:[%s6709_s1 + $0x5e4] ss:$16 sps:$4 sm:$0xff]  }
  0x96   : > { %2140 = vmatmul.mubr.bf16.gmra.mrb[36].mxu0 %v494_v63  ;;  %2752 = vmatmul.mubr.bf16.gmra.mrb[36].mxu1 %v494_v63  ;;  %v5152_v63 = vld [vmem:[%s6709_s1 + $0x4e4] ss:$16 sps:$4 sm:$0xff]  }
  0x97   : > { %2149 = vmatprep.mubr.bf16.mxu0 %v503_v0  ;;  %2761 = vmatprep.mubr.bf16.mxu1 %v503_v0  ;;  %v5155_v0 = vld [vmem:[%s6709_s1 + $0x4ec] ss:$16 sps:$4 sm:$0xff]  }
  0x9e   : > { %2150 = vmatmul.mubr.bf16.gmra.mrb[40].mxu0 %v502_v5  ;;  %2762 = vmatmul.mubr.bf16.gmra.mrb[40].mxu1 %v502_v5  ;;  %v5150_v5 = vld [vmem:[%s6709_s1 + $0x4e0] ss:$16 sps:$4 sm:$0xff]  }
  0x9f   : > { %2159 = vmatprep.mubr.bf16.mxu0 %v511_v6  ;;  %2771 = vmatprep.mubr.bf16.mxu1 %v511_v6  ;;  %v5153_v6 = vld [vmem:[%s6709_s1 + $0x4e8] ss:$16 sps:$4 sm:$0xff]  }
  0xa6   : > { %2160 = vmatmul.mubr.bf16.gmra.mrb[44].mxu0 %v510_v11  ;;  %2772 = vmatmul.mubr.bf16.gmra.mrb[44].mxu1 %v510_v11  ;;  %v5156_v11 = vld [vmem:[%s6709_s1 + $0x500] ss:$16 sps:$4 sm:$0xff]  }
  0xa7   : > { %2202 = vmatprep.mubr.bf16.mxu0 %v425_v12  ;;  %2814 = vmatprep.mubr.bf16.mxu1 %v425_v12  ;;  %v5159_v12 = vld [vmem:[%s6709_s1 + $0x508] ss:$16 sps:$4 sm:$0xff]  }
  0xae   : > { %2203 = vmatmul.mubr.bf16.vlgmr.msra.gmra.mrb[0].mxu0 %v424_v17  ;;  %2815 = vmatmul.mubr.bf16.vlgmr.msra.gmra.mrb[0].mxu1 %v424_v17  ;;  %v329_v17 = vld [vmem:[%s5589_s25 + $0x318] sm:$0xff] }
  0xaf   : > { %2324 = vmatpush1.bf16.msra.mxu0 %v5108_v18  ;;  %2936 = vmatpush1.bf16.msra.mxu1 %v5111_v19  ;;  %v337_v18 = vld [vmem:[%s5589_s25 + $0x358] sm:$0xff]  ;;  %v5162_v19 = vld [vmem:[%s6709_s1 + $0x520] ss:$16 sps:$4 sm:$0xff]  }
  0xb0   : > { %2325 = vmatprep.subr.bf16.mxu0 %v5116_v20  ;;  %2212 = vmatprep.mubr.bf16.mxu0 %v433_v21  ;;  %v5165_v20 = vld [vmem:[%s6709_s1 + $0x528] ss:$16 sps:$4 sm:$0xff]  }
  0xb1   : > { %2824 = vmatprep.mubr.bf16.mxu1 %v433_v21  ;;  %2937 = vmatprep.subr.bf16.mxu1 %v5119_v24  ;;  %v5170_v21 = vld [vmem:[%s6709_s1 + $0x544] ss:$16 sps:$4 sm:$0xff]   ;;  %v5168_v24 = vld [vmem:[%s6709_s1 + $0x540] ss:$16 sps:$4 sm:$0xff]  }
  0xb3   : > { %2326 = vmatpush1.bf16.msra.mxu0 %v5114_v22  ;;  %2938 = vmatpush1.bf16.msra.mxu1 %v5117_v26  ;;  %v5173_v22 = vld [vmem:[%s6709_s1 + $0x54c] ss:$16 sps:$4 sm:$0xff]   ;;  %v473_v26 = vpack.c.bf16 %v337_v18, %v329_v17 }
  0xb4   : > { %2327 = vmatprep.subr.bf16.mxu0 %v5122_v27  ;;  %2939 = vmatprep.subr.bf16.mxu1 %v5125_v28  ;;  %v5176_v27 = vld [vmem:[%s6709_s1 + $0x564] ss:$16 sps:$4 sm:$0xff]   ;;  %v5179_v28 = vld [vmem:[%s6709_s1 + $0x56c] ss:$16 sps:$4 sm:$0xff]  }
  0xb5   : > { %v235_v17 = vld [vmem:[%s5589_s25 + $0x28] sm:$0xff] }
  0xb6   : > { %2213 = vmatmul.mubr.bf16.gmra.mrb[4].mxu0 %v432_v31  ;;  %2825 = vmatmul.mubr.bf16.gmra.mrb[4].mxu1 %v432_v31  ;;  %v345_v31 = vld [vmem:[%s5589_s25 + $0x398] sm:$0xff]  ;;  %v243_v18 = vld [vmem:[%s5589_s25 + $0x68] sm:$0xff] }
  0xb7   : > { %2328 = vmatpush1.bf16.msra.mxu0 %v5120_v32  ;;  %2222 = vmatprep.mubr.bf16.mxu0 %v441_v33  ;;  %v353_v32 = vld [vmem:[%s5589_s25 + $0x3d8] sm:$0xff] }
  0xb8   : > { %2834 = vmatprep.mubr.bf16.mxu1 %v441_v33  ;;  %2940 = vmatpush1.bf16.msra.mxu1 %v5123_v34  ;;  %v5174_v33 = vld [vmem:[%s6709_s1 + $0x560] ss:$16 sps:$4 sm:$0xff]   ;;  %v5177_v34 = vld [vmem:[%s6709_s1 + $0x568] ss:$16 sps:$4 sm:$0xff]  }
  0xb9   : > { %2329 = vmatprep.subr.bf16.mxu0 %v5128_v36  ;;  %2941 = vmatprep.subr.bf16.mxu1 %v5131_v37  ;;  %v5185_v36 = vld [vmem:[%s6709_s1 + $0x58c] ss:$16 sps:$4 sm:$0xff]   ;;  %v472_v37 = vpack.c.bf16 %v336_v30, %v328_v29  ;;  %v5212_v29 = vld [vmem:[%s6709_s1 + $0x624] ss:$16 sps:$4 sm:$0xff]  }
  0xba   : > { %v5215_v30 = vld [vmem:[%s6709_s1 + $0x62c] ss:$16 sps:$4 sm:$0xff]  }
  0xbb   : > { %2330 = vmatpush1.bf16.msra.mxu0 %v5126_v39  ;;  %v5183_v39 = vld [vmem:[%s6709_s1 + $0x588] ss:$16 sps:$4 sm:$0xff]  }
  0xbc   : > { %2942 = vmatpush1.bf16.msra.mxu1 %v5129_v40  ;;  %2331 = vmatprep.subr.bf16.mxu0 %v5134_v43  ;;  %v481_v40 = vpack.c.bf16 %v353_v32, %v345_v31  ;;  %v344_v43 = vld [vmem:[%s5589_s25 + $0x390] sm:$0xff]  ;;  %v250_v31 = vld [vmem:[%s5589_s25 + $0xa0] sm:$0xff] }
  0xbd   : > { %2943 = vmatprep.subr.bf16.mxu1 %v5137_v44  ;;  %v352_v44 = vld [vmem:[%s5589_s25 + $0x3d0] sm:$0xff]  ;;  %v258_v32 = vld [vmem:[%s5589_s25 + $0xe0] sm:$0xff] }
  0xbe   : > { %2223 = vmatmul.mubr.bf16.gmra.mrb[8].mxu0 %v440_v45  ;;  %2835 = vmatmul.mubr.bf16.gmra.mrb[8].mxu1 %v440_v45  ;;  %v361_v45 = vld [vmem:[%s5589_s25 + $0x418] sm:$0xff]  ;;  %v480_v51 = vpack.c.bf16 %v352_v44, %v344_v43  ;;  %v5224_v43 = vld [vmem:[%s6709_s1 + $0x664] ss:$16 sps:$4 sm:$0xff]  }
  0xbf   : > { %2232 = vmatprep.mubr.bf16.mxu0 %v449_v46  ;;  %2844 = vmatprep.mubr.bf16.mxu1 %v449_v46  ;;  %v369_v46 = vld [vmem:[%s5589_s25 + $0x458] sm:$0xff] }
  0xc0   : > { %2332 = vmatpush1.bf16.msra.mxu0 %v5132_v47  ;;  %2944 = vmatpush1.bf16.msra.mxu1 %v5135_v48  ;;  %v5186_v47 = vld [vmem:[%s6709_s1 + $0x5a0] ss:$16 sps:$4 sm:$0xff]   ;;  %v5189_v48 = vld [vmem:[%s6709_s1 + $0x5a8] ss:$16 sps:$4 sm:$0xff]   ;;  %v489_v54 = vpack.c.bf16 %v369_v46, %v361_v45  ;;  %v5227_v44 = vld [vmem:[%s6709_s1 + $0x66c] ss:$16 sps:$4 sm:$0xff]  }
  0xc1   : > { %2333 = vmatprep.subr.bf16.mxu0 %v5140_v49  ;;  %2945 = vmatprep.subr.bf16.mxu1 %v5143_v50  ;;  %v5194_v49 = vld [vmem:[%s6709_s1 + $0x5c4] ss:$16 sps:$4 sm:$0xff]   ;;  %v5197_v50 = vld [vmem:[%s6709_s1 + $0x5cc] ss:$16 sps:$4 sm:$0xff]  }
  0xc2   : > { %v266_v45 = vld [vmem:[%s5589_s25 + $0x120] sm:$0xff] }
  0xc3   : > { %v274_v46 = vld [vmem:[%s5589_s25 + $0x160] sm:$0xff] }
  0xc4   : > { %2334 = vmatpush1.bf16.msra.mxu0 %v5138_v53  ;;  %2946 = vmatpush1.bf16.msra.mxu1 %v5141_v56  ;;  %v5195_v53 = vld [vmem:[%s6709_s1 + $0x5c8] ss:$16 sps:$4 sm:$0xff]   ;;  %v5203_v56 = vld [vmem:[%s6709_s1 + $0x5ec] ss:$16 sps:$4 sm:$0xff]  }
  0xc5   : > { %2335 = vmatprep.subr.bf16.mxu0 %v5146_v57  ;;  %2947 = vmatprep.subr.bf16.mxu1 %v5149_v58  ;;  %v360_v57 = vld [vmem:[%s5589_s25 + $0x410] sm:$0xff] }
  0xc6   : > { %2233 = vmatmul.mubr.bf16.gmra.mrb[12].mxu0 %v448_v59  ;;  %2845 = vmatmul.mubr.bf16.gmra.mrb[12].mxu1 %v448_v59  ;;  %v368_v58 = vld [vmem:[%s5589_s25 + $0x450] sm:$0xff]  ;;  %v377_v59 = vld [vmem:[%s5589_s25 + $0x498] sm:$0xff] }
  0xc7   : > { %2242 = vmatprep.mubr.bf16.mxu0 %v457_v60  ;;  %2854 = vmatprep.mubr.bf16.mxu1 %v457_v60  ;;  %v385_v60 = vld [vmem:[%s5589_s25 + $0x4d8] sm:$0xff]  ;;  %v488_v1 = vpack.c.bf16 %v368_v58, %v360_v57  ;;  %v5236_v57 = vld [vmem:[%s6709_s1 + $0x6a4] ss:$16 sps:$4 sm:$0xff]  }
  0xc8   : > { %2336 = vmatpush1.bf16.msra.mxu0 %v5144_v61  ;;  %2948 = vmatpush1.bf16.msra.mxu1 %v5147_v62  ;;  %v5198_v61 = vld [vmem:[%s6709_s1 + $0x5e0] ss:$16 sps:$4 sm:$0xff]   ;;  %v5201_v62 = vld [vmem:[%s6709_s1 + $0x5e8] ss:$16 sps:$4 sm:$0xff]   ;;  %v497_v2 = vpack.c.bf16 %v385_v60, %v377_v59  ;;  %v5239_v58 = vld [vmem:[%s6709_s1 + $0x6ac] ss:$16 sps:$4 sm:$0xff]  }
  0xc9   : > { %2337 = vmatprep.subr.bf16.mxu0 %v5152_v63  ;;  %2949 = vmatprep.subr.bf16.mxu1 %v5155_v0  ;;  %v5206_v63 = vld [vmem:[%s6709_s1 + $0x604] ss:$16 sps:$4 sm:$0xff]   ;;  %v5209_v0 = vld [vmem:[%s6709_s1 + $0x60c] ss:$16 sps:$4 sm:$0xff]  }
  0xca   : > { %v282_v59 = vld [vmem:[%s5589_s25 + $0x1a0] sm:$0xff] }
  0xcb   : > { %v290_v60 = vld [vmem:[%s5589_s25 + $0x1e0] sm:$0xff] }
  0xcc   : > { %2338 = vmatpush1.bf16.msra.mxu0 %v5150_v5  ;;  %2950 = vmatpush1.bf16.msra.mxu1 %v5153_v6  ;;  %v393_v5 = vld [vmem:[%s5589_s25 + $0x518] sm:$0xff] }
  0xcd   : > { %2339 = vmatprep.subr.bf16.mxu0 %v5158_v7  ;;  %2951 = vmatprep.subr.bf16.mxu1 %v5161_v8  ;;  %v401_v6 = vld [vmem:[%s5589_s25 + $0x558] sm:$0xff]  ;;  %v496_v7 = vpack.c.bf16 %v384_v4, %v376_v3  ;;  %v450_v3 = vpack.c.bf16 %v290_v60, %v282_v59  ;;  %v378_v59 = vld [vmem:[%s5589_s25 + $0x4a0] sm:$0xff] }
  0xce   : > { %2243 = vmatmul.mubr.bf16.gmra.mrb[16].mxu0 %v456_v9  ;;  %2855 = vmatmul.mubr.bf16.gmra.mrb[16].mxu1 %v456_v9  ;;  %v505_v8 = vpack.c.bf16 %v401_v6, %v393_v5  ;;  %v392_v9 = vld [vmem:[%s5589_s25 + $0x510] sm:$0xff]  ;;  %v5243_v6 = vld [vmem:[%s6709_s1 + $0x6c8] ss:$16 sps:$4 sm:$0xff]   ;;  %v386_v60 = vld [vmem:[%s5589_s25 + $0x4e0] sm:$0xff] }
  0xcf   : > { %2252 = vmatprep.mubr.bf16.mxu0 %v465_v10  ;;  %2864 = vmatprep.mubr.bf16.mxu1 %v465_v10  ;;  %v400_v10 = vld [vmem:[%s5589_s25 + $0x550] sm:$0xff] }
  0xd0   : > { %2340 = vmatpush1.bf16.msra.mxu0 %v5156_v11  ;;  %2952 = vmatpush1.bf16.msra.mxu1 %v5159_v12  ;;  %v409_v11 = vld [vmem:[%s5589_s25 + $0x598] sm:$0xff]  ;;  %v5240_v5 = vld [vmem:[%s6709_s1 + $0x6c0] ss:$16 sps:$4 sm:$0xff]  }
  0xd1   : > { %2341 = vmatprep.subr.bf16.mxu0 %v5164_v13  ;;  %2953 = vmatprep.subr.bf16.mxu1 %v5167_v14  ;;  %v417_v12 = vld [vmem:[%s5589_s25 + $0x5d8] sm:$0xff]  ;;  %v504_v13 = vpack.c.bf16 %v400_v10, %v392_v9  ;;  %v298_v9 = vld [vmem:[%s5589_s25 + $0x220] sm:$0xff] }
  0xd2   : > { %v513_v14 = vpack.c.bf16 %v417_v12, %v409_v11  ;;  %v306_v10 = vld [vmem:[%s5589_s25 + $0x260] sm:$0xff]  ;;  %v315_v11 = vld [vmem:[%s5589_s25 + $0x2a8] sm:$0xff] }
  0xd3   : > { %v323_v12 = vld [vmem:[%s5589_s25 + $0x2e8] sm:$0xff] }
  0xd4   : > { %2342 = vmatpush1.bf16.msra.mxu0 %v5162_v19  ;;  %2954 = vmatpush1.bf16.msra.mxu1 %v5165_v20  ;;  %v512_v19 = vpack.c.bf16 %v416_v16, %v408_v15  ;;  %v427_v20 = vpack.c.bf16 %v243_v18, %v235_v17  ;;  %v5254_v15 = vld [vmem:[%s6709_s1 + $0x704] ss:$16 sps:$4 sm:$0xff]   ;;  %v5257_v16 = vld [vmem:[%s6709_s1 + $0x70c] ss:$16 sps:$4 sm:$0xff]   ;;  %v458_v17 = vpack.c.bf16 %v306_v10, %v298_v9 }
  0xd5   : > { %2343 = vmatprep.subr.bf16.mxu0 %v5170_v21  ;;  %2955 = vmatprep.subr.bf16.mxu1 %v5173_v22  ;;  %v234_v21 = vld [vmem:[%s5589_s25 + $0x20] sm:$0xff]  ;;  %v467_v18 = vpack.c.bf16 %v323_v12, %v315_v11  ;;  %v237_v9 = vld [vmem:[%s5589_s25 + $0x38] sm:$0xff] }
  0xd6   : > { %2253 = vmatmul.mubr.bf16.gmra.mrb[20].mxu0 %v464_v23  ;;  %2865 = vmatmul.mubr.bf16.gmra.mrb[20].mxu1 %v464_v23  ;;  %v242_v22 = vld [vmem:[%s5589_s25 + $0x60] sm:$0xff]  ;;  %v251_v23 = vld [vmem:[%s5589_s25 + $0xa8] sm:$0xff]  ;;  %v245_v10 = vld [vmem:[%s5589_s25 + $0x78] sm:$0xff] }
  0xd7   : > { %2262 = vmatprep.mubr.bf16.mxu0 %v473_v26  ;;  %2874 = vmatprep.mubr.bf16.mxu1 %v473_v26  ;;  %v5204_v26 = vld [vmem:[%s6709_s1 + $0x600] ss:$16 sps:$4 sm:$0xff]   ;;  %v429_v12 = vpack.c.bf16 %v245_v10, %v237_v9  ;;  %v341_v9 = vld [vmem:[%s5589_s25 + $0x378] sm:$0xff] }
  0xd8   : > { %2344 = vmatpush1.bf16.msra.mxu0 %v5168_v24  ;;  %2956 = vmatpush1.bf16.msra.mxu1 %v5171_v25  ;;  %v259_v24 = vld [vmem:[%s5589_s25 + $0xe8] sm:$0xff]  ;;  %v426_v25 = vpack.c.bf16 %v242_v22, %v234_v21  ;;  %v5260_v21 = vld [vmem:[%s6709_s1 + $0x724] ss:$16 sps:$4 sm:$0xff]  }
  0xd9   : > { %2345 = vmatprep.subr.bf16.mxu0 %v5176_v27  ;;  %2957 = vmatprep.subr.bf16.mxu1 %v5179_v28  ;;  %v5207_v27 = vld [vmem:[%s6709_s1 + $0x608] ss:$16 sps:$4 sm:$0xff]   ;;  %v435_v28 = vpack.c.bf16 %v259_v24, %v251_v23  ;;  %v5263_v22 = vld [vmem:[%s6709_s1 + $0x72c] ss:$16 sps:$4 sm:$0xff]   ;;  %v314_v23 = vld [vmem:[%s5589_s25 + $0x2a0] sm:$0xff] }
  0xda   : > { %v322_v24 = vld [vmem:[%s5589_s25 + $0x2e0] sm:$0xff] }
  0xdc   : > { %2346 = vmatpush1.bf16.msra.mxu0 %v5174_v33  ;;  %2958 = vmatpush1.bf16.msra.mxu1 %v5177_v34  ;;  %v5210_v33 = vld [vmem:[%s6709_s1 + $0x620] ss:$16 sps:$4 sm:$0xff]   ;;  %v5213_v34 = vld [vmem:[%s6709_s1 + $0x628] ss:$16 sps:$4 sm:$0xff]  }
  0xdd   : > { %2347 = vmatprep.subr.bf16.mxu0 %v5182_v35  ;;  %2959 = vmatprep.subr.bf16.mxu1 %v5185_v36  ;;  %v267_v35 = vld [vmem:[%s5589_s25 + $0x128] sm:$0xff] }
  0xde   : > { %2263 = vmatmul.mubr.bf16.gmra.mrb[24].mxu0 %v472_v37  ;;  %2875 = vmatmul.mubr.bf16.gmra.mrb[24].mxu1 %v472_v37  ;;  %v275_v36 = vld [vmem:[%s5589_s25 + $0x168] sm:$0xff]  ;;  %v5218_v37 = vld [vmem:[%s6709_s1 + $0x644] ss:$16 sps:$4 sm:$0xff]  }
  0xdf   : > { %2272 = vmatprep.mubr.bf16.mxu0 %v481_v40  ;;  %2884 = vmatprep.mubr.bf16.mxu1 %v481_v40  ;;  %v443_v40 = vpack.c.bf16 %v275_v36, %v267_v35  ;;  %v5272_v35 = vld [vmem:[%s6709_s1 + $0x764] ss:$16 sps:$4 sm:$0xff]   ;;  %v5275_v36 = vld [vmem:[%s6709_s1 + $0x76c] ss:$16 sps:$4 sm:$0xff]  }
  0xe0   : > { %2348 = vmatpush1.bf16.msra.mxu0 %v5180_v38  ;;  %2960 = vmatpush1.bf16.msra.mxu1 %v5183_v39  ;;  %v5221_v38 = vld [vmem:[%s6709_s1 + $0x64c] ss:$16 sps:$4 sm:$0xff]   ;;  %v434_v39 = vpack.c.bf16 %v258_v32, %v250_v31  ;;  %v466_v31 = vpack.c.bf16 %v322_v24, %v314_v23  ;;  %v252_v23 = vld [vmem:[%s5589_s25 + $0xb0] sm:$0xff] }
  0xe1   : > { %2349 = vmatprep.subr.bf16.mxu0 %v5188_v41  ;;  %2961 = vmatprep.subr.bf16.mxu1 %v5191_v42  ;;  %v5216_v41 = vld [vmem:[%s6709_s1 + $0x640] ss:$16 sps:$4 sm:$0xff]   ;;  %v5219_v42 = vld [vmem:[%s6709_s1 + $0x648] ss:$16 sps:$4 sm:$0xff]  }
  0xe2   : > { %v260_v24 = vld [vmem:[%s5589_s25 + $0xf0] sm:$0xff] }
  0xe4   : > { %2350 = vmatpush1.bf16.msra.mxu0 %v5186_v47  ;;  %2962 = vmatpush1.bf16.msra.mxu1 %v5189_v48  ;;  %v283_v47 = vld [vmem:[%s5589_s25 + $0x1a8] sm:$0xff] }
  0xe5   : > { %2351 = vmatprep.subr.bf16.mxu0 %v5194_v49  ;;  %2963 = vmatprep.subr.bf16.mxu1 %v5197_v50  ;;  %v291_v48 = vld [vmem:[%s5589_s25 + $0x1e8] sm:$0xff]  ;;  %v5222_v49 = vld [vmem:[%s6709_s1 + $0x660] ss:$16 sps:$4 sm:$0xff]  }
  0xe6   : > { %2273 = vmatmul.mubr.bf16.gmra.mrb[28].mxu0 %v480_v51  ;;  %2885 = vmatmul.mubr.bf16.gmra.mrb[28].mxu1 %v480_v51  ;;  %v5225_v50 = vld [vmem:[%s6709_s1 + $0x668] ss:$16 sps:$4 sm:$0xff]   ;;  %v5230_v51 = vld [vmem:[%s6709_s1 + $0x684] ss:$16 sps:$4 sm:$0xff]  }
  0xe7   : > { %2282 = vmatprep.mubr.bf16.mxu0 %v489_v54  ;;  %2894 = vmatprep.mubr.bf16.mxu1 %v489_v54  ;;  %v451_v54 = vpack.c.bf16 %v291_v48, %v283_v47  ;;  %v363_v47 = vld [vmem:[%s5589_s25 + $0x428] sm:$0xff] }
  0xe8   : > { %2352 = vmatpush1.bf16.msra.mxu0 %v5192_v52  ;;  %2964 = vmatpush1.bf16.msra.mxu1 %v5195_v53  ;;  %v5233_v52 = vld [vmem:[%s6709_s1 + $0x68c] ss:$16 sps:$4 sm:$0xff]   ;;  %v442_v53 = vpack.c.bf16 %v274_v46, %v266_v45  ;;  %v346_v45 = vld [vmem:[%s5589_s25 + $0x3a0] sm:$0xff] }
  0xe9   : > { %2353 = vmatprep.subr.bf16.mxu0 %v5200_v55  ;;  %2965 = vmatprep.subr.bf16.mxu1 %v5203_v56  ;;  %v5228_v55 = vld [vmem:[%s6709_s1 + $0x680] ss:$16 sps:$4 sm:$0xff]   ;;  %v5231_v56 = vld [vmem:[%s6709_s1 + $0x688] ss:$16 sps:$4 sm:$0xff]  }
  0xea   : > { %v354_v46 = vld [vmem:[%s5589_s25 + $0x3e0] sm:$0xff]  ;;  %v371_v48 = vld [vmem:[%s5589_s25 + $0x468] sm:$0xff] }
  0xec   : > { %2354 = vmatpush1.bf16.msra.mxu0 %v5198_v61  ;;  %2966 = vmatpush1.bf16.msra.mxu1 %v5201_v62  ;;  %v299_v61 = vld [vmem:[%s5589_s25 + $0x228] sm:$0xff] }
  0xed   : > { %2476 = vmatprep.subr.bf16.mxu0 %v5206_v63  ;;  %3088 = vmatprep.subr.bf16.mxu1 %v5209_v0  ;;  %v307_v62 = vld [vmem:[%s5589_s25 + $0x268] sm:$0xff]  ;;  %v5234_v63 = vld [vmem:[%s6709_s1 + $0x6a0] ss:$16 sps:$4 sm:$0xff]  }
  0xee   : > { %2283 = vmatmul.mubr.bf16.gmra.mrb[32].mxu0 %v488_v1  ;;  %2895 = vmatmul.mubr.bf16.gmra.mrb[32].mxu1 %v488_v1  ;;  %v5237_v0 = vld [vmem:[%s6709_s1 + $0x6a8] ss:$16 sps:$4 sm:$0xff]   ;;  %v5242_v1 = vld [vmem:[%s6709_s1 + $0x6c4] ss:$16 sps:$4 sm:$0xff]   ;;  %v459_v4 = vpack.c.bf16 %v307_v62, %v299_v61 }
  0xef   : > { %2292 = vmatprep.mubr.bf16.mxu0 %v497_v2  ;;  %2904 = vmatprep.mubr.bf16.mxu1 %v497_v2  ;;  %v5245_v2 = vld [vmem:[%s6709_s1 + $0x6cc] ss:$16 sps:$4 sm:$0xff]  }
  0xf0   : > { %v395_v61 = vld [vmem:[%s5589_s25 + $0x528] sm:$0xff] }
  0xf1   : > { %v403_v62 = vld [vmem:[%s5589_s25 + $0x568] sm:$0xff] }
  0xf6   : > { %2293 = vmatmul.mubr.bf16.gmra.mrb[36].mxu0 %v496_v7  ;;  %2905 = vmatmul.mubr.bf16.gmra.mrb[36].mxu1 %v496_v7  ;;  %v5248_v7 = vld [vmem:[%s6709_s1 + $0x6e4] ss:$16 sps:$4 sm:$0xff]  }
  0xf7   : > { %2302 = vmatprep.mubr.bf16.mxu0 %v505_v8  ;;  %2914 = vmatprep.mubr.bf16.mxu1 %v505_v8  ;;  %v5251_v8 = vld [vmem:[%s6709_s1 + $0x6ec] ss:$16 sps:$4 sm:$0xff]  }
  0xfe   : > { %2303 = vmatmul.mubr.bf16.gmra.mrb[40].mxu0 %v504_v13  ;;  %2915 = vmatmul.mubr.bf16.gmra.mrb[40].mxu1 %v504_v13  ;;  %v5246_v13 = vld [vmem:[%s6709_s1 + $0x6e0] ss:$16 sps:$4 sm:$0xff]  }
  0xff   : > { %2312 = vmatprep.mubr.bf16.mxu0 %v513_v14  ;;  %2924 = vmatprep.mubr.bf16.mxu1 %v513_v14  ;;  %v5249_v14 = vld [vmem:[%s6709_s1 + $0x6e8] ss:$16 sps:$4 sm:$0xff]  }
 0x106   : > { %2313 = vmatmul.mubr.bf16.gmra.mrb[44].mxu0 %v512_v19  ;;  %2925 = vmatmul.mubr.bf16.gmra.mrb[44].mxu1 %v512_v19  ;;  %v5252_v19 = vld [vmem:[%s6709_s1 + $0x700] ss:$16 sps:$4 sm:$0xff]  }
 0x107   : > { %2355 = vmatprep.mubr.bf16.mxu0 %v427_v20  ;;  %2967 = vmatprep.mubr.bf16.mxu1 %v427_v20  ;;  %v5255_v20 = vld [vmem:[%s6709_s1 + $0x708] ss:$16 sps:$4 sm:$0xff]  }
 0x10e   : > { %2356 = vmatmul.mubr.bf16.vlgmr.msra.gmra.mrb[0].mxu0 %v426_v25  ;;  %2968 = vmatmul.mubr.bf16.vlgmr.msra.gmra.mrb[0].mxu1 %v426_v25  ;;  %v331_v25 = vld [vmem:[%s5589_s25 + $0x328] sm:$0xff] }
 0x10f   : > { %2477 = vmatpush1.bf16.msra.mxu0 %v5204_v26  ;;  %3089 = vmatpush1.bf16.msra.mxu1 %v5207_v27  ;;  %v339_v26 = vld [vmem:[%s5589_s25 + $0x368] sm:$0xff]  ;;  %v5258_v27 = vld [vmem:[%s6709_s1 + $0x720] ss:$16 sps:$4 sm:$0xff]  }
 0x110   : > { %2365 = vmatprep.mubr.bf16.mxu0 %v435_v28  ;;  %2977 = vmatprep.mubr.bf16.mxu1 %v435_v28  ;;  %v5261_v28 = vld [vmem:[%s6709_s1 + $0x728] ss:$16 sps:$4 sm:$0xff]   ;;  %v475_v32 = vpack.c.bf16 %v339_v26, %v331_v25 }
 0x111   : > { %2478 = vmatprep.subr.bf16.mxu0 %v5212_v29  ;;  %3090 = vmatprep.subr.bf16.mxu1 %v5215_v30  ;;  %v5266_v29 = vld [vmem:[%s6709_s1 + $0x744] ss:$16 sps:$4 sm:$0xff]   ;;  %v5269_v30 = vld [vmem:[%s6709_s1 + $0x74c] ss:$16 sps:$4 sm:$0xff]  }
 0x112   : > { %v269_v25 = vld [vmem:[%s5589_s25 + $0x138] sm:$0xff] }
 0x113   : > { %2479 = vmatpush1.bf16.msra.mxu0 %v5210_v33  ;;  %3091 = vmatpush1.bf16.msra.mxu1 %v5213_v34  ;;  %v5264_v33 = vld [vmem:[%s6709_s1 + $0x740] ss:$16 sps:$4 sm:$0xff]   ;;  %v5267_v34 = vld [vmem:[%s6709_s1 + $0x748] ss:$16 sps:$4 sm:$0xff]  }
 0x114   : > { %2480 = vmatprep.subr.bf16.mxu0 %v5218_v37  ;;  %3092 = vmatprep.subr.bf16.mxu1 %v5221_v38  ;;  %v330_v37 = vld [vmem:[%s5589_s25 + $0x320] sm:$0xff]  ;;  %v277_v26 = vld [vmem:[%s5589_s25 + $0x178] sm:$0xff] }
 0x115   : > { %v338_v38 = vld [vmem:[%s5589_s25 + $0x360] sm:$0xff] }
 0x116   : > { %2366 = vmatmul.mubr.bf16.gmra.mrb[4].mxu0 %v434_v39  ;;  %2978 = vmatmul.mubr.bf16.gmra.mrb[4].mxu1 %v434_v39  ;;  %v347_v39 = vld [vmem:[%s5589_s25 + $0x3a8] sm:$0xff] }
 0x117   : > { %2375 = vmatprep.mubr.bf16.mxu0 %v443_v40  ;;  %2987 = vmatprep.mubr.bf16.mxu1 %v443_v40  ;;  %v355_v40 = vld [vmem:[%s5589_s25 + $0x3e8] sm:$0xff] }
 0x118   : > { %2481 = vmatpush1.bf16.msra.mxu0 %v5216_v41  ;;  %3093 = vmatpush1.bf16.msra.mxu1 %v5219_v42  ;;  %v5270_v41 = vld [vmem:[%s6709_s1 + $0x760] ss:$16 sps:$4 sm:$0xff]   ;;  %v5273_v42 = vld [vmem:[%s6709_s1 + $0x768] ss:$16 sps:$4 sm:$0xff]  }
 0x119   : > { %2482 = vmatprep.subr.bf16.mxu0 %v5224_v43  ;;  %3094 = vmatprep.subr.bf16.mxu1 %v5227_v44  ;;  %v474_v43 = vpack.c.bf16 %v338_v38, %v330_v37  ;;  %v483_v44 = vpack.c.bf16 %v355_v40, %v347_v39  ;;  %v268_v37 = vld [vmem:[%s5589_s25 + $0x130] sm:$0xff]  ;;  %v285_v39 = vld [vmem:[%s5589_s25 + $0x1b8] sm:$0xff] }
 0x11a   : > { %v276_v38 = vld [vmem:[%s5589_s25 + $0x170] sm:$0xff]  ;;  %v293_v40 = vld [vmem:[%s5589_s25 + $0x1f8] sm:$0xff] }
 0x11c   : > { %2483 = vmatpush1.bf16.msra.mxu0 %v5222_v49  ;;  %3095 = vmatpush1.bf16.msra.mxu1 %v5225_v50  ;;  %v482_v49 = vpack.c.bf16 %v354_v46, %v346_v45  ;;  %v491_v50 = vpack.c.bf16 %v371_v48, %v363_v47  ;;  %v444_v45 = vpack.c.bf16 %v276_v38, %v268_v37  ;;  %v5293_v47 = vld [vmem:[%s6711_s3 + $0x20] sm:$0xff]   ;;  %v404_v37 = vld [vmem:[%s5589_s25 + $0x570] sm:$0xff]  ;;  %v413_v38 = vld [vmem:[%s5589_s25 + $0x5b8] sm:$0xff] }
 0x11d   : > { %2484 = vmatprep.subr.bf16.mxu0 %v5230_v51  ;;  %3096 = vmatprep.subr.bf16.mxu1 %v5233_v52  ;;  %v5276_v51 = vld [vmem:[%s6711_s3 + $0x40] sm:$0xff]   ;;  %v453_v46 = vpack.c.bf16 %v293_v40, %v285_v39  ;;  %v421_v39 = vld [vmem:[%s5589_s25 + $0x5f8] sm:$0xff] }
 0x11e   : > { %2376 = vmatmul.mubr.bf16.gmra.mrb[8].mxu0 %v442_v53  ;;  %2988 = vmatmul.mubr.bf16.gmra.mrb[8].mxu1 %v442_v53  ;;  %v5278_v52 = vld [vmem:[%s6711_s3 + $0xc0] sm:$0xff]  }
 0x11f   : > { %2385 = vmatprep.mubr.bf16.mxu0 %v451_v54  ;;  %2997 = vmatprep.mubr.bf16.mxu1 %v451_v54  ;;  %v362_v53 = vld [vmem:[%s5589_s25 + $0x420] sm:$0xff] }
 0x120   : > { %2485 = vmatpush1.bf16.msra.mxu0 %v5228_v55  ;;  %3097 = vmatpush1.bf16.msra.mxu1 %v5231_v56  ;;  %v370_v54 = vld [vmem:[%s5589_s25 + $0x460] sm:$0xff]  ;;  %v379_v55 = vld [vmem:[%s5589_s25 + $0x4a8] sm:$0xff] }
 0x121   : > { %2486 = vmatprep.subr.bf16.mxu0 %v5236_v57  ;;  %3098 = vmatprep.subr.bf16.mxu1 %v5239_v58  ;;  %v387_v56 = vld [vmem:[%s5589_s25 + $0x4e8] sm:$0xff]  ;;  %v490_v57 = vpack.c.bf16 %v370_v54, %v362_v53  ;;  %v5295_v48 = vld [vmem:[%s6711_s3 + $0xa0] sm:$0xff]   ;;  %v301_v53 = vld [vmem:[%s5589_s25 + $0x238] sm:$0xff] }
 0x122   : > { %v499_v58 = vpack.c.bf16 %v387_v56, %v379_v55  ;;  %v309_v54 = vld [vmem:[%s5589_s25 + $0x278] sm:$0xff]  ;;  %v5297_v55 = vld [vmem:[%s6711_s3 + $0x28] sm:$0xff]  }
 0x123   : > { %v5299_v56 = vld [vmem:[%s6711_s3 + $0xa8] sm:$0xff]  }
 0x124   : > { %2487 = vmatpush1.bf16.msra.mxu0 %v5234_v63  ;;  %3099 = vmatpush1.bf16.msra.mxu1 %v5237_v0  ;;  %v498_v63 = vpack.c.bf16 %v386_v60, %v378_v59  ;;  %v507_v0 = vpack.c.bf16 %v403_v62, %v395_v61  ;;  %v461_v60 = vpack.c.bf16 %v309_v54, %v301_v53  ;;  %v5301_v61 = vld [vmem:[%s6711_s3 + $0x30] sm:$0xff]  }
 0x125   : > { %2488 = vmatprep.subr.bf16.mxu0 %v5242_v1  ;;  %3100 = vmatprep.subr.bf16.mxu1 %v5245_v2  ;;  %v394_v1 = vld [vmem:[%s5589_s25 + $0x520] sm:$0xff]  ;;  %v5303_v62 = vld [vmem:[%s6711_s3 + $0xb0] sm:$0xff]  }
 0x126   : > { %2386 = vmatmul.mubr.bf16.gmra.mrb[12].mxu0 %v450_v3  ;;  %2998 = vmatmul.mubr.bf16.gmra.mrb[12].mxu1 %v450_v3  ;;  %v402_v2 = vld [vmem:[%s5589_s25 + $0x560] sm:$0xff]  ;;  %v411_v3 = vld [vmem:[%s5589_s25 + $0x5a8] sm:$0xff] }
 0x127   : > { %2395 = vmatprep.mubr.bf16.mxu0 %v459_v4  ;;  %3007 = vmatprep.mubr.bf16.mxu1 %v459_v4  ;;  %v419_v4 = vld [vmem:[%s5589_s25 + $0x5e8] sm:$0xff] }
 0x128   : > { %2489 = vmatpush1.bf16.msra.mxu0 %v5240_v5  ;;  %3101 = vmatpush1.bf16.msra.mxu1 %v5243_v6  ;;  %v506_v5 = vpack.c.bf16 %v402_v2, %v394_v1  ;;  %v515_v6 = vpack.c.bf16 %v419_v4, %v411_v3  ;;  %v308_v1 = vld [vmem:[%s5589_s25 + $0x270] sm:$0xff]  ;;  %v317_v2 = vld [vmem:[%s5589_s25 + $0x2b8] sm:$0xff] }
 0x129   : > { %2490 = vmatprep.subr.bf16.mxu0 %v5248_v7  ;;  %3102 = vmatprep.subr.bf16.mxu1 %v5251_v8  ;;  %v410_v7 = vld [vmem:[%s5589_s25 + $0x5a0] sm:$0xff]  ;;  %v325_v3 = vld [vmem:[%s5589_s25 + $0x2f8] sm:$0xff] }
 0x12a   : > { %v418_v8 = vld [vmem:[%s5589_s25 + $0x5e0] sm:$0xff] }
 0x12b   : > { %v514_v11 = vpack.c.bf16 %v418_v8, %v410_v7  ;;  %v324_v7 = vld [vmem:[%s5589_s25 + $0x2f0] sm:$0xff]  ;;  %v333_v8 = vld [vmem:[%s5589_s25 + $0x338] sm:$0xff] }
 0x12c   : > { %2491 = vmatpush1.bf16.msra.mxu0 %v5246_v13  ;;  %3103 = vmatpush1.bf16.msra.mxu1 %v5249_v14  ;;  %v236_v13 = vld [vmem:[%s5589_s25 + $0x30] sm:$0xff] }
 0x12d   : > { %2492 = vmatprep.subr.bf16.mxu0 %v5254_v15  ;;  %3104 = vmatprep.subr.bf16.mxu1 %v5257_v16  ;;  %v244_v14 = vld [vmem:[%s5589_s25 + $0x70] sm:$0xff]  ;;  %v253_v15 = vld [vmem:[%s5589_s25 + $0xb8] sm:$0xff] }
 0x12e   : > { %2396 = vmatmul.mubr.bf16.gmra.mrb[16].mxu0 %v458_v17  ;;  %3008 = vmatmul.mubr.bf16.gmra.mrb[16].mxu1 %v458_v17  ;;  %v261_v16 = vld [vmem:[%s5589_s25 + $0xf8] sm:$0xff]  ;;  %v428_v17 = vpack.c.bf16 %v244_v14, %v236_v13  ;;  %v340_v13 = vld [vmem:[%s5589_s25 + $0x370] sm:$0xff] }
 0x12f   : > { %2405 = vmatprep.mubr.bf16.mxu0 %v467_v18  ;;  %3017 = vmatprep.mubr.bf16.mxu1 %v467_v18  ;;  %v437_v18 = vpack.c.bf16 %v261_v16, %v253_v15  ;;  %v349_v14 = vld [vmem:[%s5589_s25 + $0x3b8] sm:$0xff] }
 0x130   : > { %2493 = vmatpush1.bf16.msra.mxu0 %v5252_v19  ;;  %3105 = vmatpush1.bf16.msra.mxu1 %v5255_v20  ;;  %v5277_v19 = vld [vmem:[%s6711_s3] sm:$0xff]   ;;  %v357_v15 = vld [vmem:[%s5589_s25 + $0x3f8] sm:$0xff] }
 0x131   : > { %2494 = vmatprep.subr.bf16.mxu0 %v5260_v21  ;;  %3106 = vmatprep.subr.bf16.mxu1 %v5263_v22  ;;  %v5279_v20 = vld [vmem:[%s6711_s3 + $0x80] sm:$0xff]   ;;  %v5280_v21 = vld [vmem:[%s6711_s3 + $0x48] sm:$0xff]  }
 0x132   : > { %v5282_v22 = vld [vmem:[%s6711_s3 + $0xc8] sm:$0xff]  }
 0x134   : > { %2495 = vmatpush1.bf16.msra.mxu0 %v5258_v27  ;;  %3107 = vmatpush1.bf16.msra.mxu1 %v5261_v28  ;;  %v5281_v27 = vld [vmem:[%s6711_s3 + $0x8] sm:$0xff]  }
 0x135   : > { %2496 = vmatprep.subr.bf16.mxu0 %v5266_v29  ;;  %3108 = vmatprep.subr.bf16.mxu1 %v5269_v30  ;;  %v5283_v28 = vld [vmem:[%s6711_s3 + $0x88] sm:$0xff]   ;;  %v5284_v29 = vld [vmem:[%s6711_s3 + $0x50] sm:$0xff]  }
 0x136   : > { %2406 = vmatmul.mubr.bf16.gmra.mrb[20].mxu0 %v466_v31  ;;  %3018 = vmatmul.mubr.bf16.gmra.mrb[20].mxu1 %v466_v31  ;;  %v5286_v30 = vld [vmem:[%s6711_s3 + $0xd0] sm:$0xff]   ;;  %v436_v31 = vpack.c.bf16 %v260_v24, %v252_v23 }
 0x137   : > { %2415 = vmatprep.mubr.bf16.mxu0 %v475_v32  ;;  %3027 = vmatprep.mubr.bf16.mxu1 %v475_v32  ;;  %v445_v32 = vpack.c.bf16 %v277_v26, %v269_v25  ;;  %v364_v24 = vld [vmem:[%s5589_s25 + $0x430] sm:$0xff]  ;;  %v381_v26 = vld [vmem:[%s5589_s25 + $0x4b8] sm:$0xff] }
 0x138   : > { %2497 = vmatpush1.bf16.msra.mxu0 %v5264_v33  ;;  %3109 = vmatpush1.bf16.msra.mxu1 %v5267_v34  ;;  %v5285_v33 = vld [vmem:[%s6711_s3 + $0x10] sm:$0xff]  }
 0x139   : > { %2498 = vmatprep.subr.bf16.mxu0 %v5272_v35  ;;  %3110 = vmatprep.subr.bf16.mxu1 %v5275_v36  ;;  %v5287_v34 = vld [vmem:[%s6711_s3 + $0x90] sm:$0xff]   ;;  %v5288_v35 = vld [vmem:[%s6711_s3 + $0x58] sm:$0xff]  }
 0x13a   : > { %v5290_v36 = vld [vmem:[%s6711_s3 + $0xd8] sm:$0xff]   ;;  %v372_v25 = vld [vmem:[%s5589_s25 + $0x470] sm:$0xff] }
 0x13c   : > { %2499 = vmatpush1.bf16.msra.mxu0 %v5270_v41  ;;  %3111 = vmatpush1.bf16.msra.mxu1 %v5273_v42  ;;  %v5289_v41 = vld [vmem:[%s6711_s3 + $0x18] sm:$0xff]  }
 0x13d   : > { %4314 = vmatprep.subr.bf16.mxu0 %v5276_v51  ;;  %4402 = vmatprep.subr.bf16.mxu1 %v5278_v52  ;;  %v5291_v42 = vld [vmem:[%s6711_s3 + $0x98] sm:$0xff]   ;;  %v284_v51 = vld [vmem:[%s5589_s25 + $0x1b0] sm:$0xff] }
 0x13e   : > { %2416 = vmatmul.mubr.bf16.gmra.mrb[24].mxu0 %v474_v43  ;;  %3028 = vmatmul.mubr.bf16.gmra.mrb[24].mxu1 %v474_v43  ;;  %v5292_v43 = vld [vmem:[%s6711_s3 + $0x60] sm:$0xff]   ;;  %v292_v52 = vld [vmem:[%s5589_s25 + $0x1f0] sm:$0xff] }
 0x13f   : > { %2425 = vmatprep.mubr.bf16.mxu0 %v483_v44  ;;  %3037 = vmatprep.mubr.bf16.mxu1 %v483_v44  ;;  %v5294_v44 = vld [vmem:[%s6711_s3 + $0xe0] sm:$0xff]   ;;  %v452_v59 = vpack.c.bf16 %v292_v52, %v284_v51 }
 0x140   : > { %v758_v52 = vld [vmem:[%s6710_s2] sm:$0xf] }
 0x146   : > { %2426 = vmatmul.mubr.bf16.gmra.mrb[28].mxu0 %v482_v49  ;;  %3038 = vmatmul.mubr.bf16.gmra.mrb[28].mxu1 %v482_v49  ;;  %v5296_v49 = vld [vmem:[%s6711_s3 + $0x68] sm:$0xff]  }
 0x147   : > { %2435 = vmatprep.mubr.bf16.mxu0 %v491_v50  ;;  %3047 = vmatprep.mubr.bf16.mxu1 %v491_v50  ;;  %v5298_v50 = vld [vmem:[%s6711_s3 + $0xe8] sm:$0xff]  }
 0x14e   : > { %2436 = vmatmul.mubr.bf16.gmra.mrb[32].mxu0 %v490_v57  ;;  %3048 = vmatmul.mubr.bf16.gmra.mrb[32].mxu1 %v490_v57  ;;  %v5300_v57 = vld [vmem:[%s6711_s3 + $0x70] sm:$0xff]  }
 0x14f   : > { %2445 = vmatprep.mubr.bf16.mxu0 %v499_v58  ;;  %3057 = vmatprep.mubr.bf16.mxu1 %v499_v58  ;;  %v5302_v58 = vld [vmem:[%s6711_s3 + $0xf0] sm:$0xff]  }
 0x156   : > { %2446 = vmatmul.mubr.bf16.gmra.mrb[36].mxu0 %v498_v63  ;;  %3058 = vmatmul.mubr.bf16.gmra.mrb[36].mxu1 %v498_v63  ;;  %v5304_v63 = vld [vmem:[%s6711_s3 + $0x78] sm:$0xff]  }
 0x157   : > { %2455 = vmatprep.mubr.bf16.mxu0 %v507_v0  ;;  %3067 = vmatprep.mubr.bf16.mxu1 %v507_v0  ;;  %v300_v0 = vld [vmem:[%s5589_s25 + $0x230] sm:$0xff] }
 0x158   : > { %v460_v4 = vpack.c.bf16 %v308_v1, %v300_v0 }
 0x15e   : > { %2456 = vmatmul.mubr.bf16.gmra.mrb[40].mxu0 %v506_v5  ;;  %3068 = vmatmul.mubr.bf16.gmra.mrb[40].mxu1 %v506_v5  ;;  %v469_v5 = vpack.c.bf16 %v325_v3, %v317_v2 }
 0x15f   : > { %2465 = vmatprep.mubr.bf16.mxu0 %v515_v6  ;;  %3077 = vmatprep.mubr.bf16.mxu1 %v515_v6  ;;  %v316_v6 = vld [vmem:[%s5589_s25 + $0x2b0] sm:$0xff] }
 0x160   : > { %v468_v10 = vpack.c.bf16 %v324_v7, %v316_v6 }
 0x166   : > { %2466 = vmatmul.mubr.bf16.gmra.mrb[44].mxu0 %v514_v11  ;;  %3078 = vmatmul.mubr.bf16.gmra.mrb[44].mxu1 %v514_v11  ;;  %v477_v11 = vpack.c.bf16 %v341_v9, %v333_v8 }
 0x167   : > { %4252 = vmatprep.mubr.msk.bf16.mxu0 %vm1980_vm0, %v429_v12  ;;  %4264 = vmatprep.mubr.msk.bf16.mxu1 %vm1980_vm0, %v429_v12  ;;  %v332_v12 = vld [vmem:[%s5589_s25 + $0x330] sm:$0xff] }
 0x168   : > { %v476_v16 = vpack.c.bf16 %v340_v13, %v332_v12 }
 0x16e   : > { %2509 = vmatmul.mubr.bf16.vlgmr.msra.gmra.mrb[0].mxu0 %v428_v17  ;;  %3121 = vmatmul.mubr.bf16.vlgmr.msra.gmra.mrb[0].mxu1 %v428_v17  ;;  %v485_v17 = vpack.c.bf16 %v357_v15, %v349_v14 }
 0x16f   : > { %4253 = vmatprep.mubr.msk.bf16.mxu0 %vm1980_vm0, %v437_v18  ;;  %4265 = vmatprep.mubr.msk.bf16.mxu1 %vm1980_vm0, %v437_v18  ;;  %v348_v18 = vld [vmem:[%s5589_s25 + $0x3b0] sm:$0xff] }
 0x170   : > { %4315 = vmatpush3.bf16.msra.mxu0 %v5277_v19  ;;  %4403 = vmatpush3.bf16.msra.mxu1 %v5279_v20  ;;  %v356_v19 = vld [vmem:[%s5589_s25 + $0x3f0] sm:$0xff]  ;;  %v365_v20 = vld [vmem:[%s5589_s25 + $0x438] sm:$0xff] }
 0x171   : > { %4316 = vmatprep.subr.bf16.mxu0 %v5280_v21  ;;  %4404 = vmatprep.subr.bf16.mxu1 %v5282_v22  ;;  %v373_v21 = vld [vmem:[%s5589_s25 + $0x478] sm:$0xff]  ;;  %v484_v22 = vpack.c.bf16 %v356_v19, %v348_v18 }
 0x172   : > { %v493_v23 = vpack.c.bf16 %v373_v21, %v365_v20 }
 0x174   : > { %4317 = vmatpush3.bf16.msra.mxu0 %v5281_v27  ;;  %4405 = vmatpush3.bf16.msra.mxu1 %v5283_v28  ;;  %v389_v27 = vld [vmem:[%s5589_s25 + $0x4f8] sm:$0xff]  ;;  %v492_v28 = vpack.c.bf16 %v372_v25, %v364_v24 }
 0x175   : > { %4318 = vmatprep.subr.bf16.mxu0 %v5284_v29  ;;  %4406 = vmatprep.subr.bf16.mxu1 %v5286_v30  ;;  %v501_v29 = vpack.c.bf16 %v389_v27, %v381_v26  ;;  %v380_v30 = vld [vmem:[%s5589_s25 + $0x4b0] sm:$0xff] }
 0x176   : > { %2519 = vmatmul.mubr.bf16.gmra.mrb[4].mxu0 %v436_v31  ;;  %3131 = vmatmul.mubr.bf16.gmra.mrb[4].mxu1 %v436_v31  ;;  %v388_v31 = vld [vmem:[%s5589_s25 + $0x4f0] sm:$0xff] }
 0x177   : > { %4254 = vmatprep.mubr.msk.bf16.mxu0 %vm1980_vm0, %v445_v32  ;;  %4266 = vmatprep.mubr.msk.bf16.mxu1 %vm1980_vm0, %v445_v32  ;;  %v397_v32 = vld [vmem:[%s5589_s25 + $0x538] sm:$0xff] }
 0x178   : > { %4319 = vmatpush3.bf16.msra.mxu0 %v5285_v33  ;;  %4407 = vmatpush3.bf16.msra.mxu1 %v5287_v34  ;;  %v405_v33 = vld [vmem:[%s5589_s25 + $0x578] sm:$0xff]  ;;  %v500_v34 = vpack.c.bf16 %v388_v31, %v380_v30 }
 0x179   : > { %4320 = vmatprep.subr.bf16.mxu0 %v5288_v35  ;;  %4408 = vmatprep.subr.bf16.mxu1 %v5290_v36  ;;  %v509_v35 = vpack.c.bf16 %v405_v33, %v397_v32  ;;  %v396_v36 = vld [vmem:[%s5589_s25 + $0x530] sm:$0xff] }
 0x17a   : > { %v508_v40 = vpack.c.bf16 %v404_v37, %v396_v36 }
 0x17c   : > { %4321 = vmatpush3.bf16.msra.mxu0 %v5289_v41  ;;  %4409 = vmatpush3.bf16.msra.mxu1 %v5291_v42  ;;  %v517_v41 = vpack.c.bf16 %v421_v39, %v413_v38  ;;  %v412_v42 = vld [vmem:[%s5589_s25 + $0x5b0] sm:$0xff] }
 0x17d   : > { %4322 = vmatprep.subr.bf16.mxu0 %v5292_v43  ;;  %4410 = vmatprep.subr.bf16.mxu1 %v5294_v44  ;;  %v420_v43 = vld [vmem:[%s5589_s25 + $0x5f0] sm:$0xff] }
 0x17e   : > { %2529 = vmatmul.mubr.bf16.gmra.mrb[8].mxu0 %v444_v45  ;;  %3141 = vmatmul.mubr.bf16.gmra.mrb[8].mxu1 %v444_v45  ;;  %v516_v44 = vpack.c.bf16 %v420_v43, %v412_v42  ;;  %v5305_v45 = vld [vmem:[%s6711_s3 + $0x38] sm:$0xff]  }
 0x17f   : > { %4255 = vmatprep.mubr.msk.bf16.mxu0 %vm1980_vm0, %v453_v46  ;;  %4267 = vmatprep.mubr.msk.bf16.mxu1 %vm1980_vm0, %v453_v46  ;;  %v5306_v46 = vld [vmem:[%s6711_s3 + $0xf8] sm:$0xff]  }
 0x180   : > { %4323 = vmatpush3.bf16.msra.mxu0 %v5293_v47  ;;  %4411 = vmatpush3.bf16.msra.mxu1 %v5295_v48  ;;  %v5307_v47 = vld [vmem:[%s6711_s3 + $0xb8] sm:$0xff]   ;;  %v760_v48 = vlaneseq }
 0x181   : > { %4324 = vmatprep.subr.bf16.mxu0 %v5296_v49  ;;  %4412 = vmatprep.subr.bf16.mxu1 %v5298_v50 }
 0x182   : > { %v761_v49 = vshrl.u32 %v760_v48, 7 }
 0x184   : > { %4325 = vmatpush3.bf16.msra.mxu0 %v5297_v55  ;;  %4413 = vmatpush3.bf16.msra.mxu1 %v5299_v56  ;;  %v762_v50 = vsub.s32 0, %v761_v49  ;;  %v770_v51 = vsub.s32 2, %v761_v49  ;;  %v766_v53 = vsub.s32 1, %v761_v49  ;;  %v774_v54 = vsub.s32 3, %v761_v49 }
 0x185   : > { %4326 = vmatprep.subr.bf16.mxu0 %v5300_v57  ;;  %4414 = vmatprep.subr.bf16.mxu1 %v5302_v58 }
 0x186   : > { %2539 = vmatmul.mubr.bf16.gmra.mrb[12].mxu0 %v452_v59  ;;  %3151 = vmatmul.mubr.bf16.gmra.mrb[12].mxu1 %v452_v59  ;;  %v6494_v55 = vrot.slane %v758_v52, %v762_v50  ;;  %v6496_v56 = vrot.slane %v758_v52, %v770_v51  ;;  %v6498_v57 = vrot.slane %v758_v52, %v766_v53 }
 0x187   : > { %4256 = vmatprep.mubr.msk.bf16.mxu0 %vm1980_vm0, %v461_v60  ;;  %4268 = vmatprep.mubr.msk.bf16.mxu1 %vm1980_vm0, %v461_v60  ;;  %v6500_v58 = vrot.slane %v758_v52, %v774_v54 }
 0x188   : > { %4327 = vmatpush3.bf16.msra.mxu0 %v5301_v61  ;;  %4415 = vmatpush3.bf16.msra.mxu1 %v5303_v62 }
 0x189   : > { %4328 = vmatprep.subr.bf16.mxu0 %v5304_v63  ;;  %4416 = vmatprep.subr.bf16.mxu1 %v5306_v46 }
 0x18c   : > { %4329 = vmatpush3.bf16.msra.mxu0 %v5305_v45  ;;  %4417 = vmatpush3.bf16.msra.mxu1 %v5307_v47 }
 0x18e   : > { %2549 = vmatmul.mubr.bf16.gmra.mrb[16].mxu0 %v460_v4  ;;  %3161 = vmatmul.mubr.bf16.gmra.mrb[16].mxu1 %v460_v4 }
 0x18f   : > { %4257 = vmatprep.mubr.msk.bf16.mxu0 %vm1980_vm0, %v469_v5  ;;  %4269 = vmatprep.mubr.msk.bf16.mxu1 %vm1980_vm0, %v469_v5 }
 0x196   : > { %2559 = vmatmul.mubr.bf16.gmra.mrb[20].mxu0 %v468_v10  ;;  %3171 = vmatmul.mubr.bf16.gmra.mrb[20].mxu1 %v468_v10 }
 0x197   : > { %4258 = vmatprep.mubr.msk.bf16.mxu0 %vm1980_vm0, %v477_v11  ;;  %4270 = vmatprep.mubr.msk.bf16.mxu1 %vm1980_vm0, %v477_v11 }
 0x19e   : > { %2569 = vmatmul.mubr.bf16.gmra.mrb[24].mxu0 %v476_v16  ;;  %3181 = vmatmul.mubr.bf16.gmra.mrb[24].mxu1 %v476_v16 }
 0x19f   : > { %4259 = vmatprep.mubr.msk.bf16.mxu0 %vm1980_vm0, %v485_v17  ;;  %4271 = vmatprep.mubr.msk.bf16.mxu1 %vm1980_vm0, %v485_v17 }
 0x1a6   : > { %2579 = vmatmul.mubr.bf16.gmra.mrb[28].mxu0 %v484_v22  ;;  %3191 = vmatmul.mubr.bf16.gmra.mrb[28].mxu1 %v484_v22 }
 0x1a7   : > { %4260 = vmatprep.mubr.msk.bf16.mxu0 %vm1980_vm0, %v493_v23  ;;  %4272 = vmatprep.mubr.msk.bf16.mxu1 %vm1980_vm0, %v493_v23 }
 0x1ae   : > { %2589 = vmatmul.mubr.bf16.gmra.mrb[32].mxu0 %v492_v28  ;;  %3201 = vmatmul.mubr.bf16.gmra.mrb[32].mxu1 %v492_v28 }
 0x1af   : > { %4261 = vmatprep.mubr.msk.bf16.mxu0 %vm1980_vm0, %v501_v29  ;;  %4273 = vmatprep.mubr.msk.bf16.mxu1 %vm1980_vm0, %v501_v29 }
 0x1b6   : > { %2599 = vmatmul.mubr.bf16.gmra.mrb[36].mxu0 %v500_v34  ;;  %3211 = vmatmul.mubr.bf16.gmra.mrb[36].mxu1 %v500_v34 }
 0x1b7   : > { %4262 = vmatprep.mubr.msk.bf16.mxu0 %vm1980_vm0, %v509_v35  ;;  %4274 = vmatprep.mubr.msk.bf16.mxu1 %vm1980_vm0, %v509_v35 }
 0x1be   : > { %2609 = vmatmul.mubr.bf16.gmra.mrb[40].mxu0 %v508_v40  ;;  %3221 = vmatmul.mubr.bf16.gmra.mrb[40].mxu1 %v508_v40 }
 0x1bf   : > { %4263 = vmatprep.mubr.msk.bf16.mxu0 %vm1980_vm0, %v517_v41  ;;  %4275 = vmatprep.mubr.msk.bf16.mxu1 %vm1980_vm0, %v517_v41 }
 0x1c6   : > { %2619 = vmatmul.mubr.bf16.gmra.mrb[44].mxu0 %v516_v44  ;;  %3231 = vmatmul.mubr.bf16.gmra.mrb[44].mxu1 %v516_v44 }
 0x241   : > { %v2510_v59 = vpop.f32.mrb[0].mxu0  ;;  %v3122_v60 = vpop.f32.mrb[0].mxu1 }
 0x242   : > { %v4490_v61 = vadd.f32 %v2510_v59, %v6494_v55  ;;  %v4538_v62 = vadd.f32 %v3122_v60, %v6496_v56  ;;  %v2512_v63 = vpop.f32.mrb[1].mxu0  ;;  %v3124_v0 = vpop.f32.mrb[1].mxu1 }
 0x243   : > { %v4491_v1 = vadd.f32 %v2512_v63, %v6498_v57  ;;  %v4539_v2 = vadd.f32 %v3124_v0, %v6500_v58  ;;  %v2514_v3 = vpop.f32.mrb[2].mxu0  ;;  %v3126_v4 = vpop.f32.mrb[2].mxu1 }
 0x244   : > { %v4492_v5 = vadd.f32 %v2514_v3, %v6494_v55  ;;  %v4540_v6 = vadd.f32 %v3126_v4, %v6496_v56  ;;  %v2516_v7 = vpop.f32.mrb[3].mxu0  ;;  %v3128_v8 = vpop.f32.mrb[3].mxu1  ;;  %v3241_v11 = vmax.f32 %v4490_v61, 0.0  ;;  %v3243_v12 = vmax.f32 %v4538_v62, 0.0 }
 0x245   : > { %v4493_v9 = vadd.f32 %v2516_v7, %v6498_v57  ;;  %v4541_v10 = vadd.f32 %v3128_v8, %v6500_v58  ;;  %v3242_v15 = vmax.f32 %v4491_v1, 0.0  ;;  %v3244_v16 = vmax.f32 %v4539_v2, 0.0 }
 0x246   : > { %v3245_v13 = vmax.f32 %v4492_v5, 0.0  ;;  %v3247_v14 = vmax.f32 %v4540_v6, 0.0 }
 0x247   : > { %v3246_v17 = vmax.f32 %v4493_v9, 0.0  ;;  %v3248_v18 = vmax.f32 %v4541_v10, 0.0 }
 0x248   : > { %v3337_v19 = vpack.c.bf16 %v3245_v13, %v3241_v11  ;;  %v3339_v20 = vpack.c.bf16 %v3247_v14, %v3243_v12 }
 0x249   : > { %v3338_v21 = vpack.c.bf16 %v3246_v17, %v3242_v15  ;;  %v3340_v22 = vpack.c.bf16 %v3248_v18, %v3244_v16  ;;  %v2520_v23 = vpop.f32.mrb[4].mxu0  ;;  %v3132_v24 = vpop.f32.mrb[4].mxu1 }
 0x24a   : > { %v4494_v25 = vadd.f32 %v2520_v23, %v6494_v55  ;;  %v4542_v26 = vadd.f32 %v3132_v24, %v6496_v56  ;;  %v2522_v27 = vpop.f32.mrb[5].mxu0  ;;  %v3134_v28 = vpop.f32.mrb[5].mxu1 }
 0x24b   : > { %v4495_v29 = vadd.f32 %v2522_v27, %v6498_v57  ;;  %v4543_v30 = vadd.f32 %v3134_v28, %v6500_v58  ;;  %v2524_v31 = vpop.f32.mrb[6].mxu0  ;;  %v3136_v32 = vpop.f32.mrb[6].mxu1  ;;  %3680 = vmatprep.mubr.bf16.mxu0 %v3338_v21  ;;  %3809 = vmatprep.mubr.bf16.mxu1 %v3340_v22 }
 0x24c   : > { %v4496_v33 = vadd.f32 %v2524_v31, %v6494_v55  ;;  %v4544_v34 = vadd.f32 %v3136_v32, %v6496_v56  ;;  %v2526_v35 = vpop.f32.mrb[7].mxu0  ;;  %v3138_v36 = vpop.f32.mrb[7].mxu1  ;;  %3681 = vmatmul.mubr.bf16.vlgmr.msra.gmra.mrb[48].mxu0 %v3337_v19  ;;  %3810 = vmatmul.mubr.bf16.vlgmr.msra.gmra.mrb[48].mxu1 %v3339_v20  ;;  %v3249_v39 = vmax.f32 %v4494_v25, 0.0  ;;  %v3251_v40 = vmax.f32 %v4542_v26, 0.0 }
 0x24d   : > { %v4497_v37 = vadd.f32 %v2526_v35, %v6498_v57  ;;  %v4545_v38 = vadd.f32 %v3138_v36, %v6500_v58  ;;  %v3250_v43 = vmax.f32 %v4495_v29, 0.0  ;;  %v3252_v44 = vmax.f32 %v4543_v30, 0.0 }
 0x24e   : > { %v3253_v41 = vmax.f32 %v4496_v33, 0.0  ;;  %v3255_v42 = vmax.f32 %v4544_v34, 0.0 }
 0x24f   : > { %v3254_v45 = vmax.f32 %v4497_v37, 0.0  ;;  %v3256_v46 = vmax.f32 %v4545_v38, 0.0 }
 0x250   : > { %v3341_v47 = vpack.c.bf16 %v3253_v41, %v3249_v39  ;;  %v3343_v48 = vpack.c.bf16 %v3255_v42, %v3251_v40 }
 0x251   : > { %v3342_v49 = vpack.c.bf16 %v3254_v45, %v3250_v43  ;;  %v3344_v50 = vpack.c.bf16 %v3256_v46, %v3252_v44  ;;  %v2530_v51 = vpop.f32.mrb[8].mxu0  ;;  %v3142_v52 = vpop.f32.mrb[8].mxu1 }
 0x252   : > { %v4498_v53 = vadd.f32 %v2530_v51, %v6494_v55  ;;  %v4546_v54 = vadd.f32 %v3142_v52, %v6496_v56  ;;  %v2532_v59 = vpop.f32.mrb[9].mxu0  ;;  %v3144_v60 = vpop.f32.mrb[9].mxu1 }
 0x253   : > { %v4499_v61 = vadd.f32 %v2532_v59, %v6498_v57  ;;  %v4547_v62 = vadd.f32 %v3144_v60, %v6500_v58  ;;  %v2534_v63 = vpop.f32.mrb[10].mxu0  ;;  %v3146_v0 = vpop.f32.mrb[10].mxu1  ;;  %3688 = vmatprep.mubr.bf16.mxu0 %v3342_v49  ;;  %3817 = vmatprep.mubr.bf16.mxu1 %v3344_v50 }
 0x254   : > { %v4500_v1 = vadd.f32 %v2534_v63, %v6494_v55  ;;  %v4548_v2 = vadd.f32 %v3146_v0, %v6496_v56  ;;  %v2536_v3 = vpop.f32.mrb[11].mxu0  ;;  %v3148_v4 = vpop.f32.mrb[11].mxu1  ;;  %3689 = vmatmul.mubr.bf16.gmra.mrb[52].mxu0 %v3341_v47  ;;  %3818 = vmatmul.mubr.bf16.gmra.mrb[52].mxu1 %v3343_v48  ;;  %v3257_v7 = vmax.f32 %v4498_v53, 0.0  ;;  %v3259_v8 = vmax.f32 %v4546_v54, 0.0 }
 0x255   : > { %v4501_v5 = vadd.f32 %v2536_v3, %v6498_v57  ;;  %v4549_v6 = vadd.f32 %v3148_v4, %v6500_v58  ;;  %v3258_v11 = vmax.f32 %v4499_v61, 0.0  ;;  %v3260_v12 = vmax.f32 %v4547_v62, 0.0 }
 0x256   : > { %v3261_v9 = vmax.f32 %v4500_v1, 0.0  ;;  %v3263_v10 = vmax.f32 %v4548_v2, 0.0 }
 0x257   : > { %v3262_v13 = vmax.f32 %v4501_v5, 0.0  ;;  %v3264_v14 = vmax.f32 %v4549_v6, 0.0 }
 0x258   : > { %v3345_v15 = vpack.c.bf16 %v3261_v9, %v3257_v7  ;;  %v3347_v16 = vpack.c.bf16 %v3263_v10, %v3259_v8 }
 0x259   : > { %v3346_v17 = vpack.c.bf16 %v3262_v13, %v3258_v11  ;;  %v3348_v18 = vpack.c.bf16 %v3264_v14, %v3260_v12  ;;  %v2540_v19 = vpop.f32.mrb[12].mxu0  ;;  %v3152_v20 = vpop.f32.mrb[12].mxu1 }
 0x25a   : > { %v4502_v21 = vadd.f32 %v2540_v19, %v6494_v55  ;;  %v4550_v22 = vadd.f32 %v3152_v20, %v6496_v56  ;;  %v2542_v23 = vpop.f32.mrb[13].mxu0  ;;  %v3154_v24 = vpop.f32.mrb[13].mxu1 }
 0x25b   : > { %v4503_v25 = vadd.f32 %v2542_v23, %v6498_v57  ;;  %v4551_v26 = vadd.f32 %v3154_v24, %v6500_v58  ;;  %v2544_v27 = vpop.f32.mrb[14].mxu0  ;;  %v3156_v28 = vpop.f32.mrb[14].mxu1  ;;  %3696 = vmatprep.mubr.bf16.mxu0 %v3346_v17  ;;  %3825 = vmatprep.mubr.bf16.mxu1 %v3348_v18 }
 0x25c   : > { %v4504_v29 = vadd.f32 %v2544_v27, %v6494_v55  ;;  %v4552_v30 = vadd.f32 %v3156_v28, %v6496_v56  ;;  %v2546_v31 = vpop.f32.mrb[15].mxu0  ;;  %v3158_v32 = vpop.f32.mrb[15].mxu1  ;;  %3697 = vmatmul.mubr.bf16.gmra.mrb[56].mxu0 %v3345_v15  ;;  %3826 = vmatmul.mubr.bf16.gmra.mrb[56].mxu1 %v3347_v16  ;;  %v3265_v35 = vmax.f32 %v4502_v21, 0.0  ;;  %v3267_v36 = vmax.f32 %v4550_v22, 0.0 }
 0x25d   : > { %v4505_v33 = vadd.f32 %v2546_v31, %v6498_v57  ;;  %v4553_v34 = vadd.f32 %v3158_v32, %v6500_v58  ;;  %v3266_v39 = vmax.f32 %v4503_v25, 0.0  ;;  %v3268_v40 = vmax.f32 %v4551_v26, 0.0 }
 0x25e   : > { %v3269_v37 = vmax.f32 %v4504_v29, 0.0  ;;  %v3271_v38 = vmax.f32 %v4552_v30, 0.0 }
 0x25f   : > { %v3270_v41 = vmax.f32 %v4505_v33, 0.0  ;;  %v3272_v42 = vmax.f32 %v4553_v34, 0.0 }
 0x260   : > { %v3349_v43 = vpack.c.bf16 %v3269_v37, %v3265_v35  ;;  %v3351_v44 = vpack.c.bf16 %v3271_v38, %v3267_v36 }
 0x261   : > { %v3350_v45 = vpack.c.bf16 %v3270_v41, %v3266_v39  ;;  %v3352_v46 = vpack.c.bf16 %v3272_v42, %v3268_v40  ;;  %v2550_v47 = vpop.f32.mrb[16].mxu0  ;;  %v3162_v48 = vpop.f32.mrb[16].mxu1 }
 0x262   : > { %v4506_v49 = vadd.f32 %v2550_v47, %v6494_v55  ;;  %v4554_v50 = vadd.f32 %v3162_v48, %v6496_v56  ;;  %v2552_v51 = vpop.f32.mrb[17].mxu0  ;;  %v3164_v52 = vpop.f32.mrb[17].mxu1 }
 0x263   : > { %v4507_v53 = vadd.f32 %v2552_v51, %v6498_v57  ;;  %v4555_v54 = vadd.f32 %v3164_v52, %v6500_v58  ;;  %v2554_v59 = vpop.f32.mrb[18].mxu0  ;;  %v3166_v60 = vpop.f32.mrb[18].mxu1  ;;  %3704 = vmatprep.mubr.bf16.mxu0 %v3350_v45  ;;  %3833 = vmatprep.mubr.bf16.mxu1 %v3352_v46 }
 0x264   : > { %v4508_v61 = vadd.f32 %v2554_v59, %v6494_v55  ;;  %v4556_v62 = vadd.f32 %v3166_v60, %v6496_v56  ;;  %v2556_v63 = vpop.f32.mrb[19].mxu0  ;;  %v3168_v0 = vpop.f32.mrb[19].mxu1  ;;  %3705 = vmatmul.mubr.bf16.gmra.mrb[60].mxu0 %v3349_v43  ;;  %3834 = vmatmul.mubr.bf16.gmra.mrb[60].mxu1 %v3351_v44  ;;  %v3273_v3 = vmax.f32 %v4506_v49, 0.0  ;;  %v3275_v4 = vmax.f32 %v4554_v50, 0.0 }
 0x265   : > { %v4509_v1 = vadd.f32 %v2556_v63, %v6498_v57  ;;  %v4557_v2 = vadd.f32 %v3168_v0, %v6500_v58  ;;  %v3274_v7 = vmax.f32 %v4507_v53, 0.0  ;;  %v3276_v8 = vmax.f32 %v4555_v54, 0.0 }
 0x266   : > { %v3277_v5 = vmax.f32 %v4508_v61, 0.0  ;;  %v3279_v6 = vmax.f32 %v4556_v62, 0.0 }
 0x267   : > { %v3278_v9 = vmax.f32 %v4509_v1, 0.0  ;;  %v3280_v10 = vmax.f32 %v4557_v2, 0.0 }
 0x268   : > { %v3353_v11 = vpack.c.bf16 %v3277_v5, %v3273_v3  ;;  %v3355_v12 = vpack.c.bf16 %v3279_v6, %v3275_v4 }
 0x269   : > { %v3354_v13 = vpack.c.bf16 %v3278_v9, %v3274_v7  ;;  %v3356_v14 = vpack.c.bf16 %v3280_v10, %v3276_v8  ;;  %v2560_v15 = vpop.f32.mrb[20].mxu0  ;;  %v3172_v16 = vpop.f32.mrb[20].mxu1 }
 0x26a   : > { %v4510_v17 = vadd.f32 %v2560_v15, %v6494_v55  ;;  %v4558_v18 = vadd.f32 %v3172_v16, %v6496_v56  ;;  %v2562_v19 = vpop.f32.mrb[21].mxu0  ;;  %v3174_v20 = vpop.f32.mrb[21].mxu1 }
 0x26b   : > { %v4511_v21 = vadd.f32 %v2562_v19, %v6498_v57  ;;  %v4559_v22 = vadd.f32 %v3174_v20, %v6500_v58  ;;  %v2564_v23 = vpop.f32.mrb[22].mxu0  ;;  %v3176_v24 = vpop.f32.mrb[22].mxu1  ;;  %3712 = vmatprep.mubr.bf16.mxu0 %v3354_v13  ;;  %3841 = vmatprep.mubr.bf16.mxu1 %v3356_v14 }
 0x26c   : > { %v4512_v25 = vadd.f32 %v2564_v23, %v6494_v55  ;;  %v4560_v26 = vadd.f32 %v3176_v24, %v6496_v56  ;;  %v2566_v27 = vpop.f32.mrb[23].mxu0  ;;  %v3178_v28 = vpop.f32.mrb[23].mxu1  ;;  %3713 = vmatmul.mubr.bf16.gmra.mrb[64].mxu0 %v3353_v11  ;;  %3842 = vmatmul.mubr.bf16.gmra.mrb[64].mxu1 %v3355_v12  ;;  %v3281_v31 = vmax.f32 %v4510_v17, 0.0  ;;  %v3283_v32 = vmax.f32 %v4558_v18, 0.0 }
 0x26d   : > { %v4513_v29 = vadd.f32 %v2566_v27, %v6498_v57  ;;  %v4561_v30 = vadd.f32 %v3178_v28, %v6500_v58  ;;  %v3282_v35 = vmax.f32 %v4511_v21, 0.0  ;;  %v3284_v36 = vmax.f32 %v4559_v22, 0.0 }
 0x26e   : > { %v3285_v33 = vmax.f32 %v4512_v25, 0.0  ;;  %v3287_v34 = vmax.f32 %v4560_v26, 0.0 }
 0x26f   : > { %v3286_v37 = vmax.f32 %v4513_v29, 0.0  ;;  %v3288_v38 = vmax.f32 %v4561_v30, 0.0 }
 0x270   : > { %v3357_v39 = vpack.c.bf16 %v3285_v33, %v3281_v31  ;;  %v3359_v40 = vpack.c.bf16 %v3287_v34, %v3283_v32 }
 0x271   : > { %v3358_v41 = vpack.c.bf16 %v3286_v37, %v3282_v35  ;;  %v3360_v42 = vpack.c.bf16 %v3288_v38, %v3284_v36  ;;  %v2570_v43 = vpop.f32.mrb[24].mxu0  ;;  %v3182_v44 = vpop.f32.mrb[24].mxu1 }
 0x272   : > { %v4514_v45 = vadd.f32 %v2570_v43, %v6494_v55  ;;  %v4562_v46 = vadd.f32 %v3182_v44, %v6496_v56  ;;  %v2572_v47 = vpop.f32.mrb[25].mxu0  ;;  %v3184_v48 = vpop.f32.mrb[25].mxu1 }
 0x273   : > { %v4515_v49 = vadd.f32 %v2572_v47, %v6498_v57  ;;  %v4563_v50 = vadd.f32 %v3184_v48, %v6500_v58  ;;  %v2574_v51 = vpop.f32.mrb[26].mxu0  ;;  %v3186_v52 = vpop.f32.mrb[26].mxu1  ;;  %3720 = vmatprep.mubr.bf16.mxu0 %v3358_v41  ;;  %3849 = vmatprep.mubr.bf16.mxu1 %v3360_v42 }
 0x274   : > { %v4516_v53 = vadd.f32 %v2574_v51, %v6494_v55  ;;  %v4564_v54 = vadd.f32 %v3186_v52, %v6496_v56  ;;  %v2576_v59 = vpop.f32.mrb[27].mxu0  ;;  %v3188_v60 = vpop.f32.mrb[27].mxu1  ;;  %3721 = vmatmul.mubr.bf16.gmra.mrb[68].mxu0 %v3357_v39  ;;  %3850 = vmatmul.mubr.bf16.gmra.mrb[68].mxu1 %v3359_v40  ;;  %v3289_v63 = vmax.f32 %v4514_v45, 0.0  ;;  %v3291_v0 = vmax.f32 %v4562_v46, 0.0 }
 0x275   : > { %v4517_v61 = vadd.f32 %v2576_v59, %v6498_v57  ;;  %v4565_v62 = vadd.f32 %v3188_v60, %v6500_v58  ;;  %v3290_v3 = vmax.f32 %v4515_v49, 0.0  ;;  %v3292_v4 = vmax.f32 %v4563_v50, 0.0 }
 0x276   : > { %v3293_v1 = vmax.f32 %v4516_v53, 0.0  ;;  %v3295_v2 = vmax.f32 %v4564_v54, 0.0 }
 0x277   : > { %v3294_v5 = vmax.f32 %v4517_v61, 0.0  ;;  %v3296_v6 = vmax.f32 %v4565_v62, 0.0 }
 0x278   : > { %v3361_v7 = vpack.c.bf16 %v3293_v1, %v3289_v63  ;;  %v3363_v8 = vpack.c.bf16 %v3295_v2, %v3291_v0 }
 0x279   : > { %v3362_v9 = vpack.c.bf16 %v3294_v5, %v3290_v3  ;;  %v3364_v10 = vpack.c.bf16 %v3296_v6, %v3292_v4  ;;  %v2580_v11 = vpop.f32.mrb[28].mxu0  ;;  %v3192_v12 = vpop.f32.mrb[28].mxu1 }
 0x27a   : > { %v4518_v13 = vadd.f32 %v2580_v11, %v6494_v55  ;;  %v4566_v14 = vadd.f32 %v3192_v12, %v6496_v56  ;;  %v2582_v15 = vpop.f32.mrb[29].mxu0  ;;  %v3194_v16 = vpop.f32.mrb[29].mxu1 }
 0x27b   : > { %v4519_v17 = vadd.f32 %v2582_v15, %v6498_v57  ;;  %v4567_v18 = vadd.f32 %v3194_v16, %v6500_v58  ;;  %v2584_v19 = vpop.f32.mrb[30].mxu0  ;;  %v3196_v20 = vpop.f32.mrb[30].mxu1  ;;  %3728 = vmatprep.mubr.bf16.mxu0 %v3362_v9  ;;  %3857 = vmatprep.mubr.bf16.mxu1 %v3364_v10 }
 0x27c   : > { %v4520_v21 = vadd.f32 %v2584_v19, %v6494_v55  ;;  %v4568_v22 = vadd.f32 %v3196_v20, %v6496_v56  ;;  %v2586_v23 = vpop.f32.mrb[31].mxu0  ;;  %v3198_v24 = vpop.f32.mrb[31].mxu1  ;;  %3729 = vmatmul.mubr.bf16.gmra.mrb[72].mxu0 %v3361_v7  ;;  %3858 = vmatmul.mubr.bf16.gmra.mrb[72].mxu1 %v3363_v8  ;;  %v3297_v27 = vmax.f32 %v4518_v13, 0.0  ;;  %v3299_v28 = vmax.f32 %v4566_v14, 0.0 }
 0x27d   : > { %v4521_v25 = vadd.f32 %v2586_v23, %v6498_v57  ;;  %v4569_v26 = vadd.f32 %v3198_v24, %v6500_v58  ;;  %v3298_v31 = vmax.f32 %v4519_v17, 0.0  ;;  %v3300_v32 = vmax.f32 %v4567_v18, 0.0 }
 0x27e   : > { %v3301_v29 = vmax.f32 %v4520_v21, 0.0  ;;  %v3303_v30 = vmax.f32 %v4568_v22, 0.0 }
 0x27f   : > { %v3302_v33 = vmax.f32 %v4521_v25, 0.0  ;;  %v3304_v34 = vmax.f32 %v4569_v26, 0.0 }
 0x280   : > { %v3365_v35 = vpack.c.bf16 %v3301_v29, %v3297_v27  ;;  %v3367_v36 = vpack.c.bf16 %v3303_v30, %v3299_v28 }
 0x281   : > { %v3366_v37 = vpack.c.bf16 %v3302_v33, %v3298_v31  ;;  %v3368_v38 = vpack.c.bf16 %v3304_v34, %v3300_v32  ;;  %v2590_v39 = vpop.f32.mrb[32].mxu0  ;;  %v3202_v40 = vpop.f32.mrb[32].mxu1 }
 0x282   : > { %v4522_v41 = vadd.f32 %v2590_v39, %v6494_v55  ;;  %v4570_v42 = vadd.f32 %v3202_v40, %v6496_v56  ;;  %v2592_v43 = vpop.f32.mrb[33].mxu0  ;;  %v3204_v44 = vpop.f32.mrb[33].mxu1 }
 0x283   : > { %v4523_v45 = vadd.f32 %v2592_v43, %v6498_v57  ;;  %v4571_v46 = vadd.f32 %v3204_v44, %v6500_v58  ;;  %v2594_v47 = vpop.f32.mrb[34].mxu0  ;;  %v3206_v48 = vpop.f32.mrb[34].mxu1  ;;  %3736 = vmatprep.mubr.bf16.mxu0 %v3366_v37  ;;  %3865 = vmatprep.mubr.bf16.mxu1 %v3368_v38 }
 0x284   : > { %v4524_v49 = vadd.f32 %v2594_v47, %v6494_v55  ;;  %v4572_v50 = vadd.f32 %v3206_v48, %v6496_v56  ;;  %v2596_v51 = vpop.f32.mrb[35].mxu0  ;;  %v3208_v52 = vpop.f32.mrb[35].mxu1  ;;  %3737 = vmatmul.mubr.bf16.gmra.mrb[76].mxu0 %v3365_v35  ;;  %3866 = vmatmul.mubr.bf16.gmra.mrb[76].mxu1 %v3367_v36  ;;  %v3305_v59 = vmax.f32 %v4522_v41, 0.0  ;;  %v3307_v60 = vmax.f32 %v4570_v42, 0.0 }
 0x285   : > { %v4525_v53 = vadd.f32 %v2596_v51, %v6498_v57  ;;  %v4573_v54 = vadd.f32 %v3208_v52, %v6500_v58  ;;  %v3306_v63 = vmax.f32 %v4523_v45, 0.0  ;;  %v3308_v0 = vmax.f32 %v4571_v46, 0.0 }
 0x286   : > { %v3309_v61 = vmax.f32 %v4524_v49, 0.0  ;;  %v3311_v62 = vmax.f32 %v4572_v50, 0.0 }
 0x287   : > { %v3310_v1 = vmax.f32 %v4525_v53, 0.0  ;;  %v3312_v2 = vmax.f32 %v4573_v54, 0.0 }
 0x288   : > { %v3369_v3 = vpack.c.bf16 %v3309_v61, %v3305_v59  ;;  %v3371_v4 = vpack.c.bf16 %v3311_v62, %v3307_v60 }
 0x289   : > { %v3370_v5 = vpack.c.bf16 %v3310_v1, %v3306_v63  ;;  %v3372_v6 = vpack.c.bf16 %v3312_v2, %v3308_v0  ;;  %v2600_v7 = vpop.f32.mrb[36].mxu0  ;;  %v3212_v8 = vpop.f32.mrb[36].mxu1 }
 0x28a   : > { %v4526_v9 = vadd.f32 %v2600_v7, %v6494_v55  ;;  %v4574_v10 = vadd.f32 %v3212_v8, %v6496_v56  ;;  %v2602_v11 = vpop.f32.mrb[37].mxu0  ;;  %v3214_v12 = vpop.f32.mrb[37].mxu1 }
 0x28b   : > { %v4527_v13 = vadd.f32 %v2602_v11, %v6498_v57  ;;  %v4575_v14 = vadd.f32 %v3214_v12, %v6500_v58  ;;  %v2604_v15 = vpop.f32.mrb[38].mxu0  ;;  %v3216_v16 = vpop.f32.mrb[38].mxu1  ;;  %3744 = vmatprep.mubr.bf16.mxu0 %v3370_v5  ;;  %3873 = vmatprep.mubr.bf16.mxu1 %v3372_v6 }
 0x28c   : > { %v4528_v17 = vadd.f32 %v2604_v15, %v6494_v55  ;;  %v4576_v18 = vadd.f32 %v3216_v16, %v6496_v56  ;;  %v2606_v19 = vpop.f32.mrb[39].mxu0  ;;  %v3218_v20 = vpop.f32.mrb[39].mxu1  ;;  %3745 = vmatmul.mubr.bf16.gmra.mrb[80].mxu0 %v3369_v3  ;;  %3874 = vmatmul.mubr.bf16.gmra.mrb[80].mxu1 %v3371_v4  ;;  %v3313_v23 = vmax.f32 %v4526_v9, 0.0  ;;  %v3315_v24 = vmax.f32 %v4574_v10, 0.0 }
 0x28d   : > { %v4529_v21 = vadd.f32 %v2606_v19, %v6498_v57  ;;  %v4577_v22 = vadd.f32 %v3218_v20, %v6500_v58  ;;  %v3314_v27 = vmax.f32 %v4527_v13, 0.0  ;;  %v3316_v28 = vmax.f32 %v4575_v14, 0.0 }
 0x28e   : > { %v3317_v25 = vmax.f32 %v4528_v17, 0.0  ;;  %v3319_v26 = vmax.f32 %v4576_v18, 0.0 }
 0x28f   : > { %v3318_v29 = vmax.f32 %v4529_v21, 0.0  ;;  %v3320_v30 = vmax.f32 %v4577_v22, 0.0 }
 0x290   : > { %v3373_v31 = vpack.c.bf16 %v3317_v25, %v3313_v23  ;;  %v3375_v32 = vpack.c.bf16 %v3319_v26, %v3315_v24 }
 0x291   : > { %v3374_v33 = vpack.c.bf16 %v3318_v29, %v3314_v27  ;;  %v3376_v34 = vpack.c.bf16 %v3320_v30, %v3316_v28  ;;  %v2610_v35 = vpop.f32.mrb[40].mxu0  ;;  %v3222_v36 = vpop.f32.mrb[40].mxu1  ;;  %v6602_v29 = vld [vmem:[%s6712_s4] ss:$0 sm:$0xff] }
 0x292   : > { %v4530_v37 = vadd.f32 %v2610_v35, %v6494_v55  ;;  %v4578_v38 = vadd.f32 %v3222_v36, %v6496_v56  ;;  %v2612_v39 = vpop.f32.mrb[41].mxu0  ;;  %v3224_v40 = vpop.f32.mrb[41].mxu1 }
 0x293   : > { %v4531_v41 = vadd.f32 %v2612_v39, %v6498_v57  ;;  %v4579_v42 = vadd.f32 %v3224_v40, %v6500_v58  ;;  %v2614_v43 = vpop.f32.mrb[42].mxu0  ;;  %v3226_v44 = vpop.f32.mrb[42].mxu1  ;;  %3752 = vmatprep.mubr.bf16.mxu0 %v3374_v33  ;;  %3881 = vmatprep.mubr.bf16.mxu1 %v3376_v34 }
 0x294   : > { %v4532_v45 = vadd.f32 %v2614_v43, %v6494_v55  ;;  %v4580_v46 = vadd.f32 %v3226_v44, %v6496_v56  ;;  %v2616_v47 = vpop.f32.mrb[43].mxu0  ;;  %v3228_v48 = vpop.f32.mrb[43].mxu1  ;;  %3753 = vmatmul.mubr.bf16.gmra.mrb[84].mxu0 %v3373_v31  ;;  %3882 = vmatmul.mubr.bf16.gmra.mrb[84].mxu1 %v3375_v32  ;;  %v3321_v51 = vmax.f32 %v4530_v37, 0.0  ;;  %v3323_v52 = vmax.f32 %v4578_v38, 0.0 }
 0x295   : > { %v4533_v49 = vadd.f32 %v2616_v47, %v6498_v57  ;;  %v4581_v50 = vadd.f32 %v3228_v48, %v6500_v58  ;;  %v3322_v59 = vmax.f32 %v4531_v41, 0.0  ;;  %v3324_v60 = vmax.f32 %v4579_v42, 0.0 }
 0x296   : > { %v3325_v53 = vmax.f32 %v4532_v45, 0.0  ;;  %v3327_v54 = vmax.f32 %v4580_v46, 0.0 }
 0x297   : > { %v3326_v61 = vmax.f32 %v4533_v49, 0.0  ;;  %v3328_v62 = vmax.f32 %v4581_v50, 0.0 }
 0x298   : > { %v3377_v63 = vpack.c.bf16 %v3325_v53, %v3321_v51  ;;  %v3379_v0 = vpack.c.bf16 %v3327_v54, %v3323_v52 }
 0x299   : > { %v3378_v1 = vpack.c.bf16 %v3326_v61, %v3322_v59  ;;  %v3380_v2 = vpack.c.bf16 %v3328_v62, %v3324_v60  ;;  %v2620_v3 = vpop.f32.mrb[44].mxu0  ;;  %v3232_v4 = vpop.f32.mrb[44].mxu1 }
 0x29a   : > { %v4534_v5 = vadd.f32 %v2620_v3, %v6494_v55  ;;  %v4582_v6 = vadd.f32 %v3232_v4, %v6496_v56  ;;  %v2622_v7 = vpop.f32.mrb[45].mxu0  ;;  %v3234_v8 = vpop.f32.mrb[45].mxu1 }
 0x29b   : > { %v4535_v9 = vadd.f32 %v2622_v7, %v6498_v57  ;;  %v4583_v10 = vadd.f32 %v3234_v8, %v6500_v58  ;;  %v2624_v11 = vpop.f32.mrb[46].mxu0  ;;  %v3236_v12 = vpop.f32.mrb[46].mxu1  ;;  %3760 = vmatprep.mubr.bf16.mxu0 %v3378_v1  ;;  %3889 = vmatprep.mubr.bf16.mxu1 %v3380_v2 }
 0x29c   : > { %v4536_v13 = vadd.f32 %v2624_v11, %v6494_v55  ;;  %v4584_v14 = vadd.f32 %v3236_v12, %v6496_v56  ;;  %v2626_v15 = vpop.f32.mrb[47].mxu0  ;;  %v3238_v16 = vpop.f32.mrb[47].mxu1  ;;  %3761 = vmatmul.mubr.bf16.gmra.mrb[88].mxu0 %v3377_v63  ;;  %3890 = vmatmul.mubr.bf16.gmra.mrb[88].mxu1 %v3379_v0  ;;  %v3329_v19 = vmax.f32 %v4534_v5, 0.0  ;;  %v3331_v20 = vmax.f32 %v4582_v6, 0.0 }
 0x29d   : > { %v4537_v17 = vadd.f32 %v2626_v15, %v6498_v57  ;;  %v4585_v18 = vadd.f32 %v3238_v16, %v6500_v58  ;;  %v3330_v23 = vmax.f32 %v4535_v9, 0.0  ;;  %v3332_v24 = vmax.f32 %v4583_v10, 0.0 }
 0x29e   : > { %v3333_v21 = vmax.f32 %v4536_v13, 0.0  ;;  %v3335_v22 = vmax.f32 %v4584_v14, 0.0 }
 0x29f   : > { %v3334_v25 = vmax.f32 %v4537_v17, 0.0  ;;  %v3336_v55 = vmax.f32 %v4585_v18, 0.0 }
 0x2a0   : > { %v3381_v26 = vpack.c.bf16 %v3333_v21, %v3329_v19  ;;  %v3383_v56 = vpack.c.bf16 %v3335_v22, %v3331_v20 }
 0x2a1   : > { %v3382_v27 = vpack.c.bf16 %v3334_v25, %v3330_v23  ;;  %v3384_v28 = vpack.c.bf16 %v3336_v55, %v3332_v24 }
 0x2a3   : > { %3768 = vmatprep.mubr.bf16.mxu0 %v3382_v27  ;;  %3897 = vmatprep.mubr.bf16.mxu1 %v3384_v28 }
 0x2a4   : > { %3769 = vmatmul.mubr.bf16.gmra.mrb[92].mxu0 %v3381_v26  ;;  %3898 = vmatmul.mubr.bf16.gmra.mrb[92].mxu1 %v3383_v56 }
 0x31f   : > { %v4330_v57 = vpop.f32.mrb[48].mxu0  ;;  %v4418_v58 = vpop.f32.mrb[48].mxu1 }
 0x320   : > { %v4331_v30 = vpop.f32.mrb[49].mxu0  ;;  %v4419_v31 = vpop.f32.mrb[49].mxu1 }
 0x321   : > { %v4332_v32 = vadd.f32 %v4331_v30, %v4330_v57  ;;  %v4420_v33 = vadd.f32 %v4419_v31, %v4418_v58  ;;  %v4333_v34 = vpop.f32.mrb[50].mxu0  ;;  %v4421_v35 = vpop.f32.mrb[50].mxu1 }
 0x322   : > { %v4334_v36 = vpop.f32.mrb[51].mxu0  ;;  %v4422_v37 = vpop.f32.mrb[51].mxu1 }
 0x323   : > { %v3683_v38 = vadd.f32 %v4332_v32, %v6602_v29  ;;  %v4335_v39 = vadd.f32 %v4334_v36, %v4333_v34  ;;  %v4423_v40 = vadd.f32 %v4422_v37, %v4421_v35 }
 0x325   : > { %v3812_v41 = vadd.f32 %v4420_v33, %v3683_v38  ;;  %v3686_v42 = vadd.f32 %v4335_v39, %v6602_v29 }
 0x327   : > { %3906 = vst [vmem:[%s6608_s14] sm:$0xff] %v3812_v41  ;;  %v3815_v43 = vadd.f32 %v4423_v40, %v3686_v42  ;;  %v4336_v44 = vpop.f32.mrb[52].mxu0  ;;  %v4424_v45 = vpop.f32.mrb[52].mxu1 }
 0x328   : > { %v4337_v46 = vpop.f32.mrb[53].mxu0  ;;  %v4425_v47 = vpop.f32.mrb[53].mxu1 }
 0x329   : > { %3907 = vst [vmem:[%s6608_s14 + $0x8] sm:$0xff] %v3815_v43  ;;  %v4338_v48 = vadd.f32 %v4337_v46, %v4336_v44  ;;  %v4426_v49 = vadd.f32 %v4425_v47, %v4424_v45  ;;  %v4339_v50 = vpop.f32.mrb[54].mxu0  ;;  %v4427_v51 = vpop.f32.mrb[54].mxu1 }
 0x32a   : > { %v4340_v52 = vpop.f32.mrb[55].mxu0  ;;  %v4428_v53 = vpop.f32.mrb[55].mxu1 }
 0x32b   : > { %v3691_v54 = vadd.f32 %v4338_v48, %v6602_v29  ;;  %v4341_v59 = vadd.f32 %v4340_v52, %v4339_v50  ;;  %v4429_v60 = vadd.f32 %v4428_v53, %v4427_v51 }
 0x32d   : > { %v3820_v61 = vadd.f32 %v4426_v49, %v3691_v54  ;;  %v3694_v62 = vadd.f32 %v4341_v59, %v6602_v29 }
 0x32f   : > { %3908 = vst [vmem:[%s6608_s14 + $0x10] sm:$0xff] %v3820_v61  ;;  %v3823_v63 = vadd.f32 %v4429_v60, %v3694_v62  ;;  %v4342_v0 = vpop.f32.mrb[56].mxu0  ;;  %v4430_v1 = vpop.f32.mrb[56].mxu1 }
 0x330   : > { %v4343_v2 = vpop.f32.mrb[57].mxu0  ;;  %v4431_v3 = vpop.f32.mrb[57].mxu1 }
 0x331   : > { %3909 = vst [vmem:[%s6608_s14 + $0x18] sm:$0xff] %v3823_v63  ;;  %v4344_v4 = vadd.f32 %v4343_v2, %v4342_v0  ;;  %v4432_v5 = vadd.f32 %v4431_v3, %v4430_v1  ;;  %v4345_v6 = vpop.f32.mrb[58].mxu0  ;;  %v4433_v7 = vpop.f32.mrb[58].mxu1 }
 0x332   : > { %v4346_v8 = vpop.f32.mrb[59].mxu0  ;;  %v4434_v9 = vpop.f32.mrb[59].mxu1 }
 0x333   : > { %v3699_v10 = vadd.f32 %v4344_v4, %v6602_v29  ;;  %v4347_v11 = vadd.f32 %v4346_v8, %v4345_v6  ;;  %v4435_v12 = vadd.f32 %v4434_v9, %v4433_v7 }
 0x335   : > { %v3828_v13 = vadd.f32 %v4432_v5, %v3699_v10  ;;  %v3702_v14 = vadd.f32 %v4347_v11, %v6602_v29 }
 0x337   : > { %3910 = vst [vmem:[%s6608_s14 + $0x20] sm:$0xff] %v3828_v13  ;;  %v3831_v15 = vadd.f32 %v4435_v12, %v3702_v14  ;;  %v4348_v16 = vpop.f32.mrb[60].mxu0  ;;  %v4436_v17 = vpop.f32.mrb[60].mxu1 }
 0x338   : > { %v4349_v18 = vpop.f32.mrb[61].mxu0  ;;  %v4437_v19 = vpop.f32.mrb[61].mxu1 }
 0x339   : > { %3911 = vst [vmem:[%s6608_s14 + $0x28] sm:$0xff] %v3831_v15  ;;  %v4350_v20 = vadd.f32 %v4349_v18, %v4348_v16  ;;  %v4438_v21 = vadd.f32 %v4437_v19, %v4436_v17  ;;  %v4351_v22 = vpop.f32.mrb[62].mxu0  ;;  %v4439_v23 = vpop.f32.mrb[62].mxu1 }
 0x33a   : > { %v4352_v24 = vpop.f32.mrb[63].mxu0  ;;  %v4440_v25 = vpop.f32.mrb[63].mxu1 }
 0x33b   : > { %v3707_v55 = vadd.f32 %v4350_v20, %v6602_v29  ;;  %v4353_v26 = vadd.f32 %v4352_v24, %v4351_v22  ;;  %v4441_v56 = vadd.f32 %v4440_v25, %v4439_v23 }
 0x33d   : > { %v3836_v27 = vadd.f32 %v4438_v21, %v3707_v55  ;;  %v3710_v28 = vadd.f32 %v4353_v26, %v6602_v29 }
 0x33f   : > { %3912 = vst [vmem:[%s6608_s14 + $0x30] sm:$0xff] %v3836_v27  ;;  %v3839_v57 = vadd.f32 %v4441_v56, %v3710_v28  ;;  %v4354_v58 = vpop.f32.mrb[64].mxu0  ;;  %v4442_v30 = vpop.f32.mrb[64].mxu1 }
 0x340   : > { %v4355_v31 = vpop.f32.mrb[65].mxu0  ;;  %v4443_v32 = vpop.f32.mrb[65].mxu1 }
 0x341   : > { %3913 = vst [vmem:[%s6608_s14 + $0x38] sm:$0xff] %v3839_v57  ;;  %v4356_v33 = vadd.f32 %v4355_v31, %v4354_v58  ;;  %v4444_v34 = vadd.f32 %v4443_v32, %v4442_v30  ;;  %v4357_v35 = vpop.f32.mrb[66].mxu0  ;;  %v4445_v36 = vpop.f32.mrb[66].mxu1 }
 0x342   : > { %v4358_v37 = vpop.f32.mrb[67].mxu0  ;;  %v4446_v38 = vpop.f32.mrb[67].mxu1 }
 0x343   : > { %v3715_v39 = vadd.f32 %v4356_v33, %v6602_v29  ;;  %v4359_v40 = vadd.f32 %v4358_v37, %v4357_v35  ;;  %v4447_v41 = vadd.f32 %v4446_v38, %v4445_v36 }
 0x345   : > { %v3844_v42 = vadd.f32 %v4444_v34, %v3715_v39  ;;  %v3718_v43 = vadd.f32 %v4359_v40, %v6602_v29 }
 0x347   : > { %3914 = vst [vmem:[%s6608_s14 + $0x40] sm:$0xff] %v3844_v42  ;;  %v3847_v44 = vadd.f32 %v4447_v41, %v3718_v43  ;;  %v4360_v45 = vpop.f32.mrb[68].mxu0  ;;  %v4448_v46 = vpop.f32.mrb[68].mxu1 }
 0x348   : > { %v4361_v47 = vpop.f32.mrb[69].mxu0  ;;  %v4449_v48 = vpop.f32.mrb[69].mxu1 }
 0x349   : > { %3915 = vst [vmem:[%s6608_s14 + $0x48] sm:$0xff] %v3847_v44  ;;  %v4362_v49 = vadd.f32 %v4361_v47, %v4360_v45  ;;  %v4450_v50 = vadd.f32 %v4449_v48, %v4448_v46  ;;  %v4363_v51 = vpop.f32.mrb[70].mxu0  ;;  %v4451_v52 = vpop.f32.mrb[70].mxu1 }
 0x34a   : > { %v4364_v53 = vpop.f32.mrb[71].mxu0  ;;  %v4452_v54 = vpop.f32.mrb[71].mxu1 }
 0x34b   : > { %v3723_v59 = vadd.f32 %v4362_v49, %v6602_v29  ;;  %v4365_v60 = vadd.f32 %v4364_v53, %v4363_v51  ;;  %v4453_v61 = vadd.f32 %v4452_v54, %v4451_v52 }
 0x34d   : > { %v3852_v62 = vadd.f32 %v4450_v50, %v3723_v59  ;;  %v3726_v63 = vadd.f32 %v4365_v60, %v6602_v29 }
 0x34f   : > { %3916 = vst [vmem:[%s6608_s14 + $0x50] sm:$0xff] %v3852_v62  ;;  %v3855_v0 = vadd.f32 %v4453_v61, %v3726_v63  ;;  %v4366_v1 = vpop.f32.mrb[72].mxu0  ;;  %v4454_v2 = vpop.f32.mrb[72].mxu1 }
 0x350   : > { %v4367_v3 = vpop.f32.mrb[73].mxu0  ;;  %v4455_v4 = vpop.f32.mrb[73].mxu1 }
 0x351   : > { %3917 = vst [vmem:[%s6608_s14 + $0x58] sm:$0xff] %v3855_v0  ;;  %v4368_v5 = vadd.f32 %v4367_v3, %v4366_v1  ;;  %v4456_v6 = vadd.f32 %v4455_v4, %v4454_v2  ;;  %v4369_v7 = vpop.f32.mrb[74].mxu0  ;;  %v4457_v8 = vpop.f32.mrb[74].mxu1 }
 0x352   : > { %v4370_v9 = vpop.f32.mrb[75].mxu0  ;;  %v4458_v10 = vpop.f32.mrb[75].mxu1 }
 0x353   : > { %v3731_v11 = vadd.f32 %v4368_v5, %v6602_v29  ;;  %v4371_v12 = vadd.f32 %v4370_v9, %v4369_v7  ;;  %v4459_v13 = vadd.f32 %v4458_v10, %v4457_v8 }
 0x355   : > { %v3860_v14 = vadd.f32 %v4456_v6, %v3731_v11  ;;  %v3734_v15 = vadd.f32 %v4371_v12, %v6602_v29 }
 0x357   : > { %3918 = vst [vmem:[%s6608_s14 + $0x60] sm:$0xff] %v3860_v14  ;;  %v3863_v16 = vadd.f32 %v4459_v13, %v3734_v15  ;;  %v4372_v17 = vpop.f32.mrb[76].mxu0  ;;  %v4460_v18 = vpop.f32.mrb[76].mxu1 }
 0x358   : > { %v4373_v19 = vpop.f32.mrb[77].mxu0  ;;  %v4461_v20 = vpop.f32.mrb[77].mxu1 }
 0x359   : > { %3919 = vst [vmem:[%s6608_s14 + $0x68] sm:$0xff] %v3863_v16  ;;  %v4374_v21 = vadd.f32 %v4373_v19, %v4372_v17  ;;  %v4462_v22 = vadd.f32 %v4461_v20, %v4460_v18  ;;  %v4375_v23 = vpop.f32.mrb[78].mxu0  ;;  %v4463_v24 = vpop.f32.mrb[78].mxu1 }
 0x35a   : > { %v4376_v25 = vpop.f32.mrb[79].mxu0  ;;  %v4464_v55 = vpop.f32.mrb[79].mxu1 }
 0x35b   : > { %v3739_v26 = vadd.f32 %v4374_v21, %v6602_v29  ;;  %v4377_v56 = vadd.f32 %v4376_v25, %v4375_v23  ;;  %v4465_v27 = vadd.f32 %v4464_v55, %v4463_v24 }
 0x35d   : > { %v3868_v28 = vadd.f32 %v4462_v22, %v3739_v26  ;;  %v3742_v57 = vadd.f32 %v4377_v56, %v6602_v29 }
 0x35f   : > { %3920 = vst [vmem:[%s6608_s14 + $0x70] sm:$0xff] %v3868_v28  ;;  %v3871_v58 = vadd.f32 %v4465_v27, %v3742_v57  ;;  %v4378_v30 = vpop.f32.mrb[80].mxu0  ;;  %v4466_v31 = vpop.f32.mrb[80].mxu1 }
 0x360   : > { %v4379_v32 = vpop.f32.mrb[81].mxu0  ;;  %v4467_v33 = vpop.f32.mrb[81].mxu1 }
 0x361   : > { %3921 = vst [vmem:[%s6608_s14 + $0x78] sm:$0xff] %v3871_v58  ;;  %v4380_v34 = vadd.f32 %v4379_v32, %v4378_v30  ;;  %v4468_v35 = vadd.f32 %v4467_v33, %v4466_v31  ;;  %v4381_v36 = vpop.f32.mrb[82].mxu0  ;;  %v4469_v37 = vpop.f32.mrb[82].mxu1 }
 0x362   : > { %v4382_v38 = vpop.f32.mrb[83].mxu0  ;;  %v4470_v39 = vpop.f32.mrb[83].mxu1 }
 0x363   : > { %v3747_v40 = vadd.f32 %v4380_v34, %v6602_v29  ;;  %v4383_v41 = vadd.f32 %v4382_v38, %v4381_v36  ;;  %v4471_v42 = vadd.f32 %v4470_v39, %v4469_v37 }
 0x365   : > { %v3876_v43 = vadd.f32 %v4468_v35, %v3747_v40  ;;  %v3750_v44 = vadd.f32 %v4383_v41, %v6602_v29 }
 0x367   : > { %3922 = vst [vmem:[%s6608_s14 + $0x80] sm:$0xff] %v3876_v43  ;;  %v3879_v45 = vadd.f32 %v4471_v42, %v3750_v44  ;;  %v4384_v46 = vpop.f32.mrb[84].mxu0  ;;  %v4472_v47 = vpop.f32.mrb[84].mxu1 }
 0x368   : > { %v4385_v48 = vpop.f32.mrb[85].mxu0  ;;  %v4473_v49 = vpop.f32.mrb[85].mxu1 }
 0x369   : > { %3923 = vst [vmem:[%s6608_s14 + $0x88] sm:$0xff] %v3879_v45  ;;  %v4386_v50 = vadd.f32 %v4385_v48, %v4384_v46  ;;  %v4474_v51 = vadd.f32 %v4473_v49, %v4472_v47  ;;  %v4387_v52 = vpop.f32.mrb[86].mxu0  ;;  %v4475_v53 = vpop.f32.mrb[86].mxu1 }
 0x36a   : > { %v4388_v54 = vpop.f32.mrb[87].mxu0  ;;  %v4476_v59 = vpop.f32.mrb[87].mxu1 }
 0x36b   : > { %v3755_v60 = vadd.f32 %v4386_v50, %v6602_v29  ;;  %v4389_v61 = vadd.f32 %v4388_v54, %v4387_v52  ;;  %v4477_v62 = vadd.f32 %v4476_v59, %v4475_v53 }
 0x36d   : > { %v3884_v63 = vadd.f32 %v4474_v51, %v3755_v60  ;;  %v3758_v0 = vadd.f32 %v4389_v61, %v6602_v29 }
 0x36f   : > { %3924 = vst [vmem:[%s6608_s14 + $0x90] sm:$0xff] %v3884_v63  ;;  %v3887_v1 = vadd.f32 %v4477_v62, %v3758_v0  ;;  %v4390_v2 = vpop.f32.mrb[88].mxu0  ;;  %v4478_v3 = vpop.f32.mrb[88].mxu1 }
 0x370   : > { %v4391_v4 = vpop.f32.mrb[89].mxu0  ;;  %v4479_v5 = vpop.f32.mrb[89].mxu1 }
 0x371   : > { %3925 = vst [vmem:[%s6608_s14 + $0x98] sm:$0xff] %v3887_v1  ;;  %v4392_v6 = vadd.f32 %v4391_v4, %v4390_v2  ;;  %v4480_v7 = vadd.f32 %v4479_v5, %v4478_v3  ;;  %v4393_v8 = vpop.f32.mrb[90].mxu0  ;;  %v4481_v9 = vpop.f32.mrb[90].mxu1 }
 0x372   : > { %v4394_v10 = vpop.f32.mrb[91].mxu0  ;;  %v4482_v11 = vpop.f32.mrb[91].mxu1 }
 0x373   : > { %v3763_v12 = vadd.f32 %v4392_v6, %v6602_v29  ;;  %v4395_v13 = vadd.f32 %v4394_v10, %v4393_v8  ;;  %v4483_v14 = vadd.f32 %v4482_v11, %v4481_v9 }
 0x375   : > { %v3892_v15 = vadd.f32 %v4480_v7, %v3763_v12  ;;  %v3766_v16 = vadd.f32 %v4395_v13, %v6602_v29 }
 0x377   : > { %3926 = vst [vmem:[%s6608_s14 + $0xa0] sm:$0xff] %v3892_v15  ;;  %v3895_v17 = vadd.f32 %v4483_v14, %v3766_v16  ;;  %v4396_v18 = vpop.f32.mrb[92].mxu0  ;;  %v4484_v19 = vpop.f32.mrb[92].mxu1 }
 0x378   : > { %v4397_v20 = vpop.f32.mrb[93].mxu0  ;;  %v4485_v21 = vpop.f32.mrb[93].mxu1 }
 0x379   : > { %3927 = vst [vmem:[%s6608_s14 + $0xa8] sm:$0xff] %v3895_v17  ;;  %v4398_v22 = vadd.f32 %v4397_v20, %v4396_v18  ;;  %v4486_v23 = vadd.f32 %v4485_v21, %v4484_v19  ;;  %v4399_v24 = vpop.f32.mrb[94].mxu0  ;;  %v4487_v25 = vpop.f32.mrb[94].mxu1 }
 0x37a   : > { %v4400_v55 = vpop.f32.mrb[95].mxu0  ;;  %v4488_v26 = vpop.f32.mrb[95].mxu1 }
 0x37b   : > { %v3771_v56 = vadd.f32 %v4398_v22, %v6602_v29  ;;  %v4401_v27 = vadd.f32 %v4400_v55, %v4399_v24  ;;  %v4489_v28 = vadd.f32 %v4488_v26, %v4487_v25 }
 0x37d   : > { %v3900_v57 = vadd.f32 %v4486_v23, %v3771_v56  ;;  %v3774_v58 = vadd.f32 %v4401_v27, %v6602_v29 }
 0x37f   : > { %3928 = vst [vmem:[%s6608_s14 + $0xb0] sm:$0xff] %v3900_v57  ;;  %v3903_v30 = vadd.f32 %v4489_v28, %v3774_v58 }
 0x381   : > { %3929 = vst [vmem:[%s6608_s14 + $0xb8] sm:$0xff] %v3903_v30 }
 0x382   : > { %5321 = shalt.err (!%p5318_p3)
}
 0x383   : > { %s5322_s25 = scalar_lea.hbm %s6659_s26, 3072  ;;  %s5326_s11 = scalar_lea.hbm %s6713_s5, 6144 }
 0x384   : > { %p5323_p4 = scmp.ne.s32.totalorder %s6659_s26, %s5322_s25  ;;  %p5327_p9 = scmp.lt.u32.totalorder %s6659_s26, %s6713_s5 }
 0x385   : > { %p5328_p10 = scmp.lt.u32.totalorder %s5326_s11, %s5322_s25  ;;  %p5330_p12 = scmp.lt.u32.totalorder %s5322_s25, %s6659_s26 }
 0x386   : > { %p5324_p7 = pnand %p5323_p4, %p5443_p5 }
 0x387   : > { %p5329_p11 = por %p5328_p10, %p5327_p9 }
 0x388   : > { %p5325_p8 = pneg %p5324_p7 }
 0x389   : > { %p5331_p13 = por %p5330_p12, %p5329_p11 }
 0x38b   : > { %p5332_p0 = pnand %p5331_p13, %p5325_p8 }
 0x38d   : > { %5335 = shalt.err (!%p5332_p0)
}
 0x38e   : > { %s5373_s14 = smov 128   ;;  %s5374_s16 = smov 8  }
 0x38f   : > { %4875 = dma.vmem_to_hbm [thread:$0]  (%p5443_p5), %s6661_s17, 3072, %s6659_s26, %s6667_s22, %s5373_s14, %s5373_s14, %s5374_s16  }
 0x390 PF: > { %p4881_p1 = scmp.ge.s32.totalorder %s5370_s21, 2  ;;  %s3959_s23 = sand.u32 1, %s5358_s18  }
 0x391   : > { %s3960_s15 = scalar_lea.sflag [#allocation3], %s3959_s23 }
 0x392   : > { %p4878_p2 = pnand %p4881_p1, %p5447_p6 }
 0x394   : > { %5353 = dma.done.wait (!%p4878_p2), %s3960_s15, 3072  }
 0x395   : > { %5355 = vsyncadd (!%p4878_p2), %s3960_s15, 4294964224  ;;  %p15_p3 = scmp.ge.s32.totalorder %s5430_s24, 4   ;;  %s6716_s18 = smov %s5362_s19 }
 0x396   : > { %s6717_s19 = smov %s5366_s20  ;;  %s6718_s20 = smov %s5441_s27 }
 0x397   : > { %s6719_s21 = smov %s5430_s24  ;;  %17 = sbr.rel (!%p15_p3) target bundleno = 3 (0x3), region = 75 }
 0x39e   :  { %3965 = vsyncpa [#allocation3], 1 }
 0x39f   :  { %3967 = vsyncpa [#allocation3 + $0x1], 1 }

</bundles_post_ra>
